<compile_context>
chip_gen: v6e
topology: v6e:2x2x1
jax: 0.10.0
libtpu: 0.0.40
codegen_flags: <defaults>
</compile_context>

<pallas_src>
import functools

import jax
import jax.numpy as jnp
from jax.experimental import pallas as pl
from jax.experimental.pallas import tpu as pltpu

BN_EPS = 1e-5
_WPS_ALIGN = 16          # sublane tile: 8 rows (f32) / 16 rows (bf16) -> align to 16


# ---------------------------------------------------------------------------
# Fused kernel
# ---------------------------------------------------------------------------
def _fused_ir_kernel(*refs, stride, expand, use_residual, th, w_out, wps, hp, wp):
    """One grid step = one batch image x one block of `th` output rows.

    Inputs (zero-padded, parity-split, spatially flattened planes of the input):
      x_ref    : (1, P, F, Cin)    P = stride*stride planes, F = Hps * wps
      w_e/b_e  : (Cin, hidden), (1, hidden)     [expand only; BN scale folded into w_e]
      w_dw/b_dw: (9, hidden) f32, (1, hidden)   [BN scale folded]
      w_p/b_p  : (hidden, Cout), (1, Cout)      [BN scale folded]
      o_ref    : (1, th, W_out, Cout) f32
    """
    if expand:
        (x_ref, w_e_ref, b_e_ref, w_dw_ref, b_dw_ref, w_p_ref, b_p_ref, o_ref) = refs
    else:
        (x_ref, w_dw_ref, b_dw_ref, w_p_ref, b_p_ref, o_ref) = refs

    n_planes = stride * stride
    kmax = 2 // stride                       # extra plane-rows of halo per tile
    n_shift = kmax + 1                       # distinct depthwise column shifts
    hps = hp // stride

    r = pl.program_id(1)
    row_block = th * wps
    start = pl.multiple_of(r * row_block, _WPS_ALIGN)   # wps % 16 == 0
    win = (th + kmax) * wps                  # flattened plane rows needed for this tile
    L = (th - 1) * wps + w_out               # flat length covering every valid output

    # One contiguous window per parity plane, concatenated along the (tile-aligned)
    # leading axis so the expand below is a SINGLE MXU matmul (one weight push).
    if n_planes == 1:
        x_flat = x_ref[0, 0, pl.ds(start, win), :]
    else:
        x_flat = jnp.concatenate(
            [x_ref[0, p, pl.ds(start, win), :] for p in range(n_planes)], axis=0)

    if expand:
        # --- expand 1x1 (bf16 MXU operands, f32 accumulation) + bias + ReLU6 ----------
        h = jnp.dot(x_flat, w_e_ref[...], preferred_element_type=jnp.float32)
        h = jnp.clip(h + b_e_ref[...], 0.0, 6.0)

        # --- in-kernel zero-padding mask (replaces the old (P, F, 1) f32 mask input) --
        # PyTorch zero-pads the *hidden* activation before the depthwise conv, so the
        # expand output must be zeroed on the halo (x == 0 there but the bias is not).
        pcol = jax.lax.broadcasted_iota(jnp.int32, (wps, 1), 0)
        while pcol.shape[0] < win:            # period-`wps` column index, no vector div
            pcol = jnp.concatenate([pcol, pcol], axis=0)
        pcol = pcol[:win, :]
        lidx = jax.lax.broadcasted_iota(jnp.int32, (win, 1), 0)
        is_first = r == 0
        is_last = r == pl.num_programs(1) - 1
        plane_masks = []
        for p in range(n_planes):
            pr, pc = p // stride, p % stride
            lo = -(-(1 - pc) // stride)            # first valid plane-column
            hi = (wp - 2 - pc) // stride           # last valid plane-column
            valid = (pcol >= lo) & (pcol <= hi)
            if pr == 0:                            # padded-image row 0 lives here
                valid = valid & (jnp.logical_not(is_first) | (lidx >= wps))
            if (hps - 1) * stride + pr >= hp - 1:  # padded-image row Hp-1 lives here
                valid = valid & (jnp.logical_not(is_last) | (lidx < win - wps))
            plane_masks.append(valid.astype(jnp.float32))
        mask = plane_masks[0] if n_planes == 1 else jnp.concatenate(plane_masks, axis=0)
        h = h * mask
        hidden = h.shape[-1]
    else:
        # No expand: the zero-padded input itself is the hidden activation.
        h = x_flat.astype(jnp.float32)
        hidden = h.shape[-1]

    # --- depthwise 3x3 (f32 VPU).  Column shifts are applied ONCE to the slab so every
    # tap below is an aligned leading-axis slice (wps % 16 == 0 -> bases % 8 == 0). -----
    h_shift = [h] + [h[c:, :] for c in range(1, n_shift)]
    w_dw = w_dw_ref[...]
    acc = jnp.zeros((L, hidden), jnp.float32)
    for kh in range(3):
        for kw in range(3):
            p = (kh % stride) * stride + (kw % stride)
            base = p * win + (kh // stride) * wps
            c = kw // stride
            k = kh * 3 + kw
            acc = acc + h_shift[c][base:base + L, :] * w_dw[k:k + 1, :]
    d = jnp.clip(acc + b_dw_ref[...], 0.0, 6.0)

    # --- project 1x1 (bf16 MXU operands, f32 accumulation) + bias (+ residual, f32) ---
    y = jnp.dot(d.astype(w_p_ref.dtype), w_p_ref[...],
                preferred_element_type=jnp.float32) + b_p_ref[...]
    if use_residual:
        y = y + x_flat[wps + 1:wps + 1 + L, :].astype(jnp.float32)

    # --- store the valid output rows (scratch columns j >= w_out are dropped) ---------
    # NOTE: with Cout < 128 these are lane-masked stores; padding Cout to 128 would make
    # them dense but multiplies HBM write traffic, so it is intentionally not done here.
    for i in range(th):
        o_ref[0, i] = y[i * wps:i * wps + w_out, :].astype(o_ref.dtype)


# ---------------------------------------------------------------------------
# Wrapper (tiling choice + pallas_call)
# ---------------------------------------------------------------------------
def _vmem_capacity_bytes():
    try:
        return int(pltpu.get_tpu_info().vmem_capacity_bytes)
    except Exception:
        return 64 * 1024 * 1024          # conservative fallback (v7x-sized)


def _choose_row_tile(h_out, wps, cin, hidden, cout, kmax, n_planes, n_batch,
                     act_bytes, budget_bytes):
    """Largest divisor of h_out whose per-step working set fits the VMEM budget.

    The ">= 2 row blocks" preference (second TensorCore on v7x) is applied only when the
    batch axis cannot already supply a second grid step; on single-core chips a larger
    tile is always at least as good.
    """
    n_shift = kmax + 1

    def cost(th):
        win = (th + kmax) * wps
        flat = th * wps
        hid = n_planes * win * hidden * 4 * n_shift    # h + column-shifted copies (f32)
        dw = 2 * flat * hidden * 4                     # depthwise accumulator + d
        proj = flat * cout * 4                         # projected slab
        xwin = n_planes * win * cin * act_bytes        # input window value
        out_blk = 2 * th * wps * cout * 4              # double-buffered output block
        return hid + dw + proj + xwin + out_blk

    divisors = [d for d in range(1, h_out + 1) if h_out % d == 0]
    fitting = [d for d in divisors if cost(d) <= budget_bytes] or [1]
    if n_batch >= 2:
        return max(fitting)
    parallel = [d for d in fitting if h_out // d >= 2]
    return max(parallel) if parallel else max(fitting)


def inverted_residual_forward(params, x_nchw, *, in_channels, out_channels, stride,
                              expand_ratio, row_tile=None, mxu_dtype=jnp.bfloat16):
    assert stride in (1, 2)
    use_residual = (stride == 1) and (in_channels == out_channels)
    expand = expand_ratio != 1
    act_bytes = jnp.dtype(mxu_dtype).itemsize

    # NCHW -> NHWC and cast the activation to the MXU operand dtype (bf16 by default:
    # full-rate MXU + half the HBM traffic of the wrapper pad/split passes).
    x = jnp.transpose(x_nchw, (0, 2, 3, 1)).astype(mxu_dtype)
    N, H, W, _ = x.shape
    if stride == 2:
        # TODO(synk): odd spatial dims with stride=2 would need unequal parity planes.
        assert H % 2 == 0 and W % 2 == 0
    Hp, Wp = H + 2, W + 2
    H_out = (H - 1) // stride + 1
    W_out = (W - 1) // stride + 1
    P = stride * stride
    Hps = Hp // stride
    # Pad each parity plane's width to a multiple of 16 so all flat-row offsets used in
    # the kernel are sublane-tile aligned for both f32 and bf16.
    wps = -(-(Wp // stride) // _WPS_ALIGN) * _WPS_ALIGN
    F = Hps * wps
    kmax = 2 // stride

    # Zero-pad once (conv halo + alignment scratch columns) and split into parity planes,
    # spatially flattened so the kernel only takes contiguous leading-axis windows.
    xpad = jnp.pad(x, ((0, 0), (1, 1), (1, wps * stride - W - 1), (0, 0)))
    planes = [xpad[:, p::stride, q::stride, :] for p in range(stride) for q in range(stride)]
    x_planes = jnp.stack(planes, axis=1).reshape(N, P, F, in_channels)

    # Fold BN scales into conv weights on the host; 1x1-conv weights go to the MXU dtype.
    sd, bd = params["bn_dw"]
    w_dw = (params["w_dw"] * sd[None, :]).astype(jnp.float32)      # VPU path stays f32
    sp, bp = params["bn_proj"]
    w_p = (params["w_proj"] * sp[None, :]).astype(mxu_dtype)
    if expand:
        se, be = params["bn_expand"]
        w_e = (params["w_expand"] * se[None, :]).astype(mxu_dtype)
        hidden = w_e.shape[1]
    else:
        hidden = in_channels

    # Generation-aware VMEM budgeting (v7x: 64 MiB/core, v5e/v6e: 128 MiB).
    vmem_limit = max(16 * 1024 * 1024, int(0.75 * _vmem_capacity_bytes()))
    resident = 2 * P * F * in_channels * act_bytes                         # input block, 2 bufs
    resident += 2 * act_bytes * (in_channels * hidden + hidden * out_channels)
    resident += 2 * 4 * (11 * hidden + out_channels)                       # f32 dw weights+biases
    budget = max(2 << 20, int(0.55 * vmem_limit) - resident)

    th = row_tile if row_tile is not None else _choose_row_tile(
        H_out, wps, in_channels, hidden, out_channels, kmax, P, N, act_bytes, budget)
    assert H_out % th == 0, "row tile must divide the output height"
    R = H_out // th

    in_specs = [pl.BlockSpec((1, P, F, in_channels), lambda n, r: (n, 0, 0, 0))]
    args = [x_planes]
    if expand:
        in_specs += [
            pl.BlockSpec((in_channels, hidden), lambda n, r: (0, 0)),
            pl.BlockSpec((1, hidden), lambda n, r: (0, 0)),
        ]
        args += [w_e, be.reshape(1, hidden)]
    in_specs += [
        pl.BlockSpec((9, hidden), lambda n, r: (0, 0)),
        pl.BlockSpec((1, hidden), lambda n, r: (0, 0)),
        pl.BlockSpec((hidden, out_channels), lambda n, r: (0, 0)),
        pl.BlockSpec((1, out_channels), lambda n, r: (0, 0)),
    ]
    args += [w_dw, bd.reshape(1, hidden), w_p, bp.reshape(1, out_channels)]
    # NOTE: on v7x, pipeline_mode=pl.Buffered(1) on the constant-index weight/bias specs
    # would halve their (already small) residency; left at the default for portability.

    kernel = functools.partial(
        _fused_ir_kernel, stride=stride, expand=expand, use_residual=use_residual,
        th=th, w_out=W_out, wps=wps, hp=Hp, wp=Wp)

    y = pl.pallas_call(
        kernel,
        out_shape=jax.ShapeDtypeStruct((N, H_out, W_out, out_channels), jnp.float32),
        grid_spec=pltpu.PrefetchScalarGridSpec(
            num_scalar_prefetch=0,
            grid=(N, R),
            in_specs=in_specs,
            out_specs=pl.BlockSpec((1, th, W_out, out_channels),
                                   lambda n, r: (n, r, 0, 0)),
        ),
        compiler_params=pltpu.CompilerParams(
            dimension_semantics=("parallel", "parallel"),
            vmem_limit_bytes=vmem_limit),
    )(*args)
    return jnp.transpose(y, (0, 3, 1, 2))  # NHWC -> NCHW


# ---------------------------------------------------------------------------
# Parameter construction (deterministic, matches nn module shapes)
# ---------------------------------------------------------------------------
def _fuse_bn(gamma, beta, mean, var):
    scale = gamma / jnp.sqrt(var + BN_EPS)
    bias = beta - mean * scale
    return scale.astype(jnp.float32), bias.astype(jnp.float32)


def _bn_params(key, c):
    k1, k2, k3, k4 = jax.random.split(key, 4)
    gamma = 1.0 + 0.1 * jax.random.normal(k1, (c,), jnp.float32)
    beta = 0.1 * jax.random.normal(k2, (c,), jnp.float32)
    mean = 0.1 * jax.random.normal(k3, (c,), jnp.float32)
    var = jax.random.uniform(k4, (c,), jnp.float32, 0.5, 1.5)
    return _fuse_bn(gamma, beta, mean, var)


def make_params(key, in_channels, out_channels, expand_ratio):
    hidden = round(in_channels * expand_ratio)
    keys = jax.random.split(key, 8)
    params = {}
    if expand_ratio != 1:
        # torch Conv2d(in, hidden, 1) weight (hidden, in, 1, 1) -> stored (in, hidden)
        params["w_expand"] = 0.2 * jax.random.normal(keys[0], (in_channels, hidden), jnp.float32)
        params["bn_expand"] = _bn_params(keys[1], hidden)
    # torch depthwise Conv2d weight (hidden, 1, 3, 3) -> stored (9, hidden), index kh*3+kw
    params["w_dw"] = 0.2 * jax.random.normal(keys[2], (9, hidden), jnp.float32)
    params["bn_dw"] = _bn_params(keys[3], hidden)
    # torch Conv2d(hidden, out, 1) weight (out, hidden, 1, 1) -> stored (hidden, out)
    params["w_proj"] = 0.2 * jax.random.normal(keys[4], (hidden, out_channels), jnp.float32)
    params["bn_proj"] = _bn_params(keys[5], out_channels)
    return params


# ---------------------------------------------------------------------------
# Pure-JAX reference (PyTorch semantics, all f32)
# ---------------------------------------------------------------------------
def inverted_residual_ref(params, x_nchw, *, in_channels, out_channels, stride, expand_ratio):
    use_residual = (stride == 1) and (in_channels == out_channels)
    x = jnp.transpose(x_nchw, (0, 2, 3, 1)).astype(jnp.float32)
    N, H, W, _ = x.shape
    if expand_ratio != 1:
        s, b = params["bn_expand"]
        w_e = params["w_expand"] * s[None, :]
        h = jnp.clip(jnp.einsum("nhwc,cd->nhwd", x, w_e) + b, 0.0, 6.0)
    else:
        h = x
    sd, bd = params["bn_dw"]
    w_dw = params["w_dw"] * sd[None, :]
    xp = jnp.pad(h, ((0, 0), (1, 1), (1, 1), (0, 0)))
    acc = jnp.zeros_like(h)
    for kh in range(3):
        for kw in range(3):
            acc = acc + xp[:, kh:kh + H, kw:kw + W, :] * w_dw[kh * 3 + kw]
    h = jnp.clip(acc + bd, 0.0, 6.0)[:, ::stride, ::stride, :]
    sp, bp = params["bn_proj"]
    w_p = params["w_proj"] * sp[None, :]
    y = jnp.einsum("nhwc,cd->nhwd", h, w_p) + bp
    if use_residual:
        y = y + x
    return jnp.transpose(y, (0, 3, 1, 2))


# ---------------------------------------------------------------------------
if __name__ == "__main__":
    key = jax.random.PRNGKey(0)
    N, H, W = 2, 16, 16
    configs = [
        dict(in_channels=8, out_channels=8, stride=1, expand_ratio=4),    # residual branch
        dict(in_channels=8, out_channels=16, stride=2, expand_ratio=4),   # strided (parity planes)
        dict(in_channels=8, out_channels=8, stride=1, expand_ratio=1),    # no-expand branch
    ]
    for i, cfg in enumerate(configs):
        kx, kp, key = jax.random.split(key, 3)
        x = jax.random.normal(kx, (N, cfg["in_channels"], H, W), jnp.float32)  # NCHW input
        params = make_params(kp, cfg["in_channels"], cfg["out_channels"], cfg["expand_ratio"])
        ref = inverted_residual_ref(params, x, **cfg)
        h_out = (H - 1) // cfg["stride"] + 1
        w_out = (W - 1) // cfg["stride"] + 1

        # Default (performance) path: bf16 MXU operands, f32 accumulation / VPU math.
        out = jax.block_until_ready(inverted_residual_forward(params, x, **cfg))
        assert out.shape == (N, cfg["out_channels"], h_out, w_out), out.shape
        assert jnp.allclose(out, ref, rtol=5e-2, atol=5e-2), f"bf16-path mismatch (cfg {i})"

        # f32-MXU mode isolates the kernel structure (tiling / taps / mask / residual).
        out_f32 = jax.block_until_ready(
            inverted_residual_forward(params, x, mxu_dtype=jnp.float32, **cfg))
        assert jnp.allclose(out_f32, ref, rtol=1e-4, atol=1e-4), f"f32-path mismatch (cfg {i})"
    print("KERNEL_OK")
</pallas_src>

<mosaic_0001>
module attributes {stable_mosaic.version = 11 : i64} {
  func.func @_fused_ir_kernel(%arg0: i32, %arg1: i32, %arg2: memref<1x1x576x8xbf16, #tpu.memory_space<vmem>>, %arg3: memref<8x32xbf16, #tpu.memory_space<vmem>>, %arg4: memref<1x32xf32, #tpu.memory_space<vmem>>, %arg5: memref<9x32xf32, #tpu.memory_space<vmem>>, %arg6: memref<1x32xf32, #tpu.memory_space<vmem>>, %arg7: memref<32x8xbf16, #tpu.memory_space<vmem>>, %arg8: memref<1x8xf32, #tpu.memory_space<vmem>>, %arg9: memref<1x16x16x8xf32, #tpu.memory_space<vmem>>) attributes {dimension_semantics = [#tpu.dimension_semantics<parallel>, #tpu.dimension_semantics<parallel>], iteration_bounds = array<i64: 2, 1>, scalar_prefetch = 0 : i64, scratch_operands = 0 : i64, tpu.core_type = #tpu.core_type<tc>, window_params = [{transform_indices = @transform_0, window_bounds = array<i64: 1, 1, 576, 8>}, {pipeline_mode = #tpu.pipeline_mode<synchronous>, transform_indices = @transform_1, window_bounds = array<i64: 8, 32>}, {pipeline_mode = #tpu.pipeline_mode<synchronous>, transform_indices = @transform_2, window_bounds = array<i64: 1, 32>}, {pipeline_mode = #tpu.pipeline_mode<synchronous>, transform_indices = @transform_3, window_bounds = array<i64: 9, 32>}, {pipeline_mode = #tpu.pipeline_mode<synchronous>, transform_indices = @transform_4, window_bounds = array<i64: 1, 32>}, {pipeline_mode = #tpu.pipeline_mode<synchronous>, transform_indices = @transform_5, window_bounds = array<i64: 32, 8>}, {pipeline_mode = #tpu.pipeline_mode<synchronous>, transform_indices = @transform_6, window_bounds = array<i64: 1, 8>}, {transform_indices = @transform_7, window_bounds = array<i64: 1, 16, 16, 8>}]} {
    %c512_i32 = arith.constant 512 : i32
    %0 = arith.muli %arg1, %c512_i32 : i32
    %1 = tpu.assume_multiple %0, 16 : i32
    %c0 = arith.constant 0 : index
    %c0_0 = arith.constant 0 : index
    %2 = arith.index_cast %1 : i32 to index
    %c0_1 = arith.constant 0 : index
    %3 = vector.load %arg2[%c0, %c0_0, %2, %c0_1] : memref<1x1x576x8xbf16, #tpu.memory_space<vmem>>, vector<1x1x576x8xbf16>
    %4 = vector.shape_cast %3 : vector<1x1x576x8xbf16> to vector<576x8xbf16>
    %c0_2 = arith.constant 0 : index
    %c0_3 = arith.constant 0 : index
    %5 = vector.load %arg3[%c0_2, %c0_3] : memref<8x32xbf16, #tpu.memory_space<vmem>>, vector<8x32xbf16>
    %cst = arith.constant dense<0.000000e+00> : vector<576x32xf32>
    %6 = tpu.matmul %4, %5, %cst {dimension_numbers = #tpu.dot_dimension_numbers<[1], [0], [0], [1], [0, 0, 1, 1], [], []>} : vector<576x8xbf16>, vector<8x32xbf16>, vector<576x32xf32> -> vector<576x32xf32>
    %c0_4 = arith.constant 0 : index
    %c0_5 = arith.constant 0 : index
    %7 = vector.load %arg4[%c0_4, %c0_5] : memref<1x32xf32, #tpu.memory_space<vmem>>, vector<1x32xf32>
    %8 = vector.broadcast %7 : vector<1x32xf32> to vector<576x32xf32>
    %9 = arith.addf %6, %8 : vector<576x32xf32>
    %cst_6 = arith.constant 0.000000e+00 : f32
    %cst_7 = arith.constant 6.000000e+00 : f32
    %10 = vector.broadcast %cst_6 : f32 to vector<576x32xf32>
    %11 = arith.maximumf %10, %9 : vector<576x32xf32>
    %12 = vector.broadcast %cst_7 : f32 to vector<576x32xf32>
    %13 = arith.minimumf %12, %11 : vector<576x32xf32>
    %14 = tpu.iota {dimensions = array<i32: 0>} : vector<32x1xi32>
    %15 = tpu.concatenate %14, %14 in 0 : vector<32x1xi32>, vector<32x1xi32> -> vector<64x1xi32>
    %16 = tpu.concatenate %15, %15 in 0 : vector<64x1xi32>, vector<64x1xi32> -> vector<128x1xi32>
    %17 = tpu.concatenate %16, %16 in 0 : vector<128x1xi32>, vector<128x1xi32> -> vector<256x1xi32>
    %18 = tpu.concatenate %17, %17 in 0 : vector<256x1xi32>, vector<256x1xi32> -> vector<512x1xi32>
    %19 = tpu.concatenate %18, %18 in 0 : vector<512x1xi32>, vector<512x1xi32> -> vector<1024x1xi32>
    %20 = vector.extract_strided_slice %19 {offsets = [0, 0], sizes = [576, 1], strides = [1, 1]} : vector<1024x1xi32> to vector<576x1xi32>
    %21 = tpu.iota {dimensions = array<i32: 0>} : vector<576x1xi32>
    %c0_i32 = arith.constant 0 : i32
    %22 = arith.cmpi eq, %arg1, %c0_i32 : i32
    %c0_i32_8 = arith.constant 0 : i32
    %23 = arith.cmpi eq, %arg1, %c0_i32_8 : i32
    %c1_i32 = arith.constant 1 : i32
    %24 = vector.broadcast %c1_i32 : i32 to vector<576x1xi32>
    %25 = arith.cmpi sge, %20, %24 : vector<576x1xi32>
    %c16_i32 = arith.constant 16 : i32
    %26 = vector.broadcast %c16_i32 : i32 to vector<576x1xi32>
    %27 = arith.cmpi sle, %20, %26 : vector<576x1xi32>
    %28 = arith.andi %25, %27 : vector<576x1xi1>
    %true = arith.constant true
    %29 = arith.xori %22, %true : i1
    %c32_i32 = arith.constant 32 : i32
    %30 = vector.broadcast %c32_i32 : i32 to vector<576x1xi32>
    %31 = arith.cmpi sge, %21, %30 : vector<576x1xi32>
    %32 = vector.broadcast %29 : i1 to vector<576x1xi1>
    %33 = arith.ori %32, %31 : vector<576x1xi1>
    %34 = arith.andi %28, %33 : vector<576x1xi1>
    %true_9 = arith.constant true
    %35 = arith.xori %23, %true_9 : i1
    %c544_i32 = arith.constant 544 : i32
    %36 = vector.broadcast %c544_i32 : i32 to vector<576x1xi32>
    %37 = arith.cmpi slt, %21, %36 : vector<576x1xi32>
    %38 = vector.broadcast %35 : i1 to vector<576x1xi1>
    %39 = arith.ori %38, %37 : vector<576x1xi1>
    %40 = arith.andi %34, %39 : vector<576x1xi1>
    %41 = arith.extui %40 : vector<576x1xi1> to vector<576x1xi32>
    %42 = arith.sitofp %41 : vector<576x1xi32> to vector<576x1xf32>
    %43 = vector.broadcast %42 : vector<576x1xf32> to vector<576x32xf32>
    %44 = arith.mulf %13, %43 : vector<576x32xf32>
    %45 = vector.extract_strided_slice %44 {offsets = [1, 0], sizes = [575, 32], strides = [1, 1]} : vector<576x32xf32> to vector<575x32xf32>
    %46 = vector.extract_strided_slice %44 {offsets = [2, 0], sizes = [574, 32], strides = [1, 1]} : vector<576x32xf32> to vector<574x32xf32>
    %c0_10 = arith.constant 0 : index
    %c0_11 = arith.constant 0 : index
    %47 = vector.load %arg5[%c0_10, %c0_11] : memref<9x32xf32, #tpu.memory_space<vmem>>, vector<9x32xf32>
    %cst_12 = arith.constant 0.000000e+00 : f32
    %48 = vector.broadcast %cst_12 : f32 to vector<496x32xf32>
    %49 = vector.extract_strided_slice %44 {offsets = [0, 0], sizes = [496, 32], strides = [1, 1]} : vector<576x32xf32> to vector<496x32xf32>
    %50 = vector.extract_strided_slice %47 {offsets = [0, 0], sizes = [1, 32], strides = [1, 1]} : vector<9x32xf32> to vector<1x32xf32>
    %51 = vector.broadcast %50 : vector<1x32xf32> to vector<496x32xf32>
    %52 = arith.mulf %49, %51 : vector<496x32xf32>
    %53 = arith.addf %48, %52 : vector<496x32xf32>
    %54 = vector.extract_strided_slice %45 {offsets = [0, 0], sizes = [496, 32], strides = [1, 1]} : vector<575x32xf32> to vector<496x32xf32>
    %55 = vector.extract_strided_slice %47 {offsets = [1, 0], sizes = [1, 32], strides = [1, 1]} : vector<9x32xf32> to vector<1x32xf32>
    %56 = vector.broadcast %55 : vector<1x32xf32> to vector<496x32xf32>
    %57 = arith.mulf %54, %56 : vector<496x32xf32>
    %58 = arith.addf %53, %57 : vector<496x32xf32>
    %59 = vector.extract_strided_slice %46 {offsets = [0, 0], sizes = [496, 32], strides = [1, 1]} : vector<574x32xf32> to vector<496x32xf32>
    %60 = vector.extract_strided_slice %47 {offsets = [2, 0], sizes = [1, 32], strides = [1, 1]} : vector<9x32xf32> to vector<1x32xf32>
    %61 = vector.broadcast %60 : vector<1x32xf32> to vector<496x32xf32>
    %62 = arith.mulf %59, %61 : vector<496x32xf32>
    %63 = arith.addf %58, %62 : vector<496x32xf32>
    %64 = vector.extract_strided_slice %44 {offsets = [32, 0], sizes = [496, 32], strides = [1, 1]} : vector<576x32xf32> to vector<496x32xf32>
    %65 = vector.extract_strided_slice %47 {offsets = [3, 0], sizes = [1, 32], strides = [1, 1]} : vector<9x32xf32> to vector<1x32xf32>
    %66 = vector.broadcast %65 : vector<1x32xf32> to vector<496x32xf32>
    %67 = arith.mulf %64, %66 : vector<496x32xf32>
    %68 = arith.addf %63, %67 : vector<496x32xf32>
    %69 = vector.extract_strided_slice %45 {offsets = [32, 0], sizes = [496, 32], strides = [1, 1]} : vector<575x32xf32> to vector<496x32xf32>
    %70 = vector.extract_strided_slice %47 {offsets = [4, 0], sizes = [1, 32], strides = [1, 1]} : vector<9x32xf32> to vector<1x32xf32>
    %71 = vector.broadcast %70 : vector<1x32xf32> to vector<496x32xf32>
    %72 = arith.mulf %69, %71 : vector<496x32xf32>
    %73 = arith.addf %68, %72 : vector<496x32xf32>
    %74 = vector.extract_strided_slice %46 {offsets = [32, 0], sizes = [496, 32], strides = [1, 1]} : vector<574x32xf32> to vector<496x32xf32>
    %75 = vector.extract_strided_slice %47 {offsets = [5, 0], sizes = [1, 32], strides = [1, 1]} : vector<9x32xf32> to vector<1x32xf32>
    %76 = vector.broadcast %75 : vector<1x32xf32> to vector<496x32xf32>
    %77 = arith.mulf %74, %76 : vector<496x32xf32>
    %78 = arith.addf %73, %77 : vector<496x32xf32>
    %79 = vector.extract_strided_slice %44 {offsets = [64, 0], sizes = [496, 32], strides = [1, 1]} : vector<576x32xf32> to vector<496x32xf32>
    %80 = vector.extract_strided_slice %47 {offsets = [6, 0], sizes = [1, 32], strides = [1, 1]} : vector<9x32xf32> to vector<1x32xf32>
    %81 = vector.broadcast %80 : vector<1x32xf32> to vector<496x32xf32>
    %82 = arith.mulf %79, %81 : vector<496x32xf32>
    %83 = arith.addf %78, %82 : vector<496x32xf32>
    %84 = vector.extract_strided_slice %45 {offsets = [64, 0], sizes = [496, 32], strides = [1, 1]} : vector<575x32xf32> to vector<496x32xf32>
    %85 = vector.extract_strided_slice %47 {offsets = [7, 0], sizes = [1, 32], strides = [1, 1]} : vector<9x32xf32> to vector<1x32xf32>
    %86 = vector.broadcast %85 : vector<1x32xf32> to vector<496x32xf32>
    %87 = arith.mulf %84, %86 : vector<496x32xf32>
    %88 = arith.addf %83, %87 : vector<496x32xf32>
    %89 = vector.extract_strided_slice %46 {offsets = [64, 0], sizes = [496, 32], strides = [1, 1]} : vector<574x32xf32> to vector<496x32xf32>
    %90 = vector.extract_strided_slice %47 {offsets = [8, 0], sizes = [1, 32], strides = [1, 1]} : vector<9x32xf32> to vector<1x32xf32>
    %91 = vector.broadcast %90 : vector<1x32xf32> to vector<496x32xf32>
    %92 = arith.mulf %89, %91 : vector<496x32xf32>
    %93 = arith.addf %88, %92 : vector<496x32xf32>
    %c0_13 = arith.constant 0 : index
    %c0_14 = arith.constant 0 : index
    %94 = vector.load %arg6[%c0_13, %c0_14] : memref<1x32xf32, #tpu.memory_space<vmem>>, vector<1x32xf32>
    %95 = vector.broadcast %94 : vector<1x32xf32> to vector<496x32xf32>
    %96 = arith.addf %93, %95 : vector<496x32xf32>
    %cst_15 = arith.constant 0.000000e+00 : f32
    %cst_16 = arith.constant 6.000000e+00 : f32
    %97 = vector.broadcast %cst_15 : f32 to vector<496x32xf32>
    %98 = arith.maximumf %97, %96 : vector<496x32xf32>
    %99 = vector.broadcast %cst_16 : f32 to vector<496x32xf32>
    %100 = arith.minimumf %99, %98 : vector<496x32xf32>
    %101 = arith.truncf %100 : vector<496x32xf32> to vector<496x32xbf16>
    %c0_17 = arith.constant 0 : index
    %c0_18 = arith.constant 0 : index
    %102 = vector.load %arg7[%c0_17, %c0_18] : memref<32x8xbf16, #tpu.memory_space<vmem>>, vector<32x8xbf16>
    %cst_19 = arith.constant dense<0.000000e+00> : vector<496x8xf32>
    %103 = tpu.matmul %101, %102, %cst_19 {dimension_numbers = #tpu.dot_dimension_numbers<[1], [0], [0], [1], [0, 0, 1, 1], [], []>} : vector<496x32xbf16>, vector<32x8xbf16>, vector<496x8xf32> -> vector<496x8xf32>
    %c0_20 = arith.constant 0 : index
    %c0_21 = arith.constant 0 : index
    %104 = vector.load %arg8[%c0_20, %c0_21] : memref<1x8xf32, #tpu.memory_space<vmem>>, vector<1x8xf32>
    %105 = vector.broadcast %104 : vector<1x8xf32> to vector<496x8xf32>
    %106 = arith.addf %103, %105 : vector<496x8xf32>
    %107 = vector.extract_strided_slice %4 {offsets = [33, 0], sizes = [496, 8], strides = [1, 1]} : vector<576x8xbf16> to vector<496x8xbf16>
    %108 = arith.extf %107 : vector<496x8xbf16> to vector<496x8xf32>
    %109 = arith.addf %106, %108 : vector<496x8xf32>
    %110 = vector.extract_strided_slice %109 {offsets = [0, 0], sizes = [16, 8], strides = [1, 1]} : vector<496x8xf32> to vector<16x8xf32>
    %c0_22 = arith.constant 0 : index
    %c0_23 = arith.constant 0 : index
    %c0_24 = arith.constant 0 : index
    %c0_25 = arith.constant 0 : index
    %111 = vector.load %arg9[%c0_22, %c0_23, %c0_24, %c0_25] : memref<1x16x16x8xf32, #tpu.memory_space<vmem>>, vector<1x1x16x8xf32>
    %112 = vector.shape_cast %111 : vector<1x1x16x8xf32> to vector<16x8xf32>
    %113 = vector.shape_cast %110 : vector<16x8xf32> to vector<1x1x16x8xf32>
    tpu.vector_store %arg9[%c0_22, %c0_23, %c0_24, %c0_25], %113 {strides = array<i32>} : memref<1x16x16x8xf32, #tpu.memory_space<vmem>>, vector<1x1x16x8xf32>,
    %114 = vector.extract_strided_slice %109 {offsets = [32, 0], sizes = [16, 8], strides = [1, 1]} : vector<496x8xf32> to vector<16x8xf32>
    %c0_26 = arith.constant 0 : index
    %c1 = arith.constant 1 : index
    %c0_27 = arith.constant 0 : index
    %c0_28 = arith.constant 0 : index
    %115 = vector.load %arg9[%c0_26, %c1, %c0_27, %c0_28] : memref<1x16x16x8xf32, #tpu.memory_space<vmem>>, vector<1x1x16x8xf32>
    %116 = vector.shape_cast %115 : vector<1x1x16x8xf32> to vector<16x8xf32>
    %117 = vector.shape_cast %114 : vector<16x8xf32> to vector<1x1x16x8xf32>
    tpu.vector_store %arg9[%c0_26, %c1, %c0_27, %c0_28], %117 {strides = array<i32>} : memref<1x16x16x8xf32, #tpu.memory_space<vmem>>, vector<1x1x16x8xf32>,
    %118 = vector.extract_strided_slice %109 {offsets = [64, 0], sizes = [16, 8], strides = [1, 1]} : vector<496x8xf32> to vector<16x8xf32>
    %c0_29 = arith.constant 0 : index
    %c2 = arith.constant 2 : index
    %c0_30 = arith.constant 0 : index
    %c0_31 = arith.constant 0 : index
    %119 = vector.load %arg9[%c0_29, %c2, %c0_30, %c0_31] : memref<1x16x16x8xf32, #tpu.memory_space<vmem>>, vector<1x1x16x8xf32>
    %120 = vector.shape_cast %119 : vector<1x1x16x8xf32> to vector<16x8xf32>
    %121 = vector.shape_cast %118 : vector<16x8xf32> to vector<1x1x16x8xf32>
    tpu.vector_store %arg9[%c0_29, %c2, %c0_30, %c0_31], %121 {strides = array<i32>} : memref<1x16x16x8xf32, #tpu.memory_space<vmem>>, vector<1x1x16x8xf32>,
    %122 = vector.extract_strided_slice %109 {offsets = [96, 0], sizes = [16, 8], strides = [1, 1]} : vector<496x8xf32> to vector<16x8xf32>
    %c0_32 = arith.constant 0 : index
    %c3 = arith.constant 3 : index
    %c0_33 = arith.constant 0 : index
    %c0_34 = arith.constant 0 : index
    %123 = vector.load %arg9[%c0_32, %c3, %c0_33, %c0_34] : memref<1x16x16x8xf32, #tpu.memory_space<vmem>>, vector<1x1x16x8xf32>
    %124 = vector.shape_cast %123 : vector<1x1x16x8xf32> to vector<16x8xf32>
    %125 = vector.shape_cast %122 : vector<16x8xf32> to vector<1x1x16x8xf32>
    tpu.vector_store %arg9[%c0_32, %c3, %c0_33, %c0_34], %125 {strides = array<i32>} : memref<1x16x16x8xf32, #tpu.memory_space<vmem>>, vector<1x1x16x8xf32>,
    %126 = vector.extract_strided_slice %109 {offsets = [128, 0], sizes = [16, 8], strides = [1, 1]} : vector<496x8xf32> to vector<16x8xf32>
    %c0_35 = arith.constant 0 : index
    %c4 = arith.constant 4 : index
    %c0_36 = arith.constant 0 : index
    %c0_37 = arith.constant 0 : index
    %127 = vector.load %arg9[%c0_35, %c4, %c0_36, %c0_37] : memref<1x16x16x8xf32, #tpu.memory_space<vmem>>, vector<1x1x16x8xf32>
    %128 = vector.shape_cast %127 : vector<1x1x16x8xf32> to vector<16x8xf32>
    %129 = vector.shape_cast %126 : vector<16x8xf32> to vector<1x1x16x8xf32>
    tpu.vector_store %arg9[%c0_35, %c4, %c0_36, %c0_37], %129 {strides = array<i32>} : memref<1x16x16x8xf32, #tpu.memory_space<vmem>>, vector<1x1x16x8xf32>,
    %130 = vector.extract_strided_slice %109 {offsets = [160, 0], sizes = [16, 8], strides = [1, 1]} : vector<496x8xf32> to vector<16x8xf32>
    %c0_38 = arith.constant 0 : index
    %c5 = arith.constant 5 : index
    %c0_39 = arith.constant 0 : index
    %c0_40 = arith.constant 0 : index
    %131 = vector.load %arg9[%c0_38, %c5, %c0_39, %c0_40] : memref<1x16x16x8xf32, #tpu.memory_space<vmem>>, vector<1x1x16x8xf32>
    %132 = vector.shape_cast %131 : vector<1x1x16x8xf32> to vector<16x8xf32>
    %133 = vector.shape_cast %130 : vector<16x8xf32> to vector<1x1x16x8xf32>
    tpu.vector_store %arg9[%c0_38, %c5, %c0_39, %c0_40], %133 {strides = array<i32>} : memref<1x16x16x8xf32, #tpu.memory_space<vmem>>, vector<1x1x16x8xf32>,
    %134 = vector.extract_strided_slice %109 {offsets = [192, 0], sizes = [16, 8], strides = [1, 1]} : vector<496x8xf32> to vector<16x8xf32>
    %c0_41 = arith.constant 0 : index
    %c6 = arith.constant 6 : index
    %c0_42 = arith.constant 0 : index
    %c0_43 = arith.constant 0 : index
    %135 = vector.load %arg9[%c0_41, %c6, %c0_42, %c0_43] : memref<1x16x16x8xf32, #tpu.memory_space<vmem>>, vector<1x1x16x8xf32>
    %136 = vector.shape_cast %135 : vector<1x1x16x8xf32> to vector<16x8xf32>
    %137 = vector.shape_cast %134 : vector<16x8xf32> to vector<1x1x16x8xf32>
    tpu.vector_store %arg9[%c0_41, %c6, %c0_42, %c0_43], %137 {strides = array<i32>} : memref<1x16x16x8xf32, #tpu.memory_space<vmem>>, vector<1x1x16x8xf32>,
    %138 = vector.extract_strided_slice %109 {offsets = [224, 0], sizes = [16, 8], strides = [1, 1]} : vector<496x8xf32> to vector<16x8xf32>
    %c0_44 = arith.constant 0 : index
    %c7 = arith.constant 7 : index
    %c0_45 = arith.constant 0 : index
    %c0_46 = arith.constant 0 : index
    %139 = vector.load %arg9[%c0_44, %c7, %c0_45, %c0_46] : memref<1x16x16x8xf32, #tpu.memory_space<vmem>>, vector<1x1x16x8xf32>
    %140 = vector.shape_cast %139 : vector<1x1x16x8xf32> to vector<16x8xf32>
    %141 = vector.shape_cast %138 : vector<16x8xf32> to vector<1x1x16x8xf32>
    tpu.vector_store %arg9[%c0_44, %c7, %c0_45, %c0_46], %141 {strides = array<i32>} : memref<1x16x16x8xf32, #tpu.memory_space<vmem>>, vector<1x1x16x8xf32>,
    %142 = vector.extract_strided_slice %109 {offsets = [256, 0], sizes = [16, 8], strides = [1, 1]} : vector<496x8xf32> to vector<16x8xf32>
    %c0_47 = arith.constant 0 : index
    %c8 = arith.constant 8 : index
    %c0_48 = arith.constant 0 : index
    %c0_49 = arith.constant 0 : index
    %143 = vector.load %arg9[%c0_47, %c8, %c0_48, %c0_49] : memref<1x16x16x8xf32, #tpu.memory_space<vmem>>, vector<1x1x16x8xf32>
    %144 = vector.shape_cast %143 : vector<1x1x16x8xf32> to vector<16x8xf32>
    %145 = vector.shape_cast %142 : vector<16x8xf32> to vector<1x1x16x8xf32>
    tpu.vector_store %arg9[%c0_47, %c8, %c0_48, %c0_49], %145 {strides = array<i32>} : memref<1x16x16x8xf32, #tpu.memory_space<vmem>>, vector<1x1x16x8xf32>,
    %146 = vector.extract_strided_slice %109 {offsets = [288, 0], sizes = [16, 8], strides = [1, 1]} : vector<496x8xf32> to vector<16x8xf32>
    %c0_50 = arith.constant 0 : index
    %c9 = arith.constant 9 : index
    %c0_51 = arith.constant 0 : index
    %c0_52 = arith.constant 0 : index
    %147 = vector.load %arg9[%c0_50, %c9, %c0_51, %c0_52] : memref<1x16x16x8xf32, #tpu.memory_space<vmem>>, vector<1x1x16x8xf32>
    %148 = vector.shape_cast %147 : vector<1x1x16x8xf32> to vector<16x8xf32>
    %149 = vector.shape_cast %146 : vector<16x8xf32> to vector<1x1x16x8xf32>
    tpu.vector_store %arg9[%c0_50, %c9, %c0_51, %c0_52], %149 {strides = array<i32>} : memref<1x16x16x8xf32, #tpu.memory_space<vmem>>, vector<1x1x16x8xf32>,
    %150 = vector.extract_strided_slice %109 {offsets = [320, 0], sizes = [16, 8], strides = [1, 1]} : vector<496x8xf32> to vector<16x8xf32>
    %c0_53 = arith.constant 0 : index
    %c10 = arith.constant 10 : index
    %c0_54 = arith.constant 0 : index
    %c0_55 = arith.constant 0 : index
    %151 = vector.load %arg9[%c0_53, %c10, %c0_54, %c0_55] : memref<1x16x16x8xf32, #tpu.memory_space<vmem>>, vector<1x1x16x8xf32>
    %152 = vector.shape_cast %151 : vector<1x1x16x8xf32> to vector<16x8xf32>
    %153 = vector.shape_cast %150 : vector<16x8xf32> to vector<1x1x16x8xf32>
    tpu.vector_store %arg9[%c0_53, %c10, %c0_54, %c0_55], %153 {strides = array<i32>} : memref<1x16x16x8xf32, #tpu.memory_space<vmem>>, vector<1x1x16x8xf32>,
    %154 = vector.extract_strided_slice %109 {offsets = [352, 0], sizes = [16, 8], strides = [1, 1]} : vector<496x8xf32> to vector<16x8xf32>
    %c0_56 = arith.constant 0 : index
    %c11 = arith.constant 11 : index
    %c0_57 = arith.constant 0 : index
    %c0_58 = arith.constant 0 : index
    %155 = vector.load %arg9[%c0_56, %c11, %c0_57, %c0_58] : memref<1x16x16x8xf32, #tpu.memory_space<vmem>>, vector<1x1x16x8xf32>
    %156 = vector.shape_cast %155 : vector<1x1x16x8xf32> to vector<16x8xf32>
    %157 = vector.shape_cast %154 : vector<16x8xf32> to vector<1x1x16x8xf32>
    tpu.vector_store %arg9[%c0_56, %c11, %c0_57, %c0_58], %157 {strides = array<i32>} : memref<1x16x16x8xf32, #tpu.memory_space<vmem>>, vector<1x1x16x8xf32>,
    %158 = vector.extract_strided_slice %109 {offsets = [384, 0], sizes = [16, 8], strides = [1, 1]} : vector<496x8xf32> to vector<16x8xf32>
    %c0_59 = arith.constant 0 : index
    %c12 = arith.constant 12 : index
    %c0_60 = arith.constant 0 : index
    %c0_61 = arith.constant 0 : index
    %159 = vector.load %arg9[%c0_59, %c12, %c0_60, %c0_61] : memref<1x16x16x8xf32, #tpu.memory_space<vmem>>, vector<1x1x16x8xf32>
    %160 = vector.shape_cast %159 : vector<1x1x16x8xf32> to vector<16x8xf32>
    %161 = vector.shape_cast %158 : vector<16x8xf32> to vector<1x1x16x8xf32>
    tpu.vector_store %arg9[%c0_59, %c12, %c0_60, %c0_61], %161 {strides = array<i32>} : memref<1x16x16x8xf32, #tpu.memory_space<vmem>>, vector<1x1x16x8xf32>,
    %162 = vector.extract_strided_slice %109 {offsets = [416, 0], sizes = [16, 8], strides = [1, 1]} : vector<496x8xf32> to vector<16x8xf32>
    %c0_62 = arith.constant 0 : index
    %c13 = arith.constant 13 : index
    %c0_63 = arith.constant 0 : index
    %c0_64 = arith.constant 0 : index
    %163 = vector.load %arg9[%c0_62, %c13, %c0_63, %c0_64] : memref<1x16x16x8xf32, #tpu.memory_space<vmem>>, vector<1x1x16x8xf32>
    %164 = vector.shape_cast %163 : vector<1x1x16x8xf32> to vector<16x8xf32>
    %165 = vector.shape_cast %162 : vector<16x8xf32> to vector<1x1x16x8xf32>
    tpu.vector_store %arg9[%c0_62, %c13, %c0_63, %c0_64], %165 {strides = array<i32>} : memref<1x16x16x8xf32, #tpu.memory_space<vmem>>, vector<1x1x16x8xf32>,
    %166 = vector.extract_strided_slice %109 {offsets = [448, 0], sizes = [16, 8], strides = [1, 1]} : vector<496x8xf32> to vector<16x8xf32>
    %c0_65 = arith.constant 0 : index
    %c14 = arith.constant 14 : index
    %c0_66 = arith.constant 0 : index
    %c0_67 = arith.constant 0 : index
    %167 = vector.load %arg9[%c0_65, %c14, %c0_66, %c0_67] : memref<1x16x16x8xf32, #tpu.memory_space<vmem>>, vector<1x1x16x8xf32>
    %168 = vector.shape_cast %167 : vector<1x1x16x8xf32> to vector<16x8xf32>
    %169 = vector.shape_cast %166 : vector<16x8xf32> to vector<1x1x16x8xf32>
    tpu.vector_store %arg9[%c0_65, %c14, %c0_66, %c0_67], %169 {strides = array<i32>} : memref<1x16x16x8xf32, #tpu.memory_space<vmem>>, vector<1x1x16x8xf32>,
    %170 = vector.extract_strided_slice %109 {offsets = [480, 0], sizes = [16, 8], strides = [1, 1]} : vector<496x8xf32> to vector<16x8xf32>
    %c0_68 = arith.constant 0 : index
    %c15 = arith.constant 15 : index
    %c0_69 = arith.constant 0 : index
    %c0_70 = arith.constant 0 : index
    %171 = vector.load %arg9[%c0_68, %c15, %c0_69, %c0_70] : memref<1x16x16x8xf32, #tpu.memory_space<vmem>>, vector<1x1x16x8xf32>
    %172 = vector.shape_cast %171 : vector<1x1x16x8xf32> to vector<16x8xf32>
    %173 = vector.shape_cast %170 : vector<16x8xf32> to vector<1x1x16x8xf32>
    tpu.vector_store %arg9[%c0_68, %c15, %c0_69, %c0_70], %173 {strides = array<i32>} : memref<1x16x16x8xf32, #tpu.memory_space<vmem>>, vector<1x1x16x8xf32>,
    return
  }
  func.func @transform_0(%arg0: i32, %arg1: i32) -> (i32, i32, i32, i32) {
    %c0_i32 = arith.constant 0 : i32
    %c0_i32_0 = arith.constant 0 : i32
    %c0_i32_1 = arith.constant 0 : i32
    %c0_i32_2 = arith.constant 0 : i32
    return %arg0, %c0_i32, %c0_i32_0, %c0_i32_1 : i32, i32, i32, i32
  }
  func.func @transform_1(%arg0: i32, %arg1: i32) -> (i32, i32) {
    %c0_i32 = arith.constant 0 : i32
    %c0_i32_0 = arith.constant 0 : i32
    %c0_i32_1 = arith.constant 0 : i32
    return %c0_i32, %c0_i32_0 : i32, i32
  }
  func.func @transform_2(%arg0: i32, %arg1: i32) -> (i32, i32) {
    %c0_i32 = arith.constant 0 : i32
    %c0_i32_0 = arith.constant 0 : i32
    %c0_i32_1 = arith.constant 0 : i32
    return %c0_i32, %c0_i32_0 : i32, i32
  }
  func.func @transform_3(%arg0: i32, %arg1: i32) -> (i32, i32) {
    %c0_i32 = arith.constant 0 : i32
    %c0_i32_0 = arith.constant 0 : i32
    %c0_i32_1 = arith.constant 0 : i32
    return %c0_i32, %c0_i32_0 : i32, i32
  }
  func.func @transform_4(%arg0: i32, %arg1: i32) -> (i32, i32) {
    %c0_i32 = arith.constant 0 : i32
    %c0_i32_0 = arith.constant 0 : i32
    %c0_i32_1 = arith.constant 0 : i32
    return %c0_i32, %c0_i32_0 : i32, i32
  }
  func.func @transform_5(%arg0: i32, %arg1: i32) -> (i32, i32) {
    %c0_i32 = arith.constant 0 : i32
    %c0_i32_0 = arith.constant 0 : i32
    %c0_i32_1 = arith.constant 0 : i32
    return %c0_i32, %c0_i32_0 : i32, i32
  }
  func.func @transform_6(%arg0: i32, %arg1: i32) -> (i32, i32) {
    %c0_i32 = arith.constant 0 : i32
    %c0_i32_0 = arith.constant 0 : i32
    %c0_i32_1 = arith.constant 0 : i32
    return %c0_i32, %c0_i32_0 : i32, i32
  }
  func.func @transform_7(%arg0: i32, %arg1: i32) -> (i32, i32, i32, i32) {
    %c0_i32 = arith.constant 0 : i32
    %c0_i32_0 = arith.constant 0 : i32
    %c0_i32_1 = arith.constant 0 : i32
    return %arg0, %arg1, %c0_i32, %c0_i32_0 : i32, i32, i32, i32
  }
}

</mosaic_0001>

<bundles_post_ra>
// kernel: tpu_custom_call.1
= control target key start
LH: loop header
LB: loop body
LE: loop exit
PB: predicated region body
PF: predicated region fallthrough
CT: control target
= control target key end

     0   :  { %s6697_s24 = smov 0   ;;  %s6699_s25 = smov 0   ;;  %s10731_s0 = inlined_call_operand.vmem [shape: bf16[2,1,576,8], index: 0, kind: input, shape index: {}]   ;;  %s10732_s1 = inlined_call_operand.vmem [shape: bf16[8,32], index: 1, kind: input, shape index: {}]   ;;  %s10733_s2 = inlined_call_operand.vmem [shape: f32[1,32], index: 2, kind: input, shape index: {}]   ;;  %s10734_s3 = inlined_call_operand.vmem [shape: f32[9,32], index: 3, kind: input, shape index: {}]   ;;  %s10735_s4 = inlined_call_operand.vmem [shape: f32[1,32], index: 4, kind: input, shape index: {}]   ;;  %s10736_s5 = inlined_call_operand.vmem [shape: bf16[32,8], index: 5, kind: input, shape index: {}]   ;;  %s10737_s6 = inlined_call_operand.vmem [shape: f32[1,8], index: 6, kind: input, shape index: {}]   ;;  %s10738_s7 = inlined_call_operand.vmem [shape: f32[2,16,16,8], index: 7, kind: output, shape index: {}]  }
   0x1   :  { %s6701_s26 = smov 0  }
   0x2 LB: > { %s29_s27 = sadd.s32 1, %s6647_s25  ;;  %p5861_p0 = scmp.ge.s32.totalorder %s6651_s26, 1  ;;  %s6651_s26 = sphi %s6701_s26, %s17_s26   ;;  %s6647_s25 = sphi %s6699_s25, %s11383_s25   ;;  %s6643_s24 = sphi %s6697_s24, %s11382_s24  }
   0x3   : > { %p31_p1 = scmp.ge.s32.totalorder %s29_s27, 2  ;;  %p251_p2 = scmp.lt.s32.totalorder %s6651_s26, 3 }
   0x5   : > { %s11385_s27 = smov (%p31_p1, %s29_s27), 0  ;;  %p252_p3 = pnand %p5861_p0, %p251_p2 }
   0x7   : > { %255 = sbr.rel (%p252_p3) target bundleno = 1074 (0x432), region = 48 }
   0xc   : > { %v382_v0 = vld [vmem:[%s10732_s1] sm:$0xf]  ;;  %vm679_vm0 = vcmask 1043456   ;;  %p288_p4 = scmp.lt.s32.totalorder %s6643_s24, 1  ;;  %v1145_v1 = vlaneseq  ;;  %v6653_v3 = vmov 0   ;;  %v10739_v5 = vmov 0.0  }
   0xd   : > { %6315 = vmatprep.subr.msk.bf16.mxu0 %vm679_vm0, %v382_v0  ;;  %v681_v2 = vsel %vm679_vm0, %v382_v0, 0  ;;  %6356 = vset.pattern.permute.xlu1 %v6653_v3  ;;  %vm570_vm2 = vcmask 64512   ;;  %v6655_v9 = vmov 1.0   ;;  %v6553_v47 = vld [vmem:[%s10736_s5 + $0x8] sm:$0xff]   ;;  %v6554_v48 = vld [vmem:[%s10736_s5] sm:$0xff]   ;;  %vm6656_vm4 = vmmov 0  }
   0xe   : > { %6110 = vmatpush3.bf16.msra.mxu0 %v681_v2  ;;  %s11387_s24 = smov (!%p288_p4, %s6643_s24), 1  ;;  %6345 = vset.pattern.permute.xlu0 %v6653_v3  ;;  %v6720_v4 = vshrl.u32 %v1145_v1, 7  ;;  %vm2487_vm5 = vcmask 1046528   ;;  %vm2867_vm6 = vcmask 1045504   ;;  %vm5136_vm7 = vcmask 261120  }
   0xf   : > { %6183 = vmatprep.subr.bf16.mxu0 %v10739_v5  ;;  %6311 = vmatprep.subr.bf16.mxu1 %v10739_v5  ;;  %s6316_s30 = smul.u32 288, %s11387_s24  ;;  %s6038_s23 = sshll.u32 %s11387_s24, 8 }
  0x10   : > { %vm1217_vm1 = vcmp.ge.s32.totalorder %v6720_v4, 1  ;;  %v1148_v11 = vadd.s32 16, %v6720_v4  ;;  %6313 = vmatpush3.bf16.msra.mxu1 %v6553_v47  ;;  %6211 = vmatprep.mubr.msk.bf16.mxu1 %vm6656_vm4, %v10739_v5  ;;  %s10355_s29 = scalar_lea.vmem %s10738_s7, %s6038_s23 }
  0x11   : > { %v6727_v6 = vsel %vm1217_vm1, 1.0, %v10739_v5  ;;  %s6732_s10 = scalar_lea.vmem %s10731_s0, %s6316_s30  ;;  %6312 = vmatprep.subr.bf16.mxu1 %v10739_v5 }
  0x12   : > { %v6517_v7 = vld [vmem:[%s6732_s10] sm:$0xff]   ;;  %v6518_v8 = vld [vmem:[%s6732_s10 + $0x8] sm:$0xff]   ;;  %v6346_v10 = vpack.i.bf16 %v6655_v9, %v6727_v6  ;;  %v314_v12 = vld [vmem:[%s6732_s10 + $0x10] sm:$0xff]   ;;  %vm1223_vm3 = vcmp.le.s32.totalorder %v1148_v11, 16  ;;  %v6482_v30 = vpack.i.bf16 %v6727_v6, %v6727_v6 }
  0x13   : > { %6111 = vmatprep.mubr.msk.bf16.mxu0 %vm570_vm2, %v6517_v7  ;;  %v316_v13 = vld [vmem:[%s6732_s10 + $0x18] sm:$0xff]   ;;  %v6744_v14 = vsel %vm1223_vm3, 1.0, %v10739_v5  ;;  %v318_v15 = vld [vmem:[%s6732_s10 + $0x20] sm:$0xff]   ;;  %v320_v18 = vld [vmem:[%s6732_s10 + $0x28] sm:$0xff]  }
  0x14   : > { %6112 = vmatmul.mubr.msk.bf16.vlgmr.msra.gmra.mxu0 %vm570_vm2, %v6518_v8  ;;  %6347 = vperm.xlu0 %6345, %v6346_v10   ;;  %v6750_v16 = vpack.i.bf16 %v6744_v14, %v6655_v9  ;;  %v6351_v17 = vpack.i.bf16 %v6727_v6, %v6744_v14  ;;  %v322_v19 = vld [vmem:[%s6732_s10 + $0x30] sm:$0xff]   ;;  %v324_v20 = vld [vmem:[%s6732_s10 + $0x38] sm:$0xff]   ;;  %v326_v21 = vld [vmem:[%s6732_s10 + $0x40] sm:$0xff]  }
  0x15   : > { %6115 = vmatprep.mubr.msk.bf16.mxu0 %vm570_vm2, %v314_v12  ;;  %v328_v22 = vld [vmem:[%s6732_s10 + $0x48] sm:$0xff]   ;;  %v330_v23 = vld [vmem:[%s6732_s10 + $0x50] sm:$0xff]   ;;  %v332_v24 = vld [vmem:[%s6732_s10 + $0x58] sm:$0xff]   ;;  %6184 = vmatpush3.bf16.msra.mxu0 %v6553_v47 }
  0x16   : > { %6358 = vperm.xlu1 %6356, %v6750_v16   ;;  %v334_v25 = vld [vmem:[%s6732_s10 + $0x60] sm:$0xff]   ;;  %v336_v26 = vld [vmem:[%s6732_s10 + $0x68] sm:$0xff]   ;;  %v338_v27 = vld [vmem:[%s6732_s10 + $0x70] sm:$0xff]   ;;  %6185 = vmatprep.subr.bf16.mxu0 %v10739_v5 }
  0x17   : > { %v340_v28 = vld [vmem:[%s6732_s10 + $0x78] sm:$0xff]   ;;  %v342_v29 = vld [vmem:[%s6732_s10 + $0x80] sm:$0xff]   ;;  %v344_v31 = vld [vmem:[%s6732_s10 + $0x88] sm:$0xff]   ;;  %6314 = vmatpush3.bf16.msra.mxu1 %v6554_v48 }
  0x18   : > { %6352 = vperm.xlu0 %6345, %v6351_v17   ;;  %v346_v32 = vld [vmem:[%s6732_s10 + $0x90] sm:$0xff]   ;;  %v348_v33 = vld [vmem:[%s6732_s10 + $0x98] sm:$0xff]   ;;  %v350_v34 = vld [vmem:[%s6732_s10 + $0xa0] sm:$0xff]  }
  0x19   : > { %v352_v35 = vld [vmem:[%s6732_s10 + $0xa8] sm:$0xff]   ;;  %v354_v36 = vld [vmem:[%s6732_s10 + $0xb0] sm:$0xff]   ;;  %v356_v37 = vld [vmem:[%s6732_s10 + $0xb8] sm:$0xff]   ;;  %6186 = vmatpush3.bf16.msra.mxu0 %v6554_v48 }
  0x1a   : > { %6363 = vperm.xlu1 %6356, %v6727_v6   ;;  %v358_v38 = vld [vmem:[%s6732_s10 + $0xc0] sm:$0xff]   ;;  %v360_v39 = vld [vmem:[%s6732_s10 + $0xc8] sm:$0xff]   ;;  %v362_v40 = vld [vmem:[%s6732_s10 + $0xd0] sm:$0xff]  }
  0x1b   : > { %v364_v41 = vld [vmem:[%s6732_s10 + $0xd8] sm:$0xff]   ;;  %v366_v42 = vld [vmem:[%s6732_s10 + $0xe0] sm:$0xff]   ;;  %v368_v43 = vld [vmem:[%s6732_s10 + $0xe8] sm:$0xff]  }
  0x1c   : > { %6116 = vmatmul.mubr.msk.bf16.gmra.mxu0 %vm570_vm2, %v316_v13  ;;  %6368 = vperm.xlu0 %6345, %v6750_v16   ;;  %v370_v44 = vld [vmem:[%s6732_s10 + $0xf0] sm:$0xff]   ;;  %v372_v45 = vld [vmem:[%s6732_s10 + $0xf8] sm:$0xff]   ;;  %v374_v46 = vld [vmem:[%s6732_s10 + $0x100] sm:$0xff]  }
  0x1d   : > { %6119 = vmatprep.mubr.msk.bf16.mxu0 %vm570_vm2, %v318_v15  ;;  %v376_v49 = vld [vmem:[%s6732_s10 + $0x108] sm:$0xff]   ;;  %v6551_v51 = vld [vmem:[%s6732_s10 + $0x110] sm:$0xff]   ;;  %v6552_v55 = vld [vmem:[%s6732_s10 + $0x118] sm:$0xff]   ;;  %v2231_v15 = vsub.s32 0, %v6720_v4 }
  0x1e   : > { %1898 = vperm.xlu1 %6356, %v10739_v5  }
  0x20   : > { %6373 = vperm.xlu0 %6345, %v6727_v6  }
  0x22   : > { %6378 = vperm.xlu1 %6356, %v6750_v16  }
  0x24   : > { %6120 = vmatmul.mubr.msk.bf16.gmra.mxu0 %vm570_vm2, %v320_v18  ;;  %6383 = vperm.xlu0 %6345, %v6727_v6   ;;  %v2359_v18 = vsub.s32 1, %v6720_v4 }
  0x25   : > { %6123 = vmatprep.mubr.msk.bf16.mxu0 %vm570_vm2, %v322_v19  ;;  %v2739_v19 = vsub.s32 2, %v6720_v4 }
  0x26   : > { %6388 = vperm.xlu1 %6356, %v6750_v16  }
  0x28   : > { %6393 = vperm.xlu0 %6345, %v6727_v6  }
  0x2a   : > { %6398 = vperm.xlu1 %6356, %v6750_v16  }
  0x2c   : > { %6124 = vmatmul.mubr.msk.bf16.gmra.mxu0 %vm570_vm2, %v324_v20  ;;  %6403 = vperm.xlu0 %6345, %v6727_v6   ;;  %v3119_v20 = vsub.s32 3, %v6720_v4 }
  0x2d   : > { %6127 = vmatprep.mubr.msk.bf16.mxu0 %vm570_vm2, %v326_v21  ;;  %v3247_v21 = vsub.s32 4, %v6720_v4 }
  0x2e   : > { %6408 = vperm.xlu1 %6356, %v6750_v16  }
  0x30   : > { %6413 = vperm.xlu0 %6345, %v6727_v6  }
  0x32   : > { %6418 = vperm.xlu1 %6356, %v6750_v16  }
  0x34   : > { %6128 = vmatmul.mubr.msk.bf16.gmra.mxu0 %vm570_vm2, %v328_v22  ;;  %6423 = vperm.xlu0 %6345, %v6727_v6  }
  0x35   : > { %6131 = vmatprep.mubr.msk.bf16.mxu0 %vm570_vm2, %v330_v23  ;;  %v3626_v23 = vsub.s32 5, %v6720_v4 }
  0x36   : > { %6428 = vperm.xlu1 %6356, %v6750_v16  }
  0x38   : > { %6433 = vperm.xlu0 %6345, %v6727_v6  }
  0x3a   : > { %6438 = vperm.xlu1 %6356, %v6750_v16  }
  0x3c   : > { %6132 = vmatmul.mubr.msk.bf16.gmra.mxu0 %vm570_vm2, %v332_v24  ;;  %6443 = vperm.xlu0 %6345, %v6727_v6   ;;  %v4005_v24 = vsub.s32 6, %v6720_v4 }
  0x3d   : > { %6135 = vmatprep.mubr.msk.bf16.mxu0 %vm570_vm2, %v334_v25  ;;  %v4133_v25 = vsub.s32 7, %v6720_v4 }
  0x3e   : > { %6448 = vperm.xlu1 %6356, %v6750_v16  }
  0x40   : > { %6453 = vperm.xlu0 %6345, %v6727_v6  }
  0x42   : > { %6458 = vperm.xlu1 %6356, %v10739_v5  }
  0x44   : > { %6136 = vmatmul.mubr.msk.bf16.gmra.mxu0 %vm570_vm2, %v336_v26  ;;  %6463 = vperm.xlu0 %6345, %v6655_v9  }
  0x45   : > { %6139 = vmatprep.mubr.msk.bf16.mxu0 %vm570_vm2, %v338_v27 }
  0x46   : > { %6468 = vperm.xlu1 %6356, %v6351_v17   ;;  %v2227_v17 = vld [vmem:[%s10734_s3] sm:$0xff] }
  0x47   : > { %v6930_v26 = vrot.slane %v2227_v17, %v2231_v15 }
  0x48   : > { %6473 = vperm.xlu0 %6345, %v6750_v16  }
  0x49   : > { %10968 = vst [vmem:[#allocation16_spill] sm:$0xff] %v6930_v26 }
  0x4a   : > { %6478 = vperm.xlu1 %6356, %v10739_v5  }
  0x4c   : > { %6140 = vmatmul.mubr.msk.bf16.gmra.mxu0 %vm570_vm2, %v340_v28  ;;  %6483 = vperm.xlu0 %6345, %v6482_v30   ;;  %v6934_v28 = vrot.slane %v2227_v17, %v2359_v18  ;;  %v6938_v30 = vrot.slane %v2227_v17, %v3119_v20  ;;  %v6998_v20 = vld [vmem:[%s10733_s2] ss:$0 sm:$0xff] }
  0x4d   : > { %6143 = vmatprep.mubr.msk.bf16.mxu0 %vm570_vm2, %v342_v29  ;;  %v6936_v29 = vrot.slane %v2227_v17, %v2739_v19 }
  0x4e   : > { %6488 = vperm.xlu1 %6356, %v6750_v16   ;;  %10970 = vst [vmem:[#allocation18_spill] sm:$0xff] %v6934_v28  ;;  %10972 = vst [vmem:[#allocation20_spill] sm:$0xff] %v6938_v30 }
  0x4f   : > { %10971 = vst [vmem:[#allocation19_spill] sm:$0xff] %v6936_v29 }
  0x50   : > { %6493 = vperm.xlu0 %6345, %v6655_v9  }
  0x52   : > { %2113 = vperm.xlu1 %6356, %v6744_v14  }
  0x54   : > { %6144 = vmatmul.mubr.msk.bf16.gmra.mxu0 %vm570_vm2, %v344_v31  ;;  %1858 = vperm.xlu0 %6345, %v10739_v5   ;;  %v6940_v31 = vrot.slane %v2227_v17, %v3247_v21 }
  0x55   : > { %6147 = vmatprep.mubr.msk.bf16.mxu0 %vm570_vm2, %v346_v32 }
  0x56   : > { %6498 = vperm.xlu1 %6356, %v6727_v6  }
  0x58   : > { %6503 = vperm.xlu0 %6345, %v6750_v16  }
  0x5a   : > { %6508 = vperm.xlu1 %6356, %v10739_v5  }
  0x5c   : > { %6148 = vmatmul.mubr.msk.bf16.gmra.mxu0 %vm570_vm2, %v348_v33  ;;  %6513 = vperm.xlu0 %6345, %v10739_v5   ;;  %v6944_v33 = vrot.slane %v2227_v17, %v3626_v23 }
  0x5d   : > { %6151 = vmatprep.mubr.msk.bf16.mxu0 %vm570_vm2, %v350_v34  ;;  %v6946_v34 = vrot.slane %v2227_v17, %v4005_v24 }
  0x64   : > { %6152 = vmatmul.mubr.msk.bf16.gmra.mxu0 %vm570_vm2, %v352_v35  ;;  %v6948_v35 = vrot.slane %v2227_v17, %v4133_v25 }
  0x65   : > { %6155 = vmatprep.mubr.msk.bf16.mxu0 %vm570_vm2, %v354_v36 }
  0x6c   : > { %6156 = vmatmul.mubr.msk.bf16.gmra.mxu0 %vm570_vm2, %v356_v37 }
  0x6d   : > { %6159 = vmatprep.mubr.msk.bf16.mxu0 %vm570_vm2, %v358_v38 }
  0x74   : > { %6160 = vmatmul.mubr.msk.bf16.gmra.mxu0 %vm570_vm2, %v360_v39 }
  0x75   : > { %6163 = vmatprep.mubr.msk.bf16.mxu0 %vm570_vm2, %v362_v40 }
  0x7c   : > { %6164 = vmatmul.mubr.msk.bf16.gmra.mxu0 %vm570_vm2, %v364_v41 }
  0x7d   : > { %6167 = vmatprep.mubr.msk.bf16.mxu0 %vm570_vm2, %v366_v42 }
  0x84   : > { %6168 = vmatmul.mubr.msk.bf16.gmra.mxu0 %vm570_vm2, %v368_v43 }
  0x85   : > { %6171 = vmatprep.mubr.msk.bf16.mxu0 %vm570_vm2, %v370_v44 }
  0x8c   : > { %6172 = vmatmul.mubr.msk.bf16.gmra.mxu0 %vm570_vm2, %v372_v45 }
  0x8d   : > { %6175 = vmatprep.mubr.msk.bf16.mxu0 %vm570_vm2, %v374_v46 }
  0x8f   : > { %v6858_v50 = vpop.permute.xlu0 %6347 }
  0x91   : > { %v6861_v52 = vpop.permute.xlu1 %6358 }
  0x93   : > { %v6863_v53 = vpop.permute.xlu0 %6352 }
  0x94   : > { %6176 = vmatmul.mubr.msk.bf16.gmra.mxu0 %vm570_vm2, %v376_v49 }
  0x95   : > { %6179 = vmatprep.mubr.msk.bf16.mxu0 %vm570_vm2, %v6551_v51  ;;  %v6867_v54 = vpop.permute.xlu1 %6363 }
  0x97   : > { %v6870_v56 = vpop.permute.xlu0 %6368 }
  0x99   : > { %v6872_v57 = vpop.permute.xlu1 %1898 }
  0x9b   : > { %v6875_v58 = vpop.permute.xlu0 %6373 }
  0x9c   : > { %6180 = vmatmul.mubr.msk.bf16.gmra.mxu0 %vm570_vm2, %v6552_v55 }
  0x9d   : > { %6187 = vmatprep.mubr.msk.bf16.mxu0 %vm6656_vm4, %v10739_v5  ;;  %v6879_v59 = vpop.permute.xlu1 %6378 }
  0x9f   : > { %v6881_v60 = vpop.permute.xlu0 %6383 }
  0xa1   : > { %v6883_v61 = vpop.permute.xlu1 %6388 }
  0xa3   : > { %v6885_v62 = vpop.permute.xlu0 %6393 }
  0xa5   : > { %v6887_v63 = vpop.permute.xlu1 %6398 }
  0xa6   : > { %10954 = vst [vmem:[#allocation2_spill] sm:$0xff] %v6887_v63 }
  0xa7   : > { %v6889_v0 = vpop.permute.xlu0 %6403 }
  0xa8   : > { %10955 = vst [vmem:[#allocation3_spill] sm:$0xff] %v6889_v0 }
  0xa9   : > { %v6891_v1 = vpop.permute.xlu1 %6408 }
  0xaa   : > { %10956 = vst [vmem:[#allocation4_spill] sm:$0xff] %v6891_v1 }
  0xab   : > { %v6893_v2 = vpop.permute.xlu0 %6413 }
  0xac   : > { %10957 = vst [vmem:[#allocation5_spill] sm:$0xff] %v6893_v2 }
  0xad   : > { %v6895_v3 = vpop.permute.xlu1 %6418 }
  0xae   : > { %10958 = vst [vmem:[#allocation6_spill] sm:$0xff] %v6895_v3 }
  0xaf   : > { %v6897_v6 = vpop.permute.xlu0 %6423 }
  0xb0   : > { %10959 = vst [vmem:[#allocation7_spill] sm:$0xff] %v6897_v6 }
  0xb1   : > { %v6899_v7 = vpop.permute.xlu1 %6428 }
  0xb2   : > { %10960 = vst [vmem:[#allocation8_spill] sm:$0xff] %v6899_v7 }
  0xb3   : > { %v6901_v8 = vpop.permute.xlu0 %6433 }
  0xb4   : > { %10961 = vst [vmem:[#allocation9_spill] sm:$0xff] %v6901_v8 }
  0xb5   : > { %v6903_v9 = vpop.permute.xlu1 %6438 }
  0xb6   : > { %10962 = vst [vmem:[#allocation10_spill] sm:$0xff] %v6903_v9 }
  0xb7   : > { %v6905_v10 = vpop.permute.xlu0 %6443 }
  0xb8   : > { %10963 = vst [vmem:[#allocation11_spill] sm:$0xff] %v6905_v10 }
  0xb9   : > { %v6907_v11 = vpop.permute.xlu1 %6448 }
  0xba   : > { %10964 = vst [vmem:[#allocation12_spill] sm:$0xff] %v6907_v11 }
  0xbb   : > { %v6909_v12 = vpop.permute.xlu0 %6453 }
  0xbc   : > { %10965 = vst [vmem:[#allocation13_spill] sm:$0xff] %v6909_v12 }
  0xbd   : > { %v6911_v13 = vpop.permute.xlu1 %6458 }
  0xbe   : > { %v6460_v23 = vunpack.i.l.bf16 %v6911_v13 }
  0xbf   : > { %v6913_v14 = vpop.permute.xlu0 %6463 }
  0xc0   : > { %10966 = vst [vmem:[#allocation14_spill] sm:$0xff] %v6913_v14  ;;  %v6465_v5 = vunpack.i.l.bf16 %v6913_v14 }
  0xc1   : > { %v6916_v16 = vpop.permute.xlu1 %6468 }
  0xc2   : > { %10967 = vst [vmem:[#allocation15_spill] sm:$0xff] %v6916_v16 }
  0xc3   : > { %v6925_v22 = vpop.permute.xlu0 %6473 }
  0xc5   : > { %v6932_v27 = vpop.permute.xlu1 %6478 }
  0xc6   : > { %10969 = vst [vmem:[#allocation17_spill] sm:$0xff] %v6932_v27 }
  0xc7   : > { %v6942_v32 = vpop.permute.xlu0 %6483 }
  0xc8   : > { %10973 = vst [vmem:[#allocation21_spill] sm:$0xff] %v6942_v32 }
  0xc9   : > { %v6959_v44 = vpop.permute.xlu1 %6488 }
  0xcb   : > { %v6965_v49 = vpop.permute.xlu0 %6493 }
  0xcc   : > { %10974 = vst [vmem:[#allocation22_spill] sm:$0xff] %v6965_v49 }
  0xcd   : > { %v6979_v55 = vpop.permute.xlu1 %2113 }
  0xce   : > { %10975 = vst [vmem:[#allocation23_spill] sm:$0xff] %v6979_v55 }
  0xcf   : > { %v6985_v51 = vpop.permute.xlu0 %1858 }
  0xd1   : > { %v7004_v21 = vpop.permute.xlu1 %6498 }
  0xd2   : > { %10976 = vst [vmem:[#allocation24_spill] sm:$0xff] %v7004_v21 }
  0xd3   : > { %v7010_v46 = vpop.permute.xlu0 %6503 }
  0xd4   : > { %v6113_v47 = vpop.f32.mrf.mxu0  ;;  %10977 = vst [vmem:[#allocation25_spill] sm:$0xff] %v7010_v46 }
  0xd5   : > { %v726_v24 = vadd.f32 %v6113_v47, %v6998_v20  ;;  %v6480_v47 = vunpack.i.l.bf16 %v6932_v27  ;;  %v7031_v38 = vpop.permute.xlu1 %6508 }
  0xd6   : > { %v717_v45 = vpop.f32.mrf.mxu0  ;;  %10979 = vst [vmem:[#allocation27_spill] sm:$0xff] %v7031_v38 }
  0xd7   : > { %v1005_v40 = vmax.f32 %v726_v24, 0.0  ;;  %v718_v43 = vadd.f32 %v6998_v20, %v717_v45  ;;  %v7029_v45 = vpop.permute.xlu0 %6513 }
  0xd8   : > { %v6114_v39 = vpop.f32.mrf.mxu0  ;;  %10978 = vst [vmem:[#allocation26_spill] sm:$0xff] %v7029_v45 }
  0xd9   : > { %v1076_v41 = vmin.f32 %v1005_v40, 6.0  ;;  %v1003_v36 = vmax.f32 %v718_v43, 0.0  ;;  %v729_v42 = vadd.f32 %v6114_v39, %v6998_v20 }
  0xda   : > { %v720_v17 = vpop.f32.mrf.mxu0 }
  0xdb   : > { %v1074_v48 = vmin.f32 %v1003_v36, 6.0  ;;  %v2158_v40 = vmul.f32 %v6465_v5, %v1076_v41  ;;  %v1006_v43 = vmax.f32 %v729_v42, 0.0  ;;  %v721_v39 = vadd.f32 %v6998_v20, %v720_v17 }
  0xdc   : > { %v6117_v24 = vpop.f32.mrf.mxu0 }
  0xdd   : > { %v2156_v55 = vmul.f32 %v6460_v23, %v1074_v48  ;;  %v2363_v37 = vmul.f32 %v6934_v28, %v2158_v40  ;;  %v2743_v36 = vmul.f32 %v6936_v29, %v2158_v40  ;;  %v2235_v41 = vmul.f32 %v6930_v26, %v2158_v40 }
  0xde   : > { %v1077_v42 = vmin.f32 %v1006_v43, 6.0  ;;  %v1004_v17 = vmax.f32 %v721_v39, 0.0  ;;  %v742_v4 = vadd.f32 %v6117_v24, %v6998_v20  ;;  %v733_v19 = vpop.f32.mrf.mxu0  ;;  %v10980_v24 = vunpack.i.h.bf16 %v6911_v13 }
  0xdf   : > { %v2233_v18 = vmul.f32 %v6930_v26, %v2156_v55  ;;  %v2361_v15 = vmul.f32 %v6934_v28, %v2156_v55  ;;  %v2741_v25 = vmul.f32 %v6936_v29, %v2156_v55  ;;  %v2491_v48 = vrot.slane %v2363_v37, 1 }
  0xe0   : > { %v2871_v23 = vrot.slane %v2743_v36, 2  ;;  %v1075_v38 = vmin.f32 %v1004_v17, 6.0  ;;  %v2159_v46 = vmul.f32 %v6480_v47, %v1077_v42  ;;  %v1009_v21 = vmax.f32 %v742_v4, 0.0  ;;  %v6118_v14 = vpop.f32.mrf.mxu0 }
  0xe1   : > { %v2488_v5 = vrot.slane %v2361_v15, 1  ;;  %v2868_v45 = vrot.slane %v2741_v25, 2  ;;  %v734_v40 = vadd.f32 %v6998_v20, %v733_v19  ;;  %v745_v43 = vadd.f32 %v6118_v14, %v6998_v20 }
  0xe2   : > { %v2157_v39 = vmul.f32 %v10980_v24, %v1075_v38  ;;  %v7055_v27 = vmul.f32 %v6930_v26, %v2159_v46  ;;  %v7058_v55 = vmul.f32 %v6934_v28, %v2159_v46  ;;  %v7061_v37 = vmul.f32 %v6936_v29, %v2159_v46  ;;  %v736_v4 = vpop.f32.mrf.mxu0 }
  0xe3   : > { %v1080_v47 = vmin.f32 %v1009_v21, 6.0  ;;  %v1007_v15 = vmax.f32 %v734_v40, 0.0  ;;  %v1010_v25 = vmax.f32 %v745_v43, 0.0  ;;  %v737_v19 = vadd.f32 %v6998_v20, %v736_v4 }
  0xe4   : > { %v2234_v14 = vmul.f32 %v6930_v26, %v2157_v39  ;;  %v2362_v13 = vmul.f32 %v6934_v28, %v2157_v39  ;;  %v2742_v38 = vmul.f32 %v6936_v29, %v2157_v39  ;;  %v2493_v36 = vrot.slane %v7058_v55, 1  ;;  %v7068_v42 = vpop.f32.mrf.mxu0 }
  0xe5   : > { %v10761_v17 = vrot.slane %v7061_v37, 2  ;;  %v10981_v46 = vunpack.i.h.bf16 %v6925_v22  ;;  %v1078_v21 = vmin.f32 %v1007_v15, 6.0  ;;  %v1081_v40 = vmin.f32 %v1010_v25, 6.0 }
  0xe6   : > { %v2489_v43 = vrot.slane %v2362_v13, 1  ;;  %v2869_v12 = vrot.slane %v2742_v38, 2  ;;  %v2494_v4 = vsel %vm2487_vm5, %v2491_v48, %v2493_v36  ;;  %v1008_v11 = vmax.f32 %v737_v19, 0.0  ;;  %v7074_v10 = vpop.f32.mrf.mxu0 }
  0xe7   : > { %v2162_v24 = vmul.f32 %v10981_v46, %v1080_v47  ;;  %v2677_v9 = vadd.f32 %v2494_v4, %v2235_v41  ;;  %v2874_v39 = vsel %vm2867_vm6, %v2871_v23, %v10761_v17 }
  0xe8   : > { %v2490_v47 = vsel %vm2487_vm5, %v2488_v5, %v2489_v43  ;;  %v2492_v15 = vsel %vm2487_vm5, %v2489_v43, %v2491_v48  ;;  %v2870_v25 = vsel %vm2867_vm6, %v2868_v45, %v2869_v12  ;;  %v2872_v19 = vsel %vm2867_vm6, %v2869_v12, %v2871_v23  ;;  %v7087_v13 = vpop.f32.mrf.mxu0 }
  0xe9   : > { %v7080_v55 = vmul.f32 %v6930_v26, %v2162_v24  ;;  %v2367_v8 = vmul.f32 %v6934_v28, %v2162_v24  ;;  %v2675_v41 = vadd.f32 %v2490_v47, %v2233_v18  ;;  %v2676_v38 = vadd.f32 %v2492_v15, %v2234_v14 }
  0xea   : > { %v7089_v46 = vadd.f32 %v2874_v39, %v2677_v9  ;;  %v7092_v17 = vmul.f32 %v6936_v29, %v2162_v24  ;;  %v7095_v7 = vmul.f32 %v6938_v30, %v2162_v24  ;;  %v7098_v5 = vmul.f32 %v6940_v31, %v2162_v24  ;;  %v752_v12 = vpop.f32.mrf.mxu0 }
  0xeb   : > { %10982 = vst [vmem:[#allocation28_spill] sm:$0xff] %v7080_v55  ;;  %v2499_v4 = vrot.slane %v2367_v8, 1  ;;  %v7101_v45 = vmul.f32 %v6944_v33, %v2162_v24  ;;  %v3055_v48 = vadd.f32 %v2870_v25, %v2675_v41  ;;  %v3056_v23 = vadd.f32 %v2872_v19, %v2676_v38 }
  0xec   : > { %v10983_v18 = vunpack.i.h.bf16 %v6916_v16  ;;  %v1079_v14 = vmin.f32 %v1008_v11, 6.0  ;;  %v10984_v47 = vunpack.i.l.bf16 %v6965_v49  ;;  %v6125_v6 = vpop.f32.mrf.mxu0  ;;  %v10985_v38 = vunpack.i.l.bf16 %v6925_v22 }
  0xee   : > { %v2160_v9 = vmul.f32 %v10983_v18, %v1078_v21  ;;  %v2163_v15 = vmul.f32 %v10984_v47, %v1081_v40  ;;  %v2161_v18 = vmul.f32 %v10985_v38, %v1079_v14  ;;  %v765_v47 = vpop.f32.mrf.mxu0 }
  0xf0   : > { %v7111_v24 = vmul.f32 %v6930_v26, %v2160_v9  ;;  %v2365_v25 = vmul.f32 %v6934_v28, %v2160_v9  ;;  %v7115_v19 = vmul.f32 %v6936_v29, %v2160_v9  ;;  %v3121_v11 = vmul.f32 %v6938_v30, %v2160_v9  ;;  %v6126_v1 = vpop.f32.mrf.mxu0 }
  0xf1   : > { %v3249_v21 = vmul.f32 %v6940_v31, %v2160_v9  ;;  %v3628_v41 = vmul.f32 %v6944_v33, %v2160_v9  ;;  %v7123_v40 = vmul.f32 %v6930_v26, %v2163_v15  ;;  %v7127_v49 = vmul.f32 %v6934_v28, %v2163_v15 }
  0xf2   : > { %v2495_v8 = vrot.slane %v2365_v25, 1  ;;  %v3183_v43 = vadd.f32 %v3121_v11, %v3055_v48  ;;  %v2238_v2 = vmul.f32 %v6930_v26, %v2161_v18  ;;  %v2366_v9 = vmul.f32 %v6934_v28, %v2161_v18  ;;  %v768_v39 = vpop.f32.mrf.mxu0 }
  0xf3   : > { %10986 = vst [vmem:[#allocation29_spill] sm:$0xff] %v7123_v40  ;;  %10987 = vst [vmem:[#allocation30_spill] sm:$0xff] %v7127_v49  ;;  %v3375_v16 = vrot.slane %v3249_v21, 1  ;;  %v3754_v3 = vrot.slane %v3628_v41, 2  ;;  %v7135_v14 = vmul.f32 %v6936_v29, %v2161_v18  ;;  %v3122_v25 = vmul.f32 %v6938_v30, %v2161_v18 }
  0xf4   : > { %v7132_v22 = vsel %vm2487_vm5, %v2493_v36, %v2495_v8  ;;  %v3250_v48 = vmul.f32 %v6940_v31, %v2161_v18  ;;  %v2497_v11 = vrot.slane %v2366_v9, 1  ;;  %v3629_v38 = vmul.f32 %v6944_v33, %v2161_v18 }
  0xf5   : > { %v10786_v21 = vrot.slane %v7127_v49, 1  ;;  %v7142_v41 = vmul.f32 %v6936_v29, %v2163_v15  ;;  %v3184_v36 = vadd.f32 %v3122_v25, %v3056_v23  ;;  %v7146_v0 = vmul.f32 %v6938_v30, %v2163_v15  ;;  %v6129_v29 = vpop.f32.mrf.mxu0 }
  0xf6   : > { %v3376_v40 = vrot.slane %v3250_v48, 1  ;;  %v7149_v55 = vsel %vm2487_vm5, %v2495_v8, %v2497_v11  ;;  %v2500_v9 = vsel %vm2487_vm5, %v2497_v11, %v2499_v4  ;;  %v3755_v28 = vrot.slane %v3629_v38, 2 }
  0xf7   : > { %10988 = vst [vmem:[#allocation31_spill] sm:$0xff] %v7142_v41  ;;  %v7155_v18 = vsel %vm2487_vm5, %v2499_v4, %v10786_v21  ;;  %v7157_v63 = vadd.f32 %v2500_v9, %v2238_v2  ;;  %v10990_v25 = vrot.slane %v7098_v5, 1  ;;  %v10991_v38 = vrot.slane %v7101_v45, 2  ;;  %v781_v21 = vpop.f32.mrf.mxu0 }
  0xf8   : > { %10989 = vst [vmem:[#allocation32_spill] sm:$0xff] %v7155_v18  ;;  %v3377_v23 = vsel %vm2487_vm5, %v3375_v16, %v3376_v40  ;;  %v3756_v11 = vsel %vm2867_vm6, %v3754_v3, %v3755_v28  ;;  %v7169_v2 = vmul.f32 %v6940_v31, %v2163_v15  ;;  %v7172_v16 = vmul.f32 %v6944_v33, %v2163_v15 }
  0xf9   : > { %v3379_v48 = vsel %vm2487_vm5, %v3376_v40, %v10990_v25  ;;  %v3562_v26 = vadd.f32 %v3377_v23, %v3183_v43  ;;  %v3758_v4 = vsel %vm2867_vm6, %v3755_v28, %v10991_v38  ;;  %v758_v40 = vadd.f32 %v7068_v42, %v6998_v20  ;;  %v6130_v23 = vpop.f32.mrf.mxu0 }
  0xfa   : > { %v3563_v30 = vadd.f32 %v3379_v48, %v3184_v36  ;;  %v750_v43 = vadd.f32 %v6998_v20, %v7074_v10  ;;  %v761_v28 = vadd.f32 %v7087_v13, %v6998_v20  ;;  %v753_v9 = vadd.f32 %v6998_v20, %v752_v12 }
  0xfb   : > { %v7178_v36 = vadd.f32 %v3756_v11, %v3562_v26  ;;  %v1013_v48 = vmax.f32 %v758_v40, 0.0  ;;  %v774_v10 = vadd.f32 %v6125_v6, %v6998_v20  ;;  %v766_v26 = vadd.f32 %v6998_v20, %v765_v47 }
  0xfc   : > { %v7180_v3 = vadd.f32 %v3758_v4, %v3563_v30  ;;  %v1011_v38 = vmax.f32 %v750_v43, 0.0  ;;  %v1014_v42 = vmax.f32 %v761_v28, 0.0  ;;  %v1012_v8 = vmax.f32 %v753_v9, 0.0  ;;  %v784_v30 = vpop.f32.mrf.mxu0 }
  0xfd   : > { %v1084_v11 = vmin.f32 %v1013_v48, 6.0  ;;  %v777_v13 = vadd.f32 %v6126_v1, %v6998_v20  ;;  %v769_v12 = vadd.f32 %v6998_v20, %v768_v39  ;;  %v1017_v25 = vmax.f32 %v774_v10, 0.0 }
  0xfe   : > { %v1082_v4 = vmin.f32 %v1011_v38, 6.0  ;;  %v1085_v49 = vmin.f32 %v1014_v42, 6.0  ;;  %v1083_v41 = vmin.f32 %v1012_v8, 6.0  ;;  %v1015_v18 = vmax.f32 %v766_v26, 0.0  ;;  %v6133_v15 = vpop.f32.mrf.mxu0 }
  0xff   : > { %v10992_v40 = vunpack.i.h.bf16 %v6942_v32  ;;  %v10993_v6 = vunpack.i.h.bf16 %v6959_v44  ;;  %v1018_v47 = vmax.f32 %v777_v13, 0.0  ;;  %v1016_v9 = vmax.f32 %v769_v12, 0.0 }
 0x100   : > { %v10994_v48 = vunpack.i.l.bf16 %v6959_v44  ;;  %v1088_v39 = vmin.f32 %v1017_v25, 6.0  ;;  %v7204_v8 = vmul.f32 %v6985_v51, %v1085_v49  ;;  %v1086_v38 = vmin.f32 %v1015_v18, 6.0  ;;  %v797_v42 = vpop.f32.mrf.mxu0 }
 0x101   : > { %v7193_v43 = vmul.f32 %v10992_v40, %v1082_v4  ;;  %v7197_v28 = vmul.f32 %v10993_v6, %v1084_v11  ;;  %v1089_v10 = vmin.f32 %v1018_v47, 6.0  ;;  %v1087_v26 = vmin.f32 %v1016_v9, 6.0 }
 0x102   : > { %v7201_v1 = vmul.f32 %v10994_v48, %v1083_v41  ;;  %10995 = vst [vmem:[#allocation33_spill] sm:$0xff] %v7204_v8  ;;  %v790_v4 = vadd.f32 %v6129_v29, %v6998_v20  ;;  %v782_v40 = vadd.f32 %v6998_v20, %v781_v21  ;;  %v10996_v11 = vunpack.i.l.bf16 %v6863_v53  ;;  %v6134_v51 = vpop.f32.mrf.mxu0 }
 0x103   : > { %v10997_v44 = vunpack.i.l.bf16 %v6858_v50  ;;  %v793_v25 = vadd.f32 %v6130_v23, %v6998_v20  ;;  %v785_v49 = vadd.f32 %v6998_v20, %v784_v30  ;;  %v10998_v18 = vunpack.i.l.bf16 %v6867_v54 }
 0x104   : > { %v7210_v13 = vmul.f32 %v10996_v11, %v1088_v39  ;;  %v10999_v29 = vunpack.i.h.bf16 %v6858_v50  ;;  %v1021_v6 = vmax.f32 %v790_v4, 0.0  ;;  %v1019_v47 = vmax.f32 %v782_v40, 0.0  ;;  %v800_v23 = vpop.f32.mrf.mxu0 }
 0x105   : > { %v7214_v41 = vmul.f32 %v10997_v44, %v1086_v38  ;;  %v7220_v12 = vmul.f32 %v10998_v18, %v1089_v10  ;;  %v1022_v9 = vmax.f32 %v793_v25, 0.0  ;;  %v1020_v48 = vmax.f32 %v785_v49, 0.0 }
 0x106   : > { %v7224_v21 = vmul.f32 %v10999_v29, %v1087_v26  ;;  %v806_v39 = vadd.f32 %v6133_v15, %v6998_v20  ;;  %v798_v38 = vadd.f32 %v6998_v20, %v797_v42  ;;  %v1092_v11 = vmin.f32 %v1021_v6, 6.0  ;;  %v6137_v29 = vpop.f32.mrf.mxu0 }
 0x107   : > { %v1090_v30 = vmin.f32 %v1019_v47, 6.0  ;;  %v809_v44 = vadd.f32 %v6134_v51, %v6998_v20  ;;  %v801_v10 = vadd.f32 %v6998_v20, %v800_v23  ;;  %v1093_v18 = vmin.f32 %v1022_v9, 6.0 }
 0x108   : > { %v1091_v32 = vmin.f32 %v1020_v48, 6.0  ;;  %v1025_v50 = vmax.f32 %v806_v39, 0.0  ;;  %v1023_v26 = vmax.f32 %v798_v38, 0.0  ;;  %v11000_v4 = vunpack.i.h.bf16 %v6861_v52  ;;  %v813_v39 = vpop.f32.mrf.mxu0 }
 0x109   : > { %v11002_v15 = vunpack.i.h.bf16 %v6863_v53  ;;  %v1026_v42 = vmax.f32 %v809_v44, 0.0  ;;  %v1024_v49 = vmax.f32 %v801_v10, 0.0  ;;  %v7239_v6 = vmul.f32 %v6872_v57, %v1093_v18 }
 0x10a   : > { %v7232_v40 = vmul.f32 %v11000_v4, %v1092_v11  ;;  %v11004_v51 = vunpack.i.l.bf16 %v6861_v52  ;;  %v1096_v9 = vmin.f32 %v1025_v50, 6.0  ;;  %v1094_v48 = vmin.f32 %v1023_v26, 6.0  ;;  %v7259_v52 = vld [vmem:[%s10734_s3 + $0x8] ss:$0 sm:$0xff]  ;;  %v6138_v50 = vpop.f32.mrf.mxu0 }
 0x10b   : > { %v7236_v25 = vmul.f32 %v11002_v15, %v1090_v30  ;;  %11003 = vst [vmem:[#allocation35_spill] sm:$0xff] %v7239_v6  ;;  %v1097_v38 = vmin.f32 %v1026_v42, 6.0  ;;  %v1095_v23 = vmin.f32 %v1024_v49, 6.0  ;;  %v822_v11 = vadd.f32 %v6137_v29, %v6998_v20 }
 0x10c   : > { %11001 = vst [vmem:[#allocation34_spill] sm:$0xff] %v7232_v40  ;;  %v7243_v47 = vmul.f32 %v11004_v51, %v1091_v32  ;;  %v4007_v53 = vmul.f32 %v6946_v34, %v7193_v43  ;;  %v11005_v30 = vunpack.i.h.bf16 %v6870_v56  ;;  %v11007_v57 = vunpack.i.h.bf16 %v6867_v54 }
 0x10d   : > { %v4008_v32 = vmul.f32 %v6946_v34, %v7201_v1  ;;  %v4135_v18 = vmul.f32 %v6948_v35, %v7193_v43  ;;  %v11009_v26 = vunpack.i.l.bf16 %v6875_v58  ;;  %v11011_v54 = vunpack.i.l.bf16 %v6870_v56 }
 0x10e   : > { %v7250_v44 = vmul.f32 %v11005_v30, %v1096_v9  ;;  %v7254_v10 = vmul.f32 %v11007_v57, %v1094_v48  ;;  %v1029_v15 = vmax.f32 %v822_v11, 0.0  ;;  %v4069_v42 = vadd.f32 %v4007_v53, %v7178_v36  ;;  %v816_v30 = vpop.f32.mrf.mxu0 }
 0x10f   : > { %v7267_v29 = vmul.f32 %v11009_v26, %v1097_v38  ;;  %v7271_v4 = vmul.f32 %v11011_v54, %v1095_v23  ;;  %v4070_v49 = vadd.f32 %v4008_v32, %v7180_v3  ;;  %v4136_v51 = vmul.f32 %v6948_v35, %v7201_v1 }
 0x110   : > { %11006 = vst [vmem:[#allocation36_spill] sm:$0xff] %v7250_v44  ;;  %11008 = vst [vmem:[#allocation37_spill] sm:$0xff] %v7254_v10  ;;  %v7279_v9 = vmul.f32 %v6948_v35, %v7197_v28  ;;  %v4261_v48 = vrot.slane %v4135_v18, 1  ;;  %v1100_v38 = vmin.f32 %v1029_v15, 6.0  ;;  %v4514_v56 = vmul.f32 %v7259_v52, %v7193_v43  ;;  %v6141_v32 = vpop.f32.mrf.mxu0 }
 0x111   : > { %11010 = vst [vmem:[#allocation38_spill] sm:$0xff] %v7267_v29  ;;  %11012 = vst [vmem:[#allocation39_spill] sm:$0xff] %v7271_v4  ;;  %v4515_v23 = vmul.f32 %v7259_v52, %v7201_v1  ;;  %v7287_v36 = vmul.f32 %v7259_v52, %v7197_v28  ;;  %v4262_v3 = vrot.slane %v4136_v51, 1  ;;  %v814_v53 = vadd.f32 %v6998_v20, %v813_v39 }
 0x112   : > { %v4264_v11 = vrot.slane %v7279_v9, 1  ;;  %v825_v57 = vadd.f32 %v6138_v50, %v6998_v20  ;;  %v11013_v18 = vunpack.i.h.bf16 %v6879_v59  ;;  %v4640_v54 = vrot.slane %v4514_v56, 2 }
 0x113   : > { %v4641_v15 = vrot.slane %v4515_v23, 2  ;;  %v4643_v29 = vrot.slane %v7287_v36, 2  ;;  %v4263_v6 = vsel %vm2487_vm5, %v4261_v48, %v4262_v3  ;;  %v1027_v44 = vmax.f32 %v814_v53, 0.0 }
 0x114   : > { %v7294_v26 = vmul.f32 %v11013_v18, %v1100_v38  ;;  %v4265_v51 = vsel %vm2487_vm5, %v4262_v3, %v4264_v11  ;;  %v1030_v4 = vmax.f32 %v825_v57, 0.0  ;;  %v4448_v39 = vadd.f32 %v4263_v6, %v4069_v42 }
 0x115   : > { %v4449_v10 = vadd.f32 %v4265_v51, %v4070_v49  ;;  %v4642_v50 = vsel %vm2867_vm6, %v4640_v54, %v4641_v15  ;;  %v4644_v38 = vsel %vm2867_vm6, %v4641_v15, %v4643_v29  ;;  %v1098_v56 = vmin.f32 %v1027_v44, 6.0  ;;  %v7317_v44 = vld [vmem:[%s10735_s4] ss:$0 sm:$0xff] }
 0x116   : > { %11014 = vst [vmem:[#allocation40_spill] sm:$0xff] %v7294_v26  ;;  %v1101_v23 = vmin.f32 %v1030_v4, 6.0  ;;  %v817_v18 = vadd.f32 %v6998_v20, %v816_v30  ;;  %v838_v48 = vadd.f32 %v6141_v32, %v6998_v20  ;;  %v829_v26 = vpop.f32.mrf.mxu0  ;;  %v4827_v40 = vadd.f32 %v4642_v50, %v4448_v39 }
 0x117   : > { %v4828_v3 = vadd.f32 %v4644_v38, %v4449_v10  ;;  %v2678_v6 = vadd.f32 %v7132_v22, %v7055_v27  ;;  %v11015_v42 = vrot.slane %v7115_v19, 2  ;;  %v11016_v49 = vrot.slane %v7061_v37, 2 }
 0x118   : > { %v11017_v4 = vunpack.i.h.bf16 %v6875_v58  ;;  %v11018_v10 = vunpack.i.l.bf16 %v6881_v60  ;;  %v1028_v27 = vmax.f32 %v817_v18, 0.0  ;;  %v1033_v22 = vmax.f32 %v838_v48, 0.0 }
 0x119   : > { %v2876_v53 = vsel %vm2867_vm6, %v11016_v49, %v11015_v42  ;;  %v4896_v32 = vadd.f32 %v7317_v44, %v4827_v40  ;;  %v4897_v37 = vadd.f32 %v7317_v44, %v4828_v3  ;;  %v3185_v15 = vadd.f32 %v7095_v7, %v7089_v46 }
 0x11a   : > { %v7321_v30 = vmul.f32 %v11017_v4, %v1098_v56  ;;  %v7325_v57 = vmul.f32 %v11018_v10, %v1101_v23  ;;  %v3058_v54 = vadd.f32 %v2876_v53, %v2678_v6  ;;  %v1099_v51 = vmin.f32 %v1028_v27, 6.0  ;;  %v6142_v23 = vpop.f32.mrf.mxu0 }
 0x11b   : > { %v1104_v39 = vmin.f32 %v1033_v22, 6.0  ;;  %v7333_v58 = vmul.f32 %v6940_v31, %v7193_v43  ;;  %v11020_v50 = vrot.slane %v7169_v2, 1  ;;  %v11021_v38 = vrot.slane %v7098_v5, 1 }
 0x11c   : > { %11019 = vst [vmem:[#allocation41_spill] sm:$0xff] %v7325_v57  ;;  %v4958_v40 = vmax.f32 %v4896_v32, 0.0  ;;  %v4959_v18 = vmax.f32 %v4897_v37, 0.0  ;;  %v3186_v48 = vadd.f32 %v7146_v0, %v3058_v54  ;;  %v11022_v7 = vunpack.i.l.bf16 %v6879_v59 }
 0x11d   : > { %v3381_v56 = vsel %vm2487_vm5, %v11021_v38, %v11020_v50  ;;  %v11024_v6 = vunpack.i.h.bf16 %v6883_v61  ;;  %v3382_v49 = vrot.slane %v7333_v58, 1  ;;  %v7352_v5 = vmul.f32 %v6944_v33, %v7193_v43 }
 0x11e   : > { %v3564_v3 = vadd.f32 %v3381_v56, %v3185_v15  ;;  %v7343_v46 = vmul.f32 %v11022_v7, %v1099_v51  ;;  %v5020_v53 = vmin.f32 %v4958_v40, 6.0  ;;  %v5021_v4 = vmin.f32 %v4959_v18, 6.0  ;;  %v832_v51 = vpop.f32.mrf.mxu0 }
 0x11f   : > { %v7347_v42 = vmul.f32 %v11024_v6, %v1104_v39  ;;  %v11026_v10 = vrot.slane %v7172_v16, 2  ;;  %v11027_v0 = vrot.slane %v7101_v45, 2  ;;  %v4009_v27 = vmul.f32 %v6946_v34, %v7197_v28 }
 0x120   : > { %11023 = vst [vmem:[#allocation42_spill] sm:$0xff] %v7343_v46  ;;  %v11028_v22 = vmov %v11020_v50  ;;  %v3761_v37 = vrot.slane %v7352_v5, 2  ;;  %v4010_v15 = vmul.f32 %v6946_v34, %v7204_v8  ;;  %v5082_v39 = vpack.c.bf16 %v5021_v4, %v5020_v53 }
 0x121   : > { %11025 = vst [vmem:[#allocation43_spill] sm:$0xff] %v7347_v42  ;;  %v3760_v59 = vsel %vm2867_vm6, %v11027_v0, %v11026_v10  ;;  %v3383_v32 = vsel %vm2487_vm5, %v11028_v22, %v3382_v49  ;;  %v4138_v50 = vmul.f32 %v6948_v35, %v7204_v8  ;;  %v7373_v38 = vmul.f32 %v6948_v35, %v7214_v41 }
 0x122   : > { %v3943_v54 = vadd.f32 %v3760_v59, %v3564_v3  ;;  %v3565_v45 = vadd.f32 %v3383_v32, %v3186_v48  ;;  %v11029_v2 = vmov %v11026_v10  ;;  %v4517_v18 = vmul.f32 %v7259_v52, %v7204_v8  ;;  %6188 = vmatmul.mubr.msk.bf16.vlgmr.msra.gmra.mxu0 %vm5136_vm7, %v5082_v39 }
 0x123   : > { %v3762_v56 = vsel %vm2867_vm6, %v11029_v2, %v3761_v37  ;;  %v7384_v48 = vmul.f32 %v7259_v52, %v7214_v41  ;;  %v4266_v7 = vrot.slane %v4138_v50, 1  ;;  %v4268_v6 = vrot.slane %v7373_v38, 1 }
 0x124   : > { %v4071_v40 = vadd.f32 %v4009_v27, %v3943_v54  ;;  %v3944_v3 = vadd.f32 %v3762_v56, %v3565_v45  ;;  %v830_v53 = vadd.f32 %v6998_v20, %v829_v26  ;;  %v11030_v4 = vmov 0.0   ;;  %v6145_v27 = vpop.f32.mrf.mxu0 }
 0x125   : > { %6191 = vmatprep.mubr.msk.bf16.mxu0 %vm6656_vm4, %v11030_v4  ;;  %v4645_v16 = vrot.slane %v4517_v18, 2  ;;  %v4647_v10 = vrot.slane %v7384_v48, 2  ;;  %v841_v0 = vadd.f32 %v6142_v23, %v6998_v20  ;;  %v833_v59 = vadd.f32 %v6998_v20, %v832_v51 }
 0x126   : > { %v4072_v22 = vadd.f32 %v4010_v15, %v3944_v3  ;;  %v4267_v32 = vsel %vm2487_vm5, %v4264_v11, %v4266_v7  ;;  %v4269_v26 = vsel %vm2487_vm5, %v4266_v7, %v4268_v6  ;;  %v1031_v54 = vmax.f32 %v830_v53, 0.0 }
 0x127   : > { %v4450_v39 = vadd.f32 %v4267_v32, %v4071_v40  ;;  %v4646_v45 = vsel %vm2867_vm6, %v4643_v29, %v4645_v16  ;;  %v4648_v23 = vsel %vm2867_vm6, %v4645_v16, %v4647_v10  ;;  %v1034_v51 = vmax.f32 %v841_v0, 0.0 }
 0x128   : > { %v4451_v15 = vadd.f32 %v4269_v26, %v4072_v22  ;;  %v1102_v50 = vmin.f32 %v1031_v54, 6.0  ;;  %v1032_v9 = vmax.f32 %v833_v59, 0.0  ;;  %v854_v11 = vadd.f32 %v6145_v27, %v6998_v20  ;;  %v845_v59 = vpop.f32.mrf.mxu0 }
 0x129   : > { %v4829_v2 = vadd.f32 %v4646_v45, %v4450_v39  ;;  %v1105_v56 = vmin.f32 %v1034_v51, 6.0  ;;  %v2679_v18 = vadd.f32 %v7149_v55, %v7111_v24  ;;  %v11031_v40 = vrot.slane %v7135_v14, 2 }
 0x12a   : > { %v11032_v36 = vrot.slane %v7115_v19, 2  ;;  %v4830_v3 = vadd.f32 %v4648_v23, %v4451_v15  ;;  %v11033_v7 = vunpack.i.h.bf16 %v6881_v60  ;;  %v1103_v16 = vmin.f32 %v1032_v9, 6.0  ;;  %v11041_v15 = vld [vmem:[#allocation20_spill] sm:$0xff] }
 0x12b   : > { %v1037_v0 = vmax.f32 %v854_v11, 0.0  ;;  %v4898_v27 = vadd.f32 %v7317_v44, %v4829_v2  ;;  %v11035_v22 = vunpack.i.l.bf16 %v6885_v62  ;;  %v11037_v55 = vrot.slane %v7092_v17, 2  ;;  %v11042_v2 = vld [vmem:[#allocation2_spill] sm:$0xff] }
 0x12c   : > { %v2878_v29 = vsel %vm2867_vm6, %v11032_v36, %v11031_v40  ;;  %v7416_v53 = vmul.f32 %v11033_v7, %v1102_v50  ;;  %v11038_v24 = vmov %v11031_v40  ;;  %v4899_v60 = vadd.f32 %v7317_v44, %v4830_v3  ;;  %v6146_v40 = vpop.f32.mrf.mxu0 }
 0x12d   : > { %v7421_v32 = vmul.f32 %v11035_v22, %v1105_v56  ;;  %v2880_v19 = vsel %vm2867_vm6, %v11038_v24, %v11037_v55  ;;  %v3059_v26 = vadd.f32 %v2878_v29, %v2679_v18  ;;  %v11039_v54 = vunpack.i.l.bf16 %v6883_v61 }
 0x12e   : > { %11034 = vst [vmem:[#allocation44_spill] sm:$0xff] %v7416_v53  ;;  %v1108_v45 = vmin.f32 %v1037_v0, 6.0  ;;  %v3060_v23 = vadd.f32 %v2880_v19, %v7157_v63  ;;  %v4960_v51 = vmax.f32 %v4898_v27, 0.0  ;;  %v3125_v50 = vmul.f32 %v11041_v15, %v7193_v43 }
 0x12f   : > { %11036 = vst [vmem:[#allocation45_spill] sm:$0xff] %v7421_v32  ;;  %v7431_v39 = vmul.f32 %v11039_v54, %v1103_v16  ;;  %v3126_v9 = vmul.f32 %v11041_v15, %v7201_v1  ;;  %v3254_v14 = vmul.f32 %v6940_v31, %v7201_v1  ;;  %v4961_v11 = vmax.f32 %v4899_v60, 0.0 }
 0x130   : > { %v11043_v56 = vunpack.i.h.bf16 %v11042_v2  ;;  %v7446_v61 = vmul.f32 %v6940_v31, %v7197_v28  ;;  %v3633_v63 = vmul.f32 %v6944_v33, %v7201_v1  ;;  %v5022_v36 = vmin.f32 %v4960_v51, 6.0 }
 0x131   : > { %11040 = vst [vmem:[#allocation46_spill] sm:$0xff] %v7431_v39  ;;  %v3187_v29 = vadd.f32 %v3125_v50, %v3059_v26  ;;  %v3188_v3 = vadd.f32 %v3126_v9, %v3060_v23  ;;  %v3384_v7 = vrot.slane %v3254_v14, 1  ;;  %v5023_v16 = vmin.f32 %v4961_v11, 6.0 }
 0x132   : > { %v7442_v18 = vmul.f32 %v11043_v56, %v1108_v45  ;;  %v3386_v0 = vrot.slane %v7446_v61, 1  ;;  %v7453_v27 = vmul.f32 %v6944_v33, %v7197_v28  ;;  %v3763_v22 = vrot.slane %v3633_v63, 2 }
 0x133   : > { %v3385_v55 = vsel %vm2487_vm5, %v3382_v49, %v3384_v7  ;;  %v4011_v24 = vmul.f32 %v6946_v34, %v7214_v41  ;;  %v4012_v19 = vmul.f32 %v6946_v34, %v7224_v21  ;;  %v4140_v26 = vmul.f32 %v6948_v35, %v7224_v21  ;;  %v848_v49 = vpop.f32.mrf.mxu0 }
 0x134   : > { %11044 = vst [vmem:[#allocation20_spill] sm:$0xff] %v7442_v18  ;;  %v5083_v60 = vpack.c.bf16 %v5023_v16, %v5022_v36  ;;  %v3387_v54 = vsel %vm2487_vm5, %v3384_v7, %v3386_v0  ;;  %v3566_v45 = vadd.f32 %v3385_v55, %v3187_v29  ;;  %v3764_v58 = vsel %vm2867_vm6, %v3761_v37, %v3763_v22 }
 0x135   : > { %v3567_v23 = vadd.f32 %v3387_v54, %v3188_v3  ;;  %v3765_v51 = vrot.slane %v7453_v27, 2  ;;  %v7473_v50 = vmul.f32 %v6948_v35, %v7210_v13  ;;  %v4270_v9 = vrot.slane %v4140_v26, 1  ;;  %v6149_v55 = vpop.f32.mrf.mxu0 }
 0x136   : > { %6192 = vmatmul.mubr.msk.bf16.gmra.mxu0 %vm5136_vm7, %v5083_v60  ;;  %v3945_v14 = vadd.f32 %v3764_v58, %v3566_v45  ;;  %v4519_v11 = vmul.f32 %v7259_v52, %v7224_v21  ;;  %v7480_v5 = vmul.f32 %v7259_v52, %v7210_v13  ;;  %v846_v37 = vadd.f32 %v6998_v20, %v845_v59 }
 0x137   : > { %6195 = vmatprep.mubr.msk.bf16.mxu0 %vm6656_vm4, %v11030_v4  ;;  %v3766_v56 = vsel %vm2867_vm6, %v3763_v22, %v3765_v51  ;;  %v4271_v63 = vsel %vm2487_vm5, %v4268_v6, %v4270_v9  ;;  %v4272_v36 = vrot.slane %v7473_v50, 1  ;;  %v857_v29 = vadd.f32 %v6146_v40, %v6998_v20 }
 0x138   : > { %v3946_v3 = vadd.f32 %v3766_v56, %v3567_v23  ;;  %v4073_v7 = vadd.f32 %v4011_v24, %v3945_v14  ;;  %v4649_v16 = vrot.slane %v4519_v11, 2  ;;  %v10799_v59 = vrot.slane %v7480_v5, 2  ;;  %v11047_v56 = vld [vmem:[#allocation32_spill] sm:$0xff] }
 0x139   : > { %v4273_v26 = vsel %vm2487_vm5, %v4270_v9, %v4272_v36  ;;  %v1035_v60 = vmax.f32 %v846_v37, 0.0  ;;  %v1038_v22 = vmax.f32 %v857_v29, 0.0  ;;  %v849_v38 = vadd.f32 %v6998_v20, %v848_v49  ;;  %v11045_v37 = vld [vmem:[#allocation18_spill] sm:$0xff]  ;;  %v11050_v29 = vld [vmem:[#allocation3_spill] sm:$0xff] }
 0x13a   : > { %v4074_v54 = vadd.f32 %v4012_v19, %v3946_v3  ;;  %v4452_v6 = vadd.f32 %v4271_v63, %v4073_v7  ;;  %v4650_v40 = vsel %vm2867_vm6, %v4647_v10, %v4649_v16  ;;  %v4652_v24 = vsel %vm2867_vm6, %v4649_v16, %v10799_v59  ;;  %v11046_v19 = vld [vmem:[#allocation28_spill] sm:$0xff] }
 0x13b   : > { %v1106_v45 = vmin.f32 %v1035_v60, 6.0  ;;  %v1109_v58 = vmin.f32 %v1038_v22, 6.0  ;;  %v1036_v23 = vmax.f32 %v849_v38, 0.0  ;;  %v870_v14 = vadd.f32 %v6149_v55, %v6998_v20  ;;  %v11053_v22 = vld [vmem:[#allocation19_spill] sm:$0xff] }
 0x13c   : > { %v4453_v9 = vadd.f32 %v4273_v26, %v4074_v54  ;;  %v4831_v11 = vadd.f32 %v4650_v40, %v4452_v6  ;;  %v7507_v49 = vmul.f32 %v11045_v37, %v7193_v43  ;;  %v2681_v48 = vadd.f32 %v11047_v56, %v11046_v19  ;;  %v7525_v54 = vpop.f32.mrf.mxu0  ;;  %v11059_v19 = vld [vmem:[#allocation30_spill] sm:$0xff] }
 0x13d   : > { %v11048_v10 = vunpack.i.h.bf16 %v6885_v62  ;;  %v11051_v3 = vunpack.i.l.bf16 %v11050_v29  ;;  %v1107_v16 = vmin.f32 %v1036_v23, 6.0  ;;  %v1041_v60 = vmax.f32 %v870_v14, 0.0 }
 0x13e   : > { %v4832_v20 = vadd.f32 %v4652_v24, %v4453_v9  ;;  %v4900_v55 = vadd.f32 %v7317_v44, %v4831_v11  ;;  %v10798_v26 = vrot.slane %v7507_v49, 1  ;;  %v7523_v38 = vmul.f32 %v11053_v22, %v7193_v43  ;;  %v7559_v59 = vpop.f32.mrf.mxu0 }
 0x13f   : > { %v7513_v63 = vmul.f32 %v11048_v10, %v1106_v45  ;;  %v7517_v7 = vmul.f32 %v11051_v3, %v1109_v58  ;;  %v11054_v62 = vunpack.i.l.bf16 %v11042_v2  ;;  %v1112_v40 = vmin.f32 %v1041_v60, 6.0  ;;  %v11056_v45 = vld [vmem:[#allocation31_spill] sm:$0xff]  ;;  %v11061_v3 = vld [vmem:[#allocation4_spill] sm:$0xff] }
 0x140   : > { %v11057_v58 = vrot.slane %v11056_v45, 2  ;;  %v11058_v23 = vrot.slane %v7092_v17, 2  ;;  %v3127_v14 = vmul.f32 %v11041_v15, %v7197_v28  ;;  %v4901_v9 = vadd.f32 %v7317_v44, %v4832_v20  ;;  %v11064_v17 = vld [vmem:[#allocation29_spill] sm:$0xff] }
 0x141   : > { %11049 = vst [vmem:[#allocation2_spill] sm:$0xff] %v7513_v63  ;;  %11052 = vst [vmem:[#allocation18_spill] sm:$0xff] %v7517_v7  ;;  %v7529_v6 = vmul.f32 %v11054_v62, %v1107_v16  ;;  %v4962_v11 = vmax.f32 %v4900_v55, 0.0  ;;  %v11060_v56 = vrot.slane %v11059_v19, 1  ;;  %v10800_v10 = vrot.slane %v7523_v38, 2 }
 0x142   : > { %v2882_v24 = vsel %vm2867_vm6, %v11058_v23, %v11057_v58  ;;  %v11062_v16 = vunpack.i.h.bf16 %v11061_v3  ;;  %v3128_v23 = vmul.f32 %v11041_v15, %v7204_v8  ;;  %v4963_v20 = vmax.f32 %v4901_v9, 0.0 }
 0x143   : > { %11055 = vst [vmem:[#allocation28_spill] sm:$0xff] %v7529_v6  ;;  %v2504_v2 = vsel %vm2487_vm5, %v11060_v56, %v10798_v26  ;;  %v3061_v58 = vadd.f32 %v2882_v24, %v2681_v48  ;;  %v5024_v55 = vmin.f32 %v4962_v11, 6.0  ;;  %v11065_v19 = vrot.slane %v11056_v45, 2 }
 0x144   : > { %v7547_v60 = vmul.f32 %v11062_v16, %v1112_v40  ;;  %v2682_v62 = vadd.f32 %v2504_v2, %v11064_v17  ;;  %v3256_v26 = vmul.f32 %v6940_v31, %v7204_v8  ;;  %v7563_v48 = vmul.f32 %v6940_v31, %v7214_v41 }
 0x145   : > { %v2884_v56 = vsel %vm2867_vm6, %v11065_v19, %v10800_v10  ;;  %v3189_v16 = vadd.f32 %v3127_v14, %v3061_v58  ;;  %v3635_v24 = vmul.f32 %v6944_v33, %v7204_v8  ;;  %v5025_v9 = vmin.f32 %v4963_v20, 6.0  ;;  %v7582_v10 = vpop.f32.mrf.mxu0 }
 0x146   : > { %11063 = vst [vmem:[#allocation32_spill] sm:$0xff] %v7547_v60  ;;  %v3062_v40 = vadd.f32 %v2884_v56, %v2682_v62  ;;  %v3388_v11 = vrot.slane %v3256_v26, 1  ;;  %v7569_v45 = vmul.f32 %v6944_v33, %v7214_v41  ;;  %v4013_v2 = vmul.f32 %v6946_v34, %v7210_v13 }
 0x147   : > { %v10802_v62 = vrot.slane %v7563_v48, 1  ;;  %v3767_v14 = vrot.slane %v3635_v24, 2  ;;  %v4014_v58 = vmul.f32 %v6946_v34, %v7220_v12  ;;  %v5084_v19 = vpack.c.bf16 %v5025_v9, %v5024_v55 }
 0x148   : > { %v3190_v17 = vadd.f32 %v3128_v23, %v3062_v40  ;;  %v3389_v20 = vsel %vm2487_vm5, %v3386_v0, %v3388_v11  ;;  %v10801_v26 = vrot.slane %v7569_v45, 2  ;;  %v4142_v56 = vmul.f32 %v6948_v35, %v7220_v12 }
 0x149   : > { %v3391_v23 = vsel %vm2487_vm5, %v3388_v11, %v10802_v62  ;;  %v3568_v40 = vadd.f32 %v3389_v20, %v3189_v16  ;;  %v3768_v55 = vsel %vm2867_vm6, %v3765_v51, %v3767_v14  ;;  %v7592_v61 = vmul.f32 %v6948_v35, %v7236_v25  ;;  %6196 = vmatmul.mubr.msk.bf16.gmra.mxu0 %vm5136_vm7, %v5084_v19 }
 0x14a   : > { %v3569_v0 = vadd.f32 %v3391_v23, %v3190_v17  ;;  %v3770_v24 = vsel %vm2867_vm6, %v3767_v14, %v10801_v26  ;;  %v4274_v9 = vrot.slane %v4142_v56, 1  ;;  %v4521_v11 = vmul.f32 %v7259_v52, %v7220_v12  ;;  %6199 = vmatprep.mubr.msk.bf16.mxu0 %vm6656_vm4, %v11030_v4  ;;  %v11066_v17 = vld [vmem:[#allocation16_spill] sm:$0xff]  ;;  %v7614_v26 = vpop.f32.mrf.mxu0 }
 0x14b   : > { %v3947_v27 = vadd.f32 %v3768_v55, %v3568_v40  ;;  %v10803_v51 = vrot.slane %v7592_v61, 1  ;;  %v7605_v16 = vmul.f32 %v7259_v52, %v7236_v25  ;;  %v2245_v19 = vmul.f32 %v11066_v17, %v7214_v41 }
 0x14c   : > { %v3948_v20 = vadd.f32 %v3770_v24, %v3569_v0  ;;  %v4275_v14 = vsel %vm2487_vm5, %v4272_v36, %v4274_v9  ;;  %v4653_v56 = vrot.slane %v4521_v11, 2  ;;  %v2246_v23 = vmul.f32 %v11066_v17, %v7224_v21  ;;  %v7644_v7 = vpop.f32.mrf.mxu0 }
 0x14d   : > { %v4075_v40 = vadd.f32 %v4013_v2, %v3947_v27  ;;  %v4277_v55 = vsel %vm2487_vm5, %v4274_v9, %v10803_v51  ;;  %v10806_v62 = vrot.slane %v7605_v16, 2  ;;  %v7622_v0 = vmul.f32 %v11045_v37, %v7214_v41 }
 0x14e   : > { %v4076_v50 = vadd.f32 %v4014_v58, %v3948_v20  ;;  %v11068_v36 = vrot.slane %v7480_v5, 2  ;;  %v2374_v11 = vmul.f32 %v11045_v37, %v7224_v21  ;;  %v7631_v2 = vmul.f32 %v11045_v37, %v7210_v13 }
 0x14f   : > { %11067 = vst [vmem:[#allocation3_spill] sm:$0xff] %v7622_v0  ;;  %v4454_v27 = vadd.f32 %v4275_v14, %v4075_v40  ;;  %v4656_v9 = vsel %vm2867_vm6, %v4653_v56, %v10806_v62  ;;  %v7639_v58 = vmul.f32 %v11053_v22, %v7214_v41  ;;  %v2754_v60 = vmul.f32 %v11053_v22, %v7224_v21 }
 0x150   : > { %v4654_v24 = vsel %vm2867_vm6, %v11068_v36, %v4653_v56  ;;  %v4455_v5 = vadd.f32 %v4277_v55, %v4076_v50  ;;  %v2513_v20 = vrot.slane %v2374_v11, 1  ;;  %v10811_v36 = vrot.slane %v7631_v2, 1 }
 0x151   : > { %11069 = vst [vmem:[#allocation19_spill] sm:$0xff] %v7639_v58  ;;  %v4833_v14 = vadd.f32 %v4654_v24, %v4454_v27  ;;  %v7648_v40 = vmul.f32 %v11053_v22, %v7210_v13  ;;  %v3133_v62 = vmul.f32 %v11041_v15, %v7236_v25  ;;  %v11070_v55 = vrot.slane %v7622_v0, 1 }
 0x152   : > { %v4834_v51 = vadd.f32 %v4656_v9, %v4455_v5  ;;  %v2516_v11 = vsel %vm2487_vm5, %v2513_v20, %v10811_v36  ;;  %v2893_v18 = vrot.slane %v2754_v60, 2  ;;  %v11071_v32 = vrot.slane %v7639_v58, 2  ;;  %v7671_v60 = vpop.f32.mrf.mxu0 }
 0x153   : > { %v2514_v50 = vsel %vm2487_vm5, %v11070_v55, %v2513_v20  ;;  %v4902_v24 = vadd.f32 %v7317_v44, %v4833_v14  ;;  %v2688_v6 = vadd.f32 %v2516_v11, %v2246_v23  ;;  %v10815_v63 = vrot.slane %v7648_v40, 2 }
 0x154   : > { %v2687_v27 = vadd.f32 %v2514_v50, %v2245_v19  ;;  %v4903_v56 = vadd.f32 %v7317_v44, %v4834_v51  ;;  %v2894_v9 = vsel %vm2867_vm6, %v11071_v32, %v2893_v18  ;;  %v3134_v5 = vmul.f32 %v11041_v15, %v7243_v47  ;;  %v11073_v50 = vld [vmem:[#allocation34_spill] sm:$0xff] }
 0x155   : > { %v7669_v55 = vmul.f32 %v6940_v31, %v7236_v25  ;;  %v4964_v20 = vmax.f32 %v4902_v24, 0.0  ;;  %v2896_v19 = vsel %vm2867_vm6, %v2893_v18, %v10815_v63  ;;  %v3262_v51 = vmul.f32 %v6940_v31, %v7243_v47 }
 0x156   : > { %v3067_v23 = vadd.f32 %v2894_v9, %v2687_v27  ;;  %v4965_v14 = vmax.f32 %v4903_v56, 0.0  ;;  %v3068_v32 = vadd.f32 %v2896_v19, %v2688_v6  ;;  %v7680_v11 = vmul.f32 %v6940_v31, %v11073_v50  ;;  %v7690_v56 = vpop.f32.mrf.mxu0 }
 0x157   : > { %11072 = vst [vmem:[#allocation31_spill] sm:$0xff] %v7669_v55  ;;  %v10818_v36 = vrot.slane %v7669_v55, 1  ;;  %v5026_v42 = vmin.f32 %v4964_v20, 6.0  ;;  %v3400_v53 = vrot.slane %v3262_v51, 1  ;;  %v7685_v24 = vmul.f32 %v6944_v33, %v7236_v25  ;;  %11075 = vst [vmem:[#allocation4_spill] sm:$0xff] %v7690_v56 }
 0x158   : > { %v3195_v39 = vadd.f32 %v3133_v62, %v3067_v23  ;;  %v5027_v18 = vmin.f32 %v4965_v14, 6.0  ;;  %v3196_v27 = vadd.f32 %v3134_v5, %v3068_v32  ;;  %v10822_v9 = vrot.slane %v7680_v11, 1  ;;  %v11076_v23 = vld [vmem:[#allocation37_spill] sm:$0xff] }
 0x159   : > { %11074 = vst [vmem:[#allocation30_spill] sm:$0xff] %v7685_v24  ;;  %v3641_v6 = vmul.f32 %v6944_v33, %v7243_v47  ;;  %v3401_v19 = vsel %vm2487_vm5, %v10818_v36, %v3400_v53  ;;  %v7697_v62 = vmul.f32 %v6944_v33, %v11073_v50  ;;  %v10821_v20 = vrot.slane %v7685_v24, 2  ;;  %v11077_v36 = vld [vmem:[#allocation39_spill] sm:$0xff] }
 0x15a   : > { %v4019_v5 = vmul.f32 %v6946_v34, %v11076_v23  ;;  %v5085_v51 = vpack.c.bf16 %v5027_v18, %v5026_v42  ;;  %v3403_v14 = vsel %vm2487_vm5, %v3400_v53, %v10822_v9  ;;  %v3574_v32 = vadd.f32 %v3401_v19, %v3195_v39  ;;  %v11078_v39 = vld [vmem:[#allocation36_spill] sm:$0xff] }
 0x15b   : > { %v3779_v63 = vrot.slane %v3641_v6, 2  ;;  %v3575_v57 = vadd.f32 %v3403_v14, %v3196_v27  ;;  %v10827_v46 = vrot.slane %v7697_v62, 2  ;;  %v4020_v55 = vmul.f32 %v6946_v34, %v11077_v36  ;;  %v7726_v6 = vpop.f32.mrf.mxu0 }
 0x15c   : > { %v7710_v58 = vmul.f32 %v6948_v35, %v11076_v23  ;;  %6200 = vmatmul.mubr.msk.bf16.gmra.mxu0 %vm5136_vm7, %v5085_v51  ;;  %v4148_v53 = vmul.f32 %v6948_v35, %v11077_v36  ;;  %v7720_v18 = vmul.f32 %v6948_v35, %v11078_v39  ;;  %v7724_v27 = vmul.f32 %v7259_v52, %v11076_v23 }
 0x15d   : > { %v3780_v42 = vsel %vm2867_vm6, %v10821_v20, %v3779_v63  ;;  %11079 = vst [vmem:[#allocation29_spill] sm:$0xff] %v7726_v6  ;;  %v3782_v19 = vsel %vm2867_vm6, %v3779_v63, %v10827_v46  ;;  %v4527_v20 = vmul.f32 %v7259_v52, %v11077_v36  ;;  %6203 = vmatprep.mubr.msk.bf16.mxu0 %vm6656_vm4, %v11030_v4 }
 0x15e   : > { %v3953_v51 = vadd.f32 %v3780_v42, %v3574_v32  ;;  %v10829_v14 = vrot.slane %v7710_v58, 1  ;;  %v3954_v9 = vadd.f32 %v3782_v19, %v3575_v57  ;;  %v4286_v24 = vrot.slane %v4148_v53, 1  ;;  %v7745_v42 = vld [vmem:[%s10733_s2] ss:$0 sm:$0xff] }
 0x15f   : > { %v10830_v0 = vrot.slane %v7720_v18, 1  ;;  %v7739_v8 = vmul.f32 %v7259_v52, %v11078_v39  ;;  %v10831_v63 = vrot.slane %v7724_v27, 2  ;;  %v4665_v32 = vrot.slane %v4527_v20, 2  ;;  %v7756_v20 = vpop.f32.mrf.mxu0 }
 0x160   : > { %v4081_v6 = vadd.f32 %v4019_v5, %v3953_v51  ;;  %v862_v46 = vadd.f32 %v7745_v42, %v7525_v54  ;;  %v4082_v57 = vadd.f32 %v4020_v55, %v3954_v9  ;;  %v4287_v53 = vsel %vm2487_vm5, %v10829_v14, %v4286_v24  ;;  %11080 = vst [vmem:[#allocation16_spill] sm:$0xff] %v7756_v20 }
 0x161   : > { %v4289_v5 = vsel %vm2487_vm5, %v4286_v24, %v10830_v0  ;;  %v10832_v19 = vrot.slane %v7739_v8, 2  ;;  %v4666_v36 = vsel %vm2867_vm6, %v10831_v63, %v4665_v32  ;;  %v873_v54 = vadd.f32 %v7745_v42, %v7559_v59 }
 0x162   : > { %v4460_v51 = vadd.f32 %v4287_v53, %v4081_v6  ;;  %v1039_v56 = vmax.f32 %v862_v46, 0.0  ;;  %v4461_v55 = vadd.f32 %v4289_v5, %v4082_v57  ;;  %v865_v24 = vadd.f32 %v7745_v42, %v7582_v10  ;;  %v7774_v5 = vpop.f32.mrf.mxu0 }
 0x163   : > { %v4668_v9 = vsel %vm2867_vm6, %v4665_v32, %v10832_v19  ;;  %v886_v14 = vadd.f32 %v7745_v42, %v7614_v26  ;;  %v1042_v0 = vmax.f32 %v873_v54, 0.0  ;;  %v2241_v46 = vmul.f32 %v11066_v17, %v7193_v43  ;;  %11081 = vst [vmem:[#allocation34_spill] sm:$0xff] %v7774_v5 }
 0x164   : > { %v4839_v6 = vadd.f32 %v4666_v36, %v4460_v51  ;;  %v1110_v53 = vmin.f32 %v1039_v56, 6.0  ;;  %v4840_v63 = vadd.f32 %v4668_v9, %v4461_v55  ;;  %v1040_v20 = vmax.f32 %v865_v24, 0.0  ;;  %v11084_v55 = vld [vmem:[#allocation5_spill] sm:$0xff] }
 0x165   : > { %v1045_v59 = vmax.f32 %v886_v14, 0.0  ;;  %v2242_v57 = vmul.f32 %v11066_v17, %v7201_v1  ;;  %v11082_v10 = vunpack.i.h.bf16 %v11050_v29  ;;  %v1113_v26 = vmin.f32 %v1042_v0, 6.0 }
 0x166   : > { %v4908_v32 = vadd.f32 %v7317_v44, %v4839_v6  ;;  %v2370_v36 = vmul.f32 %v11045_v37, %v7201_v1  ;;  %v4909_v43 = vadd.f32 %v7317_v44, %v4840_v63  ;;  %v1111_v56 = vmin.f32 %v1040_v20, 6.0  ;;  %v11089_v63 = vld [vmem:[#allocation6_spill] sm:$0xff] }
 0x167   : > { %v7779_v19 = vmul.f32 %v11082_v10, %v1110_v53  ;;  %v1116_v51 = vmin.f32 %v1045_v59, 6.0  ;;  %v7786_v14 = vmul.f32 %v11045_v37, %v7197_v28  ;;  %v11085_v9 = vunpack.i.l.bf16 %v11084_v55 }
 0x168   : > { %v4970_v54 = vmax.f32 %v4908_v32, 0.0  ;;  %v2505_v29 = vrot.slane %v2370_v36, 1  ;;  %v2750_v0 = vmul.f32 %v11053_v22, %v7201_v1  ;;  %v4971_v6 = vmax.f32 %v4909_v43, 0.0  ;;  %v7803_v32 = vpop.f32.mrf.mxu0 }
 0x169   : > { %11083 = vst [vmem:[#allocation37_spill] sm:$0xff] %v7779_v19  ;;  %v7790_v24 = vmul.f32 %v11085_v9, %v1113_v26  ;;  %v11087_v53 = vunpack.i.l.bf16 %v11061_v3  ;;  %v11090_v20 = vunpack.i.h.bf16 %v11089_v63  ;;  %v10836_v19 = vrot.slane %v7786_v14, 1  ;;  %11092 = vst [vmem:[#allocation47_spill] sm:$0xff] %v7803_v32 }
 0x16a   : > { %v5032_v5 = vmin.f32 %v4970_v54, 6.0  ;;  %v11093_v26 = vrot.slane %v7507_v49, 1  ;;  %v7810_v1 = vmul.f32 %v11053_v22, %v7197_v28  ;;  %v2885_v3 = vrot.slane %v2750_v0, 2 }
 0x16b   : > { %11086 = vst [vmem:[#allocation36_spill] sm:$0xff] %v7790_v24  ;;  %v7796_v10 = vmul.f32 %v11087_v53, %v1111_v56  ;;  %v7800_v59 = vmul.f32 %v11090_v20, %v1116_v51  ;;  %v5033_v43 = vmin.f32 %v4971_v6, 6.0  ;;  %v2508_v56 = vsel %vm2487_vm5, %v2505_v29, %v10836_v19 }
 0x16c   : > { %v2506_v36 = vsel %vm2487_vm5, %v11093_v26, %v2505_v29  ;;  %v3129_v9 = vmul.f32 %v11041_v15, %v7214_v41  ;;  %v2684_v53 = vadd.f32 %v2508_v56, %v2242_v57  ;;  %v11094_v54 = vrot.slane %v7523_v38, 2  ;;  %v7829_v41 = vpop.f32.mrf.mxu0 }
 0x16d   : > { %11088 = vst [vmem:[#allocation5_spill] sm:$0xff] %v7796_v10  ;;  %11091 = vst [vmem:[#allocation6_spill] sm:$0xff] %v7800_v59  ;;  %v2683_v51 = vadd.f32 %v2506_v36, %v2241_v46  ;;  %v10835_v20 = vrot.slane %v7810_v1, 2  ;;  %v3130_v26 = vmul.f32 %v11041_v15, %v7224_v21  ;;  %v5088_v0 = vpack.c.bf16 %v5033_v43, %v5032_v5 }
 0x16e   : > { %v2886_v49 = vsel %vm2867_vm6, %v11094_v54, %v2885_v3  ;;  %v3258_v59 = vmul.f32 %v6940_v31, %v7224_v21  ;;  %v7827_v46 = vmul.f32 %v6940_v31, %v7210_v13  ;;  %11095 = vst [vmem:[#allocation48_spill] sm:$0xff] %v7829_v41  ;;  %v3637_v57 = vmul.f32 %v6944_v33, %v7224_v21 }
 0x16f   : > { %v3063_v6 = vadd.f32 %v2886_v49, %v2683_v51  ;;  %v2888_v38 = vsel %vm2867_vm6, %v2885_v3, %v10835_v20  ;;  %v7838_v5 = vmul.f32 %v6944_v33, %v7210_v13  ;;  %v4015_v29 = vmul.f32 %v6946_v34, %v7236_v25  ;;  %6212 = vmatmul.mubr.msk.bf16.vlgmr.msra.gmra.mxu1 %vm5136_vm7, %v5088_v0 }
 0x170   : > { %v3064_v36 = vadd.f32 %v2888_v38, %v2684_v53  ;;  %v3392_v56 = vrot.slane %v3258_v59, 1  ;;  %v10837_v51 = vrot.slane %v7827_v46, 1  ;;  %6215 = vmatprep.mubr.msk.bf16.mxu1 %vm6656_vm4, %v11030_v4  ;;  %v3771_v3 = vrot.slane %v3637_v57, 2 }
 0x171   : > { %v3191_v43 = vadd.f32 %v3129_v9, %v3063_v6  ;;  %v10838_v21 = vrot.slane %v7838_v5, 2  ;;  %v4016_v54 = vmul.f32 %v6946_v34, %v7243_v47  ;;  %v4144_v49 = vmul.f32 %v6948_v35, %v7243_v47  ;;  %v7861_v6 = vpop.f32.mrf.mxu0 }
 0x172   : > { %v3192_v20 = vadd.f32 %v3130_v26, %v3064_v36  ;;  %v11096_v0 = vrot.slane %v7563_v48, 1  ;;  %v3395_v59 = vsel %vm2487_vm5, %v3392_v56, %v10837_v51  ;;  %v7859_v53 = vmul.f32 %v6948_v35, %v11073_v50  ;;  %11097 = vst [vmem:[#allocation49_spill] sm:$0xff] %v7861_v6 }
 0x173   : > { %v11098_v57 = vrot.slane %v7569_v45, 2  ;;  %v3774_v48 = vsel %vm2867_vm6, %v3771_v3, %v10838_v21  ;;  %v4278_v26 = vrot.slane %v4144_v49, 1  ;;  %v7874_v51 = vmul.f32 %v7259_v52, %v11073_v50  ;;  %v7887_v24 = vpop.f32.mrf.mxu0 }
 0x174   : > { %v3393_v9 = vsel %vm2487_vm5, %v11096_v0, %v3392_v56  ;;  %v3571_v36 = vadd.f32 %v3395_v59, %v3192_v20  ;;  %v10840_v0 = vrot.slane %v7859_v53, 1  ;;  %v4523_v56 = vmul.f32 %v7259_v52, %v7243_v47  ;;  %11100 = vst [vmem:[#allocation50_spill] sm:$0xff] %v7887_v24 }
 0x175   : > { %v3570_v38 = vadd.f32 %v3393_v9, %v3191_v43  ;;  %v3772_v19 = vsel %vm2867_vm6, %v11098_v57, %v3771_v3  ;;  %v11099_v45 = vrot.slane %v7592_v61, 1  ;;  %v2247_v57 = vmul.f32 %v11066_v17, %v7210_v13  ;;  %v7913_v41 = vpop.f32.mrf.mxu0 }
 0x176   : > { %v2248_v20 = vmul.f32 %v11066_v17, %v7220_v12  ;;  %v3950_v3 = vadd.f32 %v3774_v48, %v3571_v36  ;;  %v4281_v49 = vsel %vm2487_vm5, %v4278_v26, %v10840_v0  ;;  %v4657_v59 = vrot.slane %v4523_v56, 2 }
 0x177   : > { %v3949_v43 = vadd.f32 %v3772_v19, %v3570_v38  ;;  %v4279_v9 = vsel %vm2487_vm5, %v11099_v45, %v4278_v26  ;;  %v10842_v21 = vrot.slane %v7874_v51, 2  ;;  %v2376_v61 = vmul.f32 %v11045_v37, %v7220_v12 }
 0x178   : > { %v7893_v38 = vmul.f32 %v11045_v37, %v7236_v25  ;;  %v2756_v48 = vmul.f32 %v11053_v22, %v7220_v12  ;;  %v4078_v36 = vadd.f32 %v4016_v54, %v3950_v3  ;;  %v11101_v45 = vrot.slane %v7605_v16, 2  ;;  %v11103_v3 = vld [vmem:[#allocation35_spill] sm:$0xff] }
 0x179   : > { %v4077_v19 = vadd.f32 %v4015_v29, %v3949_v43  ;;  %v4660_v56 = vsel %vm2867_vm6, %v4657_v59, %v10842_v21  ;;  %v7905_v29 = vmul.f32 %v11053_v22, %v7236_v25  ;;  %v2517_v0 = vrot.slane %v2376_v61, 1  ;;  %11104 = vst [vmem:[#allocation35_spill] sm:$0xff] %v7913_v41 }
 0x17a   : > { %v4658_v26 = vsel %vm2867_vm6, %v11101_v45, %v4657_v59  ;;  %v10843_v10 = vrot.slane %v7893_v38, 1  ;;  %v2897_v24 = vrot.slane %v2756_v48, 2  ;;  %v4457_v6 = vadd.f32 %v4281_v49, %v4078_v36 }
 0x17b   : > { %11102 = vst [vmem:[#allocation51_spill] sm:$0xff] %v7905_v29  ;;  %v4456_v43 = vadd.f32 %v4279_v9, %v4077_v19  ;;  %v3135_v16 = vmul.f32 %v11041_v15, %v11073_v50  ;;  %v3136_v45 = vmul.f32 %v11041_v15, %v11103_v3  ;;  %v11105_v21 = vrot.slane %v7631_v2, 1 }
 0x17c   : > { %v2520_v19 = vsel %vm2487_vm5, %v2517_v0, %v10843_v10  ;;  %v11106_v49 = vrot.slane %v7648_v40, 2  ;;  %v4836_v48 = vadd.f32 %v4660_v56, %v4457_v6  ;;  %v11107_v32 = vrot.slane %v7905_v29, 2 }
 0x17d   : > { %v4835_v59 = vadd.f32 %v4658_v26, %v4456_v43  ;;  %v2518_v9 = vsel %vm2487_vm5, %v11105_v21, %v2517_v0  ;;  %v2690_v54 = vadd.f32 %v2520_v19, %v2248_v20  ;;  %v3264_v2 = vmul.f32 %v6940_v31, %v11103_v3 }
 0x17e   : > { %v2898_v61 = vsel %vm2867_vm6, %v11106_v49, %v2897_v24  ;;  %v2689_v36 = vadd.f32 %v2518_v9, %v2247_v57  ;;  %v2900_v41 = vsel %vm2867_vm6, %v2897_v24, %v11107_v32  ;;  %v7932_v21 = vmul.f32 %v6940_v31, %v11076_v23  ;;  %v7941_v24 = vpop.f32.mrf.mxu0 }
 0x17f   : > { %v4904_v26 = vadd.f32 %v7317_v44, %v4835_v59  ;;  %v3643_v40 = vmul.f32 %v6944_v33, %v11103_v3  ;;  %v4905_v6 = vadd.f32 %v7317_v44, %v4836_v48  ;;  %v3070_v57 = vadd.f32 %v2900_v41, %v2690_v54 }
 0x180   : > { %v3069_v0 = vadd.f32 %v2898_v61, %v2689_v36  ;;  %v7939_v20 = vmul.f32 %v6944_v33, %v11076_v23  ;;  %v3404_v56 = vrot.slane %v3264_v2, 1  ;;  %v10848_v43 = vrot.slane %v7932_v21, 1 }
 0x181   : > { %v4966_v32 = vmax.f32 %v4904_v26, 0.0  ;;  %v3783_v59 = vrot.slane %v3643_v40, 2  ;;  %v4967_v9 = vmax.f32 %v4905_v6, 0.0  ;;  %v3198_v49 = vadd.f32 %v3136_v45, %v3070_v57  ;;  %v7957_v45 = vpop.f32.mrf.mxu0  ;;  %v11110_v6 = vld [vmem:[#allocation38_spill] sm:$0xff] }
 0x182   : > { %v3197_v19 = vadd.f32 %v3135_v16, %v3069_v0  ;;  %v10847_v10 = vrot.slane %v7939_v20, 2  ;;  %v11108_v61 = vrot.slane %v7680_v11, 1  ;;  %v3407_v54 = vsel %vm2487_vm5, %v3404_v56, %v10848_v43 }
 0x183   : > { %v5028_v29 = vmin.f32 %v4966_v32, 6.0  ;;  %v11109_v48 = vrot.slane %v7697_v62, 2  ;;  %v5029_v26 = vmin.f32 %v4967_v9, 6.0  ;;  %v3577_v40 = vadd.f32 %v3407_v54, %v3198_v49 }
 0x184   : > { %v3405_v41 = vsel %vm2487_vm5, %v11108_v61, %v3404_v56  ;;  %v3786_v16 = vsel %vm2867_vm6, %v3783_v59, %v10847_v10  ;;  %v4021_v11 = vmul.f32 %v6946_v34, %v11078_v39  ;;  %v4022_v0 = vmul.f32 %v6946_v34, %v11110_v6  ;;  %v11127_v10 = vld [vmem:[#allocation3_spill] sm:$0xff] }
 0x185   : > { %v3784_v36 = vsel %vm2867_vm6, %v11109_v48, %v3783_v59  ;;  %v3576_v2 = vadd.f32 %v3405_v41, %v3197_v19  ;;  %v4150_v62 = vmul.f32 %v6948_v35, %v11110_v6  ;;  %v7967_v57 = vmul.f32 %v6948_v35, %v7321_v30 }
 0x186   : > { %v5086_v32 = vpack.c.bf16 %v5029_v26, %v5028_v29  ;;  %v3956_v9 = vadd.f32 %v3786_v16, %v3577_v40  ;;  %v4529_v59 = vmul.f32 %v7259_v52, %v11110_v6  ;;  %v7974_v61 = vmul.f32 %v7259_v52, %v7321_v30  ;;  %v7981_v26 = vpop.f32.mrf.mxu0 }
 0x187   : > { %v3955_v56 = vadd.f32 %v3784_v36, %v3576_v2  ;;  %v4290_v19 = vrot.slane %v4150_v62, 1  ;;  %v10845_v49 = vrot.slane %v7967_v57, 1  ;;  %v878_v41 = vadd.f32 %v7745_v42, %v7644_v7 }
 0x188   : > { %6204 = vmatmul.mubr.msk.bf16.gmra.mxu0 %vm5136_vm7, %v5086_v32  ;;  %v4084_v48 = vadd.f32 %v4022_v0, %v3956_v9  ;;  %v4669_v29 = vrot.slane %v4529_v59, 2  ;;  %v889_v36 = vadd.f32 %v7745_v42, %v7671_v60  ;;  %v11111_v2 = vrot.slane %v7720_v18, 1  ;;  %v11113_v9 = vld [vmem:[#allocation4_spill] sm:$0xff] }
 0x189   : > { %v4083_v54 = vadd.f32 %v4021_v11, %v3955_v56  ;;  %v4293_v52 = vsel %vm2487_vm5, %v4290_v19, %v10845_v49  ;;  %v10846_v7 = vrot.slane %v7974_v61, 2  ;;  %v1043_v16 = vmax.f32 %v878_v41, 0.0  ;;  %6207 = vmatprep.mubr.msk.bf16.mxu0 %vm6656_vm4, %v11030_v4 }
 0x18a   : > { %v4291_v40 = vsel %vm2487_vm5, %v11111_v2, %v4290_v19  ;;  %v4463_v0 = vadd.f32 %v4293_v52, %v4084_v48  ;;  %v11112_v60 = vrot.slane %v7739_v8, 2  ;;  %v1046_v32 = vmax.f32 %v889_v36, 0.0  ;;  %v11114_v19 = vld [vmem:[#allocation29_spill] sm:$0xff]  ;;  %v8004_v48 = vpop.f32.mrf.mxu0 }
 0x18b   : > { %v4462_v11 = vadd.f32 %v4291_v40, %v4083_v54  ;;  %v4672_v18 = vsel %vm2867_vm6, %v4669_v29, %v10846_v7  ;;  %v1114_v56 = vmin.f32 %v1043_v16, 6.0  ;;  %v881_v59 = vadd.f32 %v7745_v42, %v11113_v9  ;;  %v11117_v16 = vld [vmem:[#allocation33_spill] sm:$0xff] }
 0x18c   : > { %v4670_v62 = vsel %vm2867_vm6, %v11112_v60, %v4669_v29  ;;  %v902_v41 = vadd.f32 %v7745_v42, %v11114_v19  ;;  %v4842_v49 = vadd.f32 %v4672_v18, %v4463_v0  ;;  %v1117_v54 = vmin.f32 %v1046_v32, 6.0  ;;  %v11118_v0 = vld [vmem:[#allocation7_spill] sm:$0xff] }
 0x18d   : > { %v4841_v2 = vadd.f32 %v4670_v62, %v4462_v11  ;;  %v2243_v8 = vmul.f32 %v11066_v17, %v7197_v28  ;;  %v11115_v36 = vunpack.i.h.bf16 %v11084_v55  ;;  %v1044_v29 = vmax.f32 %v881_v59, 0.0 }
 0x18e   : > { %v1049_v52 = vmax.f32 %v902_v41, 0.0  ;;  %v2244_v60 = vmul.f32 %v11066_v17, %v11117_v16  ;;  %v4911_v11 = vadd.f32 %v7317_v44, %v4842_v49  ;;  %v11119_v62 = vunpack.i.l.bf16 %v11118_v0  ;;  %v8026_v49 = vpop.f32.mrf.mxu0 }
 0x18f   : > { %v8008_v40 = vmul.f32 %v11115_v36, %v1114_v56  ;;  %v4910_v9 = vadd.f32 %v7317_v44, %v4841_v2  ;;  %v2372_v28 = vmul.f32 %v11045_v37, %v11117_v16  ;;  %v1115_v18 = vmin.f32 %v1044_v29, 6.0  ;;  %v11123_v29 = vld [vmem:[#allocation8_spill] sm:$0xff] }
 0x190   : > { %v8016_v32 = vmul.f32 %v11119_v62, %v1117_v54  ;;  %v1120_v55 = vmin.f32 %v1049_v52, 6.0  ;;  %v2752_v56 = vmul.f32 %v11053_v22, %v11117_v16  ;;  %v3131_v59 = vmul.f32 %v11041_v15, %v7210_v13 }
 0x191   : > { %11116 = vst [vmem:[#allocation38_spill] sm:$0xff] %v8008_v40  ;;  %v4972_v19 = vmax.f32 %v4910_v9, 0.0  ;;  %v4973_v41 = vmax.f32 %v4911_v11, 0.0  ;;  %v2509_v2 = vrot.slane %v2372_v28, 1  ;;  %v3132_v44 = vmul.f32 %v11041_v15, %v7220_v12 }
 0x192   : > { %11120 = vst [vmem:[#allocation4_spill] sm:$0xff] %v8016_v32  ;;  %v11121_v54 = vunpack.i.l.bf16 %v11089_v63  ;;  %v11124_v52 = vunpack.i.h.bf16 %v11123_v29  ;;  %v2889_v16 = vrot.slane %v2752_v56, 2  ;;  %v3260_v13 = vmul.f32 %v6940_v31, %v7220_v12  ;;  %v11130_v56 = vld [vmem:[#allocation19_spill] sm:$0xff] }
 0x193   : > { %v5034_v9 = vmin.f32 %v4972_v19, 6.0  ;;  %v5035_v11 = vmin.f32 %v4973_v41, 6.0  ;;  %v11126_v28 = vrot.slane %v7786_v14, 1  ;;  %v11128_v43 = vrot.slane %v11127_v10, 1 }
 0x194   : > { %v8030_v36 = vmul.f32 %v11121_v54, %v1115_v18  ;;  %v8034_v62 = vmul.f32 %v11124_v52, %v1120_v55  ;;  %v11129_v32 = vrot.slane %v7810_v1, 2  ;;  %v11131_v52 = vrot.slane %v11130_v56, 2  ;;  %v11136_v56 = vld [vmem:[#allocation30_spill] sm:$0xff] }
 0x195   : > { %v2510_v7 = vsel %vm2487_vm5, %v11126_v28, %v2509_v2  ;;  %v2512_v63 = vsel %vm2487_vm5, %v2509_v2, %v11128_v43  ;;  %v5089_v19 = vpack.c.bf16 %v5035_v11, %v5034_v9  ;;  %v3396_v41 = vrot.slane %v3260_v13, 1  ;;  %v8054_v28 = vpop.f32.mrf.mxu0 }
 0x196   : > { %11122 = vst [vmem:[#allocation29_spill] sm:$0xff] %v8030_v36  ;;  %11125 = vst [vmem:[#allocation33_spill] sm:$0xff] %v8034_v62  ;;  %v2685_v18 = vadd.f32 %v2510_v7, %v2243_v8  ;;  %v2686_v54 = vadd.f32 %v2512_v63, %v2244_v60  ;;  %v2890_v55 = vsel %vm2867_vm6, %v11129_v32, %v2889_v16  ;;  %v11132_v60 = vrot.slane %v7827_v46, 1 }
 0x197   : > { %v2892_v62 = vsel %vm2867_vm6, %v2889_v16, %v11131_v52  ;;  %v3639_v14 = vmul.f32 %v6944_v33, %v7220_v12  ;;  %v4017_v10 = vmul.f32 %v6946_v34, %v11073_v50  ;;  %v4018_v1 = vmul.f32 %v6946_v34, %v11103_v3  ;;  %6216 = vmatmul.mubr.msk.bf16.gmra.mxu1 %vm5136_vm7, %v5089_v19  ;;  %v11133_v12 = vld [vmem:[#allocation31_spill] sm:$0xff] }
 0x198   : > { %v3065_v43 = vadd.f32 %v2890_v55, %v2685_v18  ;;  %v3066_v7 = vadd.f32 %v2892_v62, %v2686_v54  ;;  %v4146_v8 = vmul.f32 %v6948_v35, %v11103_v3  ;;  %v3397_v32 = vsel %vm2487_vm5, %v11132_v60, %v3396_v41  ;;  %v8070_v62 = vld [vmem:[%s10734_s3 + $0x8] ss:$0 sm:$0xff]  ;;  %6219 = vmatprep.mubr.msk.bf16.mxu1 %vm6656_vm4, %v11030_v4  ;;  %v8086_v60 = vpop.f32.mrf.mxu0 }
 0x199   : > { %v11134_v2 = vrot.slane %v11133_v12, 1  ;;  %v3775_v13 = vrot.slane %v3639_v14, 2  ;;  %v4525_v9 = vmul.f32 %v8070_v62, %v11103_v3  ;;  %v2249_v18 = vmul.f32 %v11066_v17, %v7236_v25 }
 0x19a   : > { %v3193_v11 = vadd.f32 %v3131_v59, %v3065_v43  ;;  %v3194_v46 = vadd.f32 %v3132_v44, %v3066_v7  ;;  %v4282_v63 = vrot.slane %v4146_v8, 1  ;;  %v11135_v54 = vrot.slane %v7838_v5, 2 }
 0x19b   : > { %v3399_v16 = vsel %vm2487_vm5, %v3396_v41, %v11134_v2  ;;  %v11137_v52 = vrot.slane %v11136_v56, 2  ;;  %v4661_v41 = vrot.slane %v4525_v9, 2  ;;  %v2250_v14 = vmul.f32 %v11066_v17, %v7243_v47  ;;  %v8117_v56 = vpop.f32.mrf.mxu0 }
 0x19c   : > { %v3776_v55 = vsel %vm2867_vm6, %v11135_v54, %v3775_v13  ;;  %v3572_v59 = vadd.f32 %v3397_v32, %v3193_v11  ;;  %v3573_v44 = vadd.f32 %v3399_v16, %v3194_v46  ;;  %v11138_v43 = vrot.slane %v7859_v53, 1 }
 0x19d   : > { %v3778_v19 = vsel %vm2867_vm6, %v3775_v13, %v11137_v52  ;;  %v11139_v5 = vrot.slane %v7710_v58, 1  ;;  %v11140_v8 = vrot.slane %v7874_v51, 2  ;;  %v11141_v2 = vrot.slane %v7724_v27, 2 }
 0x19e   : > { %v4283_v25 = vsel %vm2487_vm5, %v11138_v43, %v4282_v63  ;;  %v2378_v32 = vmul.f32 %v11045_v37, %v7243_v47  ;;  %v8104_v53 = vmul.f32 %v11045_v37, %v11073_v50  ;;  %v3951_v16 = vadd.f32 %v3776_v55, %v3572_v59 }
 0x19f   : > { %v4285_v7 = vsel %vm2487_vm5, %v4282_v63, %v11139_v5  ;;  %v4662_v12 = vsel %vm2867_vm6, %v11140_v8, %v4661_v41  ;;  %v4664_v13 = vsel %vm2867_vm6, %v4661_v41, %v11141_v2  ;;  %v3952_v9 = vadd.f32 %v3778_v19, %v3573_v44  ;;  %v11142_v63 = vld [vmem:[#allocation39_spill] sm:$0xff] }
 0x1a0   : > { %v2758_v58 = vmul.f32 %v11053_v22, %v7243_v47  ;;  %v8110_v51 = vmul.f32 %v11053_v22, %v11073_v50  ;;  %v2521_v11 = vrot.slane %v2378_v32, 1  ;;  %v10851_v27 = vrot.slane %v8104_v53, 1  ;;  %v11144_v32 = vld [vmem:[#allocation51_spill] sm:$0xff] }
 0x1a1   : > { %v3137_v46 = vmul.f32 %v11041_v15, %v11076_v23  ;;  %v3138_v54 = vmul.f32 %v11041_v15, %v11142_v63  ;;  %v4079_v55 = vadd.f32 %v4017_v10, %v3951_v16  ;;  %v4080_v52 = vadd.f32 %v4018_v1, %v3952_v9 }
 0x1a2   : > { %v2901_v19 = vrot.slane %v2758_v58, 2  ;;  %v2903_v47 = vrot.slane %v8110_v51, 2  ;;  %v11143_v41 = vrot.slane %v7893_v38, 1  ;;  %v2524_v44 = vsel %vm2487_vm5, %v2521_v11, %v10851_v27 }
 0x1a3   : > { %v3266_v43 = vmul.f32 %v6940_v31, %v11142_v63  ;;  %v8130_v5 = vmul.f32 %v6940_v31, %v11078_v39  ;;  %v4458_v10 = vadd.f32 %v4283_v25, %v4079_v55  ;;  %v4459_v1 = vadd.f32 %v4285_v7, %v4080_v52 }
 0x1a4   : > { %v2522_v59 = vsel %vm2487_vm5, %v11143_v41, %v2521_v11  ;;  %v2692_v2 = vadd.f32 %v2524_v44, %v2250_v14  ;;  %v11145_v16 = vrot.slane %v11144_v32, 2  ;;  %v2904_v9 = vsel %vm2867_vm6, %v2901_v19, %v2903_v47  ;;  %v8139_v41 = vpop.f32.mrf.mxu0 }
 0x1a5   : > { %v2691_v8 = vadd.f32 %v2522_v59, %v2249_v18  ;;  %v3408_v58 = vrot.slane %v3266_v43, 1  ;;  %v10857_v11 = vrot.slane %v8130_v5, 1  ;;  %v4837_v27 = vadd.f32 %v4662_v12, %v4458_v10  ;;  %v8156_v12 = vld [vmem:[%s10735_s4] ss:$0 sm:$0xff] }
 0x1a6   : > { %v2902_v38 = vsel %vm2867_vm6, %v11145_v16, %v2901_v19  ;;  %v4838_v36 = vadd.f32 %v4664_v13, %v4459_v1  ;;  %v3072_v25 = vadd.f32 %v2904_v9, %v2692_v2  ;;  %v11146_v18 = vrot.slane %v7932_v21, 1  ;;  %v11147_v1 = vld [vmem:[#allocation42_spill] sm:$0xff]  ;;  %v8165_v2 = vpop.f32.mrf.mxu0 }
 0x1a7   : > { %v3071_v40 = vadd.f32 %v2902_v38, %v2691_v8  ;;  %v3411_v7 = vsel %vm2487_vm5, %v3408_v58, %v10857_v11  ;;  %v3645_v55 = vmul.f32 %v6944_v33, %v11142_v63  ;;  %v8151_v52 = vmul.f32 %v6944_v33, %v11078_v39  ;;  %11148 = vst [vmem:[#allocation7_spill] sm:$0xff] %v8165_v2 }
 0x1a8   : > { %v3409_v14 = vsel %vm2487_vm5, %v11146_v18, %v3408_v58  ;;  %v4906_v21 = vadd.f32 %v8156_v12, %v4837_v27  ;;  %v4907_v13 = vadd.f32 %v8156_v12, %v4838_v36  ;;  %v3200_v59 = vadd.f32 %v3138_v54, %v3072_v25  ;;  %v11150_v54 = vld [vmem:[#allocation40_spill] sm:$0xff] }
 0x1a9   : > { %v3199_v19 = vadd.f32 %v3137_v46, %v3071_v40  ;;  %v3787_v44 = vrot.slane %v3645_v55, 2  ;;  %v10854_v43 = vrot.slane %v8151_v52, 2  ;;  %v4023_v10 = vmul.f32 %v6946_v34, %v7321_v30 }
 0x1aa   : > { %v4024_v8 = vmul.f32 %v6946_v34, %v11147_v1  ;;  %v4968_v32 = vmax.f32 %v4906_v21, 0.0  ;;  %v4969_v16 = vmax.f32 %v4907_v13, 0.0  ;;  %v3579_v9 = vadd.f32 %v3411_v7, %v3200_v59 }
 0x1ab   : > { %v3578_v38 = vadd.f32 %v3409_v14, %v3199_v19  ;;  %v11149_v27 = vrot.slane %v7939_v20, 2  ;;  %v3790_v36 = vsel %vm2867_vm6, %v3787_v44, %v10854_v43  ;;  %v4152_v46 = vmul.f32 %v6948_v35, %v11147_v1  ;;  %v8186_v19 = vpop.f32.mrf.mxu0  ;;  %v11152_v43 = vld [vmem:[#allocation16_spill] sm:$0xff] }
 0x1ac   : > { %v8177_v58 = vmul.f32 %v6948_v35, %v11150_v54  ;;  %v5030_v25 = vmin.f32 %v4968_v32, 6.0  ;;  %v5031_v18 = vmin.f32 %v4969_v16, 6.0  ;;  %v3958_v14 = vadd.f32 %v3790_v36, %v3579_v9  ;;  %11151 = vst [vmem:[#allocation8_spill] sm:$0xff] %v8186_v19 }
 0x1ad   : > { %v3788_v40 = vsel %vm2867_vm6, %v11149_v27, %v3787_v44  ;;  %v4294_v7 = vrot.slane %v4152_v46, 1  ;;  %v4531_v21 = vmul.f32 %v8070_v62, %v11147_v1  ;;  %v8184_v13 = vmul.f32 %v8070_v62, %v11150_v54 }
 0x1ae   : > { %v3957_v55 = vadd.f32 %v3788_v40, %v3578_v38  ;;  %v10856_v20 = vrot.slane %v8177_v58, 1  ;;  %v5087_v59 = vpack.c.bf16 %v5031_v18, %v5030_v25  ;;  %v4086_v27 = vadd.f32 %v4024_v8, %v3958_v14  ;;  %v11154_v8 = vld [vmem:[#allocation34_spill] sm:$0xff]  ;;  %v11156_v14 = vld [vmem:[#allocation47_spill] sm:$0xff] }
 0x1af   : > { %v894_v32 = vadd.f32 %v7745_v42, %v11152_v43  ;;  %v11153_v16 = vrot.slane %v7967_v57, 1  ;;  %v4673_v40 = vrot.slane %v4531_v21, 2  ;;  %v10855_v36 = vrot.slane %v8184_v13, 2  ;;  %v11157_v21 = vld [vmem:[#allocation48_spill] sm:$0xff] }
 0x1b0   : > { %v4085_v44 = vadd.f32 %v4023_v10, %v3957_v55  ;;  %v4297_v9 = vsel %vm2487_vm5, %v4294_v7, %v10856_v20  ;;  %6208 = vmatmul.mubr.msk.bf16.gmra.mxu0 %vm5136_vm7, %v5087_v59  ;;  %v905_v18 = vadd.f32 %v7745_v42, %v11154_v8  ;;  %v11155_v43 = vrot.slane %v7974_v61, 2 }
 0x1b1   : > { %v4295_v38 = vsel %vm2487_vm5, %v11153_v16, %v4294_v7  ;;  %v4465_v25 = vadd.f32 %v4297_v9, %v4086_v27  ;;  %v1047_v10 = vmax.f32 %v894_v32, 0.0  ;;  %v4676_v55 = vsel %vm2867_vm6, %v4673_v40, %v10855_v36 }
 0x1b2   : > { %v4464_v46 = vadd.f32 %v4295_v38, %v4085_v44  ;;  %v4674_v57 = vsel %vm2867_vm6, %v11155_v43, %v4673_v40  ;;  %v897_v7 = vadd.f32 %v7745_v42, %v11156_v14  ;;  %v918_v59 = vadd.f32 %v7745_v42, %v11157_v21  ;;  %v8210_v44 = vpop.f32.mrf.mxu0 }
 0x1b3   : > { %11158 = vst [vmem:[#allocation3_spill] sm:$0xff] %v8210_v44  ;;  %v4844_v32 = vadd.f32 %v4676_v55, %v4465_v25  ;;  %v1118_v16 = vmin.f32 %v1047_v10, 6.0  ;;  %v1050_v38 = vmax.f32 %v905_v18, 0.0  ;;  %v2251_v8 = vmul.f32 %v11066_v17, %v11073_v50 }
 0x1b4   : > { %v4843_v27 = vadd.f32 %v4674_v57, %v4464_v46  ;;  %v1048_v9 = vmax.f32 %v897_v7, 0.0  ;;  %v1053_v61 = vmax.f32 %v918_v59, 0.0  ;;  %v2252_v40 = vmul.f32 %v11066_v17, %v11103_v3  ;;  %v8228_v57 = vpop.f32.mrf.mxu0  ;;  %v11162_v59 = vld [vmem:[#allocation9_spill] sm:$0xff] }
 0x1b5   : > { %v4913_v14 = vadd.f32 %v8156_v12, %v4844_v32  ;;  %v11159_v21 = vunpack.i.h.bf16 %v11118_v0  ;;  %v1121_v46 = vmin.f32 %v1050_v38, 6.0  ;;  %v2380_v18 = vmul.f32 %v11045_v37, %v11103_v3  ;;  %11161 = vst [vmem:[#allocation31_spill] sm:$0xff] %v8228_v57 }
 0x1b6   : > { %v4912_v43 = vadd.f32 %v8156_v12, %v4843_v27  ;;  %v1119_v25 = vmin.f32 %v1048_v9, 6.0  ;;  %v1124_v10 = vmin.f32 %v1053_v61, 6.0  ;;  %v8226_v50 = vmul.f32 %v11045_v37, %v11076_v23  ;;  %v11167_v9 = vld [vmem:[#allocation10_spill] sm:$0xff] }
 0x1b7   : > { %v8220_v36 = vmul.f32 %v11159_v21, %v1118_v16  ;;  %v4975_v7 = vmax.f32 %v4913_v14, 0.0  ;;  %v11163_v27 = vunpack.i.l.bf16 %v11162_v59  ;;  %v2760_v0 = vmul.f32 %v11053_v22, %v11103_v3 }
 0x1b8   : > { %v4974_v55 = vmax.f32 %v4912_v43, 0.0  ;;  %v11165_v16 = vunpack.i.l.bf16 %v11123_v29  ;;  %v11168_v61 = vunpack.i.h.bf16 %v11167_v9  ;;  %v2525_v20 = vrot.slane %v2380_v18, 1 }
 0x1b9   : > { %11160 = vst [vmem:[#allocation19_spill] sm:$0xff] %v8220_v36  ;;  %v8232_v32 = vmul.f32 %v11163_v27, %v1121_v46  ;;  %v10858_v11 = vrot.slane %v8226_v50, 1  ;;  %v5037_v14 = vmin.f32 %v4975_v7, 6.0  ;;  %v8247_v46 = vmul.f32 %v11053_v22, %v11076_v23 }
 0x1ba   : > { %v8238_v38 = vmul.f32 %v11165_v16, %v1119_v25  ;;  %v8242_v21 = vmul.f32 %v11168_v61, %v1124_v10  ;;  %v5036_v43 = vmin.f32 %v4974_v55, 6.0  ;;  %v2905_v27 = vrot.slane %v2760_v0, 2  ;;  %v8259_v55 = vpop.f32.mrf.mxu0 }
 0x1bb   : > { %11164 = vst [vmem:[#allocation30_spill] sm:$0xff] %v8232_v32  ;;  %v11170_v3 = vrot.slane %v8104_v53, 1  ;;  %v2528_v25 = vsel %vm2487_vm5, %v2525_v20, %v10858_v11  ;;  %v3139_v10 = vmul.f32 %v11041_v15, %v11078_v39  ;;  %v3140_v18 = vmul.f32 %v11041_v15, %v11110_v6  ;;  %11171 = vst [vmem:[#allocation42_spill] sm:$0xff] %v8259_v55 }
 0x1bc   : > { %11166 = vst [vmem:[#allocation39_spill] sm:$0xff] %v8238_v38  ;;  %11169 = vst [vmem:[#allocation51_spill] sm:$0xff] %v8242_v21  ;;  %v5090_v7 = vpack.c.bf16 %v5037_v14, %v5036_v43  ;;  %v2694_v61 = vadd.f32 %v2528_v25, %v2252_v40  ;;  %v2906_v53 = vsel %vm2867_vm6, %v2903_v47, %v2905_v27  ;;  %v10863_v0 = vrot.slane %v8247_v46, 2  ;;  %v11172_v40 = vld [vmem:[#allocation41_spill] sm:$0xff] }
 0x1bd   : > { %v2526_v29 = vsel %vm2487_vm5, %v11170_v3, %v2525_v20  ;;  %v3268_v20 = vmul.f32 %v6940_v31, %v11110_v6  ;;  %v8269_v3 = vmul.f32 %v6940_v31, %v7321_v30  ;;  %v3647_v11 = vmul.f32 %v6944_v33, %v11110_v6 }
 0x1be   : > { %v2693_v16 = vadd.f32 %v2526_v29, %v2251_v8  ;;  %6220 = vmatmul.mubr.msk.bf16.gmra.mxu1 %vm5136_vm7, %v5090_v7  ;;  %v8276_v51 = vmul.f32 %v6944_v33, %v7321_v30  ;;  %v4025_v47 = vmul.f32 %v6946_v34, %v11150_v54  ;;  %v4026_v43 = vmul.f32 %v6946_v34, %v11172_v40 }
 0x1bf   : > { %6223 = vmatprep.mubr.msk.bf16.mxu1 %vm6656_vm4, %v11030_v4  ;;  %v2908_v14 = vsel %vm2867_vm6, %v2905_v27, %v10863_v0  ;;  %v3412_v29 = vrot.slane %v3268_v20, 1  ;;  %v10864_v25 = vrot.slane %v8269_v3, 1  ;;  %v3791_v7 = vrot.slane %v3647_v11, 2  ;;  %v11176_v0 = vld [vmem:[#allocation44_spill] sm:$0xff] }
 0x1c0   : > { %v3073_v8 = vadd.f32 %v2906_v53, %v2693_v16  ;;  %v8288_v16 = vpop.f32.mrf.mxu0  ;;  %v3074_v53 = vadd.f32 %v2908_v14, %v2694_v61  ;;  %v10865_v32 = vrot.slane %v8276_v51, 2  ;;  %v4154_v38 = vmul.f32 %v6948_v35, %v11172_v40 }
 0x1c1   : > { %11173 = vst [vmem:[#allocation40_spill] sm:$0xff] %v8288_v16  ;;  %v11174_v36 = vrot.slane %v8130_v5, 1  ;;  %v3415_v27 = vsel %vm2487_vm5, %v3412_v29, %v10864_v25  ;;  %v11175_v20 = vrot.slane %v8151_v52, 2  ;;  %v8314_v52 = vmul.f32 %v8070_v62, %v11176_v0 }
 0x1c2   : > { %v3201_v21 = vadd.f32 %v3139_v10, %v3073_v8  ;;  %v8304_v10 = vmul.f32 %v6948_v35, %v11176_v0  ;;  %v3202_v61 = vadd.f32 %v3140_v18, %v3074_v53  ;;  %v3794_v5 = vsel %vm2867_vm6, %v3791_v7, %v10865_v32  ;;  %v8318_v16 = vpop.f32.mrf.mxu0 }
 0x1c3   : > { %v3413_v55 = vsel %vm2487_vm5, %v11174_v36, %v3412_v29  ;;  %v3792_v11 = vsel %vm2867_vm6, %v11175_v20, %v3791_v7  ;;  %v4298_v14 = vrot.slane %v4154_v38, 1  ;;  %v4533_v29 = vmul.f32 %v8070_v62, %v11172_v40  ;;  %v11177_v20 = vld [vmem:[#allocation49_spill] sm:$0xff]  ;;  %11178 = vst [vmem:[#allocation16_spill] sm:$0xff] %v8318_v16  ;;  %v11180_v7 = vld [vmem:[#allocation50_spill] sm:$0xff] }
 0x1c4   : > { %v3580_v8 = vadd.f32 %v3413_v55, %v3201_v21  ;;  %v10869_v36 = vrot.slane %v8304_v10, 1  ;;  %v910_v25 = vadd.f32 %v7745_v42, %v11177_v20  ;;  %v3581_v21 = vadd.f32 %v3415_v27, %v3202_v61  ;;  %v11181_v27 = vld [vmem:[#allocation35_spill] sm:$0xff] }
 0x1c5   : > { %v11179_v55 = vrot.slane %v8177_v58, 1  ;;  %v921_v53 = vadd.f32 %v7745_v42, %v11180_v7  ;;  %v4677_v57 = vrot.slane %v4533_v29, 2  ;;  %v10866_v44 = vrot.slane %v8314_v52, 2  ;;  %v8339_v29 = vpop.f32.mrf.mxu0 }
 0x1c6   : > { %v3959_v18 = vadd.f32 %v3792_v11, %v3580_v8  ;;  %v4301_v32 = vsel %vm2487_vm5, %v4298_v14, %v10869_v36  ;;  %v1051_v19 = vmax.f32 %v910_v25, 0.0  ;;  %v3960_v20 = vadd.f32 %v3794_v5, %v3581_v21 }
 0x1c7   : > { %v4299_v38 = vsel %vm2487_vm5, %v11179_v55, %v4298_v14  ;;  %v1054_v16 = vmax.f32 %v921_v53, 0.0  ;;  %v913_v11 = vadd.f32 %v7745_v42, %v11181_v27  ;;  %v11182_v58 = vrot.slane %v8184_v13, 2 }
 0x1c8   : > { %v4087_v2 = vadd.f32 %v4025_v47, %v3959_v18  ;;  %v4680_v8 = vsel %vm2867_vm6, %v4677_v57, %v10866_v44  ;;  %v1122_v55 = vmin.f32 %v1051_v19, 6.0  ;;  %v934_v14 = vadd.f32 %v7745_v42, %v7941_v24  ;;  %v11185_v24 = vld [vmem:[#allocation11_spill] sm:$0xff] }
 0x1c9   : > { %v4678_v61 = vsel %vm2867_vm6, %v11182_v58, %v4677_v57  ;;  %v4088_v25 = vadd.f32 %v4026_v43, %v3960_v20  ;;  %v1125_v5 = vmin.f32 %v1054_v16, 6.0  ;;  %v1052_v21 = vmax.f32 %v913_v11, 0.0 }
 0x1ca   : > { %v4466_v47 = vadd.f32 %v4299_v38, %v4087_v2  ;;  %v11183_v18 = vunpack.i.h.bf16 %v11162_v59  ;;  %v1057_v13 = vmax.f32 %v934_v14, 0.0  ;;  %v2253_v53 = vmul.f32 %v11066_v17, %v11076_v23  ;;  %v8361_v38 = vpop.f32.mrf.mxu0  ;;  %v11190_v14 = vld [vmem:[#allocation12_spill] sm:$0xff] }
 0x1cb   : > { %v2254_v19 = vmul.f32 %v11066_v17, %v11142_v63  ;;  %v4467_v57 = vadd.f32 %v4301_v32, %v4088_v25  ;;  %v11186_v58 = vunpack.i.l.bf16 %v11185_v24  ;;  %v1123_v2 = vmin.f32 %v1052_v21, 6.0 }
 0x1cc   : > { %v8343_v7 = vmul.f32 %v11183_v18, %v1122_v55  ;;  %v4845_v27 = vadd.f32 %v4678_v61, %v4466_v47  ;;  %v1128_v43 = vmin.f32 %v1057_v13, 6.0  ;;  %v2382_v59 = vmul.f32 %v11045_v37, %v11142_v63  ;;  %v6182_v18 = vpop.f32.mrf.mxu0 }
 0x1cd   : > { %v8351_v44 = vmul.f32 %v11186_v58, %v1125_v5  ;;  %v8357_v16 = vmul.f32 %v11045_v37, %v11078_v39  ;;  %v2762_v23 = vmul.f32 %v11053_v22, %v11142_v63  ;;  %v4846_v32 = vadd.f32 %v4680_v8, %v4467_v57 }
 0x1ce   : > { %11184 = vst [vmem:[#allocation34_spill] sm:$0xff] %v8343_v7  ;;  %v4914_v20 = vadd.f32 %v8156_v12, %v4845_v27  ;;  %v11188_v11 = vunpack.i.l.bf16 %v11167_v9  ;;  %v8370_v55 = vmul.f32 %v11053_v22, %v11078_v39  ;;  %v11191_v25 = vunpack.i.h.bf16 %v11190_v14 }
 0x1cf   : > { %11187 = vst [vmem:[#allocation47_spill] sm:$0xff] %v8351_v44  ;;  %v2529_v5 = vrot.slane %v2382_v59, 1  ;;  %v10868_v63 = vrot.slane %v8357_v16, 1  ;;  %v2909_v21 = vrot.slane %v2762_v23, 2  ;;  %v4915_v8 = vadd.f32 %v8156_v12, %v4846_v32 }
 0x1d0   : > { %v8366_v61 = vmul.f32 %v11188_v11, %v1123_v2  ;;  %v8374_v47 = vmul.f32 %v11191_v25, %v1128_v43  ;;  %v4976_v13 = vmax.f32 %v4914_v20, 0.0  ;;  %v10867_v9 = vrot.slane %v8370_v55, 2 }
 0x1d1   : > { %v3141_v57 = vmul.f32 %v11041_v15, %v7321_v30  ;;  %v11193_v27 = vrot.slane %v8226_v50, 1  ;;  %v2532_v2 = vsel %vm2487_vm5, %v2529_v5, %v10868_v63  ;;  %v11194_v43 = vrot.slane %v8247_v46, 2 }
 0x1d2   : > { %11189 = vst [vmem:[#allocation48_spill] sm:$0xff] %v8366_v61  ;;  %11192 = vst [vmem:[#allocation9_spill] sm:$0xff] %v8374_v47  ;;  %v3142_v23 = vmul.f32 %v11041_v15, %v11147_v1  ;;  %v4977_v32 = vmax.f32 %v4915_v8, 0.0  ;;  %v5038_v20 = vmin.f32 %v4976_v13, 6.0  ;;  %v2696_v25 = vadd.f32 %v2532_v2, %v2254_v19 }
 0x1d3   : > { %v2530_v58 = vsel %vm2487_vm5, %v11193_v27, %v2529_v5  ;;  %v2910_v59 = vsel %vm2867_vm6, %v11194_v43, %v2909_v21  ;;  %v2912_v50 = vsel %vm2867_vm6, %v2909_v21, %v10867_v9  ;;  %v3270_v18 = vmul.f32 %v6940_v31, %v11147_v1 }
 0x1d4   : > { %v2695_v11 = vadd.f32 %v2530_v58, %v2253_v53  ;;  %v8399_v5 = vmul.f32 %v6940_v31, %v11150_v54  ;;  %v3649_v46 = vmul.f32 %v6944_v33, %v11147_v1  ;;  %v5039_v27 = vmin.f32 %v4977_v32, 6.0 }
 0x1d5   : > { %v3076_v8 = vadd.f32 %v2912_v50, %v2696_v25  ;;  %v8405_v53 = vmul.f32 %v6944_v33, %v11150_v54  ;;  %v3416_v19 = vrot.slane %v3270_v18, 1  ;;  %v4027_v58 = vmul.f32 %v6946_v34, %v11176_v0  ;;  %v11197_v18 = vld [vmem:[#allocation46_spill] sm:$0xff] }
 0x1d6   : > { %v3075_v43 = vadd.f32 %v2910_v59, %v2695_v11  ;;  %v10871_v21 = vrot.slane %v8399_v5, 1  ;;  %v3795_v13 = vrot.slane %v3649_v46, 2  ;;  %v5091_v2 = vpack.c.bf16 %v5039_v27, %v5038_v20 }
 0x1d7   : > { %v3204_v63 = vadd.f32 %v3142_v23, %v3076_v8  ;;  %v10870_v36 = vrot.slane %v8405_v53, 2  ;;  %v11195_v32 = vrot.slane %v8269_v3, 1  ;;  %v11196_v25 = vrot.slane %v8276_v51, 2  ;;  %v11198_v51 = vld [vmem:[#allocation43_spill] sm:$0xff] }
 0x1d8   : > { %v3203_v9 = vadd.f32 %v3141_v57, %v3075_v43  ;;  %v3419_v11 = vsel %vm2487_vm5, %v3416_v19, %v10871_v21  ;;  %v4028_v46 = vmul.f32 %v6946_v34, %v11197_v18  ;;  %6224 = vmatmul.mubr.msk.bf16.gmra.mxu1 %vm5136_vm7, %v5091_v2  ;;  %v4156_v20 = vmul.f32 %v6948_v35, %v11197_v18 }
 0x1d9   : > { %v3417_v59 = vsel %vm2487_vm5, %v11195_v32, %v3416_v19  ;;  %v3796_v50 = vsel %vm2867_vm6, %v11196_v25, %v3795_v13  ;;  %v3583_v23 = vadd.f32 %v3419_v11, %v3204_v63  ;;  %v3798_v3 = vsel %vm2867_vm6, %v3795_v13, %v10870_v36  ;;  %6227 = vmatprep.mubr.msk.bf16.mxu1 %vm6656_vm4, %v11030_v4 }
 0x1da   : > { %v3582_v57 = vadd.f32 %v3417_v59, %v3203_v9  ;;  %v8432_v27 = vmul.f32 %v6948_v35, %v11198_v51  ;;  %v4535_v43 = vmul.f32 %v8070_v62, %v11197_v18  ;;  %v8438_v63 = vmul.f32 %v8070_v62, %v11198_v51 }
 0x1db   : > { %v926_v9 = vadd.f32 %v7745_v42, %v7957_v45  ;;  %v3962_v19 = vadd.f32 %v3798_v3, %v3583_v23  ;;  %v4302_v13 = vrot.slane %v4156_v20, 1  ;;  %v937_v2 = vadd.f32 %v7745_v42, %v7981_v26 }
 0x1dc   : > { %v3961_v8 = vadd.f32 %v3796_v50, %v3582_v57  ;;  %v4304_v32 = vrot.slane %v8432_v27, 1  ;;  %v4681_v59 = vrot.slane %v4535_v43, 2  ;;  %v4683_v11 = vrot.slane %v8438_v63, 2 }
 0x1dd   : > { %v1055_v25 = vmax.f32 %v926_v9, 0.0  ;;  %v4090_v21 = vadd.f32 %v4028_v46, %v3962_v19  ;;  %v11199_v47 = vrot.slane %v8304_v10, 1  ;;  %v1058_v61 = vmax.f32 %v937_v2, 0.0 }
 0x1de   : > { %v4089_v36 = vadd.f32 %v4027_v58, %v3961_v8  ;;  %v4305_v45 = vsel %vm2487_vm5, %v4302_v13, %v4304_v32  ;;  %v11200_v50 = vrot.slane %v8314_v52, 2  ;;  %v4684_v57 = vsel %vm2867_vm6, %v4681_v59, %v4683_v11 }
 0x1df   : > { %v4303_v44 = vsel %vm2487_vm5, %v11199_v47, %v4302_v13  ;;  %v1126_v23 = vmin.f32 %v1055_v25, 6.0  ;;  %v4469_v46 = vadd.f32 %v4305_v45, %v4090_v21  ;;  %v1129_v3 = vmin.f32 %v1058_v61, 6.0 }
 0x1e0   : > { %v4682_v26 = vsel %vm2867_vm6, %v11200_v50, %v4681_v59  ;;  %v4468_v58 = vadd.f32 %v4303_v44, %v4089_v36  ;;  %v929_v10 = vadd.f32 %v7745_v42, %v8004_v48  ;;  %v11201_v47 = vunpack.i.h.bf16 %v11185_v24  ;;  %v11203_v36 = vld [vmem:[#allocation13_spill] sm:$0xff] }
 0x1e1   : > { %v950_v52 = vadd.f32 %v7745_v42, %v8026_v49  ;;  %v2255_v43 = vmul.f32 %v11066_v17, %v11078_v39  ;;  %v2256_v9 = vmul.f32 %v11066_v17, %v11110_v6  ;;  %v4848_v44 = vadd.f32 %v4684_v57, %v4469_v46 }
 0x1e2   : > { %v8462_v20 = vmul.f32 %v11201_v47, %v1126_v23  ;;  %v4847_v8 = vadd.f32 %v4682_v26, %v4468_v58  ;;  %v11204_v61 = vunpack.i.l.bf16 %v11203_v36  ;;  %v1056_v48 = vmax.f32 %v929_v10, 0.0 }
 0x1e3   : > { %v1061_v19 = vmax.f32 %v950_v52, 0.0  ;;  %v2384_v24 = vmul.f32 %v11045_v37, %v11110_v6  ;;  %v8478_v42 = vmul.f32 %v11045_v37, %v7321_v30  ;;  %v2764_v39 = vmul.f32 %v11053_v22, %v11110_v6 }
 0x1e4   : > { %11202 = vst [vmem:[#allocation10_spill] sm:$0xff] %v8462_v20  ;;  %v8472_v21 = vmul.f32 %v11204_v61, %v1129_v3  ;;  %v4916_v49 = vadd.f32 %v8156_v12, %v4847_v8  ;;  %v4917_v13 = vadd.f32 %v8156_v12, %v4848_v44  ;;  %v1127_v2 = vmin.f32 %v1056_v48, 6.0  ;;  %v11208_v3 = vld [vmem:[#allocation15_spill] sm:$0xff] }
 0x1e5   : > { %v8486_v59 = vmul.f32 %v11053_v22, %v7321_v30  ;;  %v1132_v25 = vmin.f32 %v1061_v19, 6.0  ;;  %v2533_v45 = vrot.slane %v2384_v24, 1  ;;  %v2535_v50 = vrot.slane %v8478_v42, 1 }
 0x1e6   : > { %11205 = vst [vmem:[#allocation41_spill] sm:$0xff] %v8472_v21  ;;  %v2913_v26 = vrot.slane %v2764_v39, 2  ;;  %v4978_v57 = vmax.f32 %v4916_v49, 0.0  ;;  %v4979_v23 = vmax.f32 %v4917_v13, 0.0  ;;  %v11206_v58 = vunpack.i.l.bf16 %v11190_v14 }
 0x1e7   : > { %v2915_v6 = vrot.slane %v8486_v59, 2  ;;  %v11209_v10 = vunpack.i.l.bf16 %v11208_v3  ;;  %v11211_v52 = vrot.slane %v8357_v16, 1  ;;  %v2536_v44 = vsel %vm2487_vm5, %v2533_v45, %v2535_v50 }
 0x1e8   : > { %v8491_v46 = vmul.f32 %v11206_v58, %v1127_v2  ;;  %v11212_v61 = vrot.slane %v8370_v55, 2  ;;  %v5040_v48 = vmin.f32 %v4978_v57, 6.0  ;;  %v5041_v19 = vmin.f32 %v4979_v23, 6.0 }
 0x1e9   : > { %v8496_v47 = vmul.f32 %v11209_v10, %v1132_v25  ;;  %v2534_v8 = vsel %vm2487_vm5, %v11211_v52, %v2533_v45  ;;  %v2698_v39 = vadd.f32 %v2536_v44, %v2256_v9  ;;  %v2916_v49 = vsel %vm2867_vm6, %v2913_v26, %v2915_v6  ;;  %v11213_v52 = vld [vmem:[#allocation45_spill] sm:$0xff] }
 0x1ea   : > { %11207 = vst [vmem:[#allocation44_spill] sm:$0xff] %v8491_v46  ;;  %v2914_v14 = vsel %vm2867_vm6, %v11212_v61, %v2913_v26  ;;  %v2697_v24 = vadd.f32 %v2534_v8, %v2255_v43  ;;  %v3143_v16 = vmul.f32 %v11041_v15, %v11150_v54  ;;  %v3144_v13 = vmul.f32 %v11041_v15, %v11172_v40 }
 0x1eb   : > { %11210 = vst [vmem:[#allocation49_spill] sm:$0xff] %v8496_v47  ;;  %v3272_v2 = vmul.f32 %v6940_v31, %v11172_v40  ;;  %v5092_v55 = vpack.c.bf16 %v5041_v19, %v5040_v48  ;;  %v3078_v45 = vadd.f32 %v2916_v49, %v2698_v39  ;;  %v8518_v43 = vmul.f32 %v6940_v31, %v11176_v0  ;;  %v11215_v49 = vld [vmem:[#allocation2_spill] sm:$0xff] }
 0x1ec   : > { %v3077_v25 = vadd.f32 %v2914_v14, %v2697_v24  ;;  %v3651_v26 = vmul.f32 %v6944_v33, %v11172_v40  ;;  %v8524_v57 = vmul.f32 %v6944_v33, %v11176_v0  ;;  %v4029_v23 = vmul.f32 %v6946_v34, %v11198_v51 }
 0x1ed   : > { %v3420_v9 = vrot.slane %v3272_v2, 1  ;;  %6228 = vmatmul.mubr.msk.bf16.gmra.mxu1 %vm5136_vm7, %v5092_v55  ;;  %v3206_v3 = vadd.f32 %v3144_v13, %v3078_v45  ;;  %v3422_v10 = vrot.slane %v8518_v43, 1  ;;  %v4030_v8 = vmul.f32 %v6946_v34, %v11213_v52 }
 0x1ee   : > { %v3205_v58 = vadd.f32 %v3143_v16, %v3077_v25  ;;  %6231 = vmatprep.mubr.msk.bf16.mxu1 %vm6656_vm4, %v11030_v4  ;;  %v11214_v44 = vrot.slane %v8399_v5, 1  ;;  %v3799_v14 = vrot.slane %v3651_v26, 2  ;;  %v3801_v48 = vrot.slane %v8524_v57, 2 }
 0x1ef   : > { %v4158_v19 = vmul.f32 %v6948_v35, %v11213_v52  ;;  %v3423_v24 = vsel %vm2487_vm5, %v3420_v9, %v3422_v10  ;;  %v8545_v16 = vmul.f32 %v6948_v35, %v11215_v49  ;;  %v4537_v5 = vmul.f32 %v8070_v62, %v11213_v52 }
 0x1f0   : > { %v3421_v61 = vsel %vm2487_vm5, %v11214_v44, %v3420_v9  ;;  %v3585_v13 = vadd.f32 %v3423_v24, %v3206_v3  ;;  %v11216_v2 = vrot.slane %v8405_v53, 2  ;;  %v3802_v25 = vsel %vm2867_vm6, %v3799_v14, %v3801_v48  ;;  %v8566_v3 = vld [vmem:[%s10733_s2] ss:$0 sm:$0xff] }
 0x1f1   : > { %v3584_v39 = vadd.f32 %v3421_v61, %v3205_v58  ;;  %v4306_v45 = vrot.slane %v4158_v19, 1  ;;  %v4308_v9 = vrot.slane %v8545_v16, 1  ;;  %v8558_v58 = vmul.f32 %v8070_v62, %v11215_v49 }
 0x1f2   : > { %v3800_v55 = vsel %vm2867_vm6, %v11216_v2, %v3799_v14  ;;  %v4685_v44 = vrot.slane %v4537_v5, 2  ;;  %v3964_v61 = vadd.f32 %v3802_v25, %v3585_v13  ;;  %v942_v14 = vadd.f32 %v8566_v3, %v8054_v28 }
 0x1f3   : > { %v3963_v26 = vadd.f32 %v3800_v55, %v3584_v39  ;;  %v4307_v53 = vsel %vm2487_vm5, %v4304_v32, %v4306_v45  ;;  %v953_v19 = vadd.f32 %v8566_v3, %v8086_v60  ;;  %v4309_v39 = vsel %vm2487_vm5, %v4306_v45, %v4308_v9 }
 0x1f4   : > { %v4686_v27 = vsel %vm2867_vm6, %v4683_v11, %v4685_v44  ;;  %v4687_v32 = vrot.slane %v8558_v58, 2  ;;  %v4092_v5 = vadd.f32 %v4030_v8, %v3964_v61  ;;  %v1059_v13 = vmax.f32 %v942_v14, 0.0 }
 0x1f5   : > { %v4091_v24 = vadd.f32 %v4029_v23, %v3963_v26  ;;  %v1062_v2 = vmax.f32 %v953_v19, 0.0  ;;  %v945_v28 = vadd.f32 %v8566_v3, %v8117_v56  ;;  %v966_v23 = vadd.f32 %v8566_v3, %v8139_v41  ;;  %v11219_v41 = vld [vmem:[#allocation17_spill] sm:$0xff] }
 0x1f6   : > { %v4688_v60 = vsel %vm2867_vm6, %v4685_v44, %v4687_v32  ;;  %v2257_v63 = vmul.f32 %v11066_v17, %v7321_v30  ;;  %v4471_v11 = vadd.f32 %v4309_v39, %v4092_v5  ;;  %v1130_v25 = vmin.f32 %v1059_v13, 6.0 }
 0x1f7   : > { %v4470_v55 = vadd.f32 %v4307_v53, %v4091_v24  ;;  %v1133_v45 = vmin.f32 %v1062_v2, 6.0  ;;  %v1060_v8 = vmax.f32 %v945_v28, 0.0  ;;  %v1065_v61 = vmax.f32 %v966_v23, 0.0 }
 0x1f8   : > { %v2258_v56 = vmul.f32 %v11066_v17, %v11147_v1  ;;  %v2386_v53 = vmul.f32 %v11045_v37, %v11147_v1  ;;  %v4850_v14 = vadd.f32 %v4688_v60, %v4471_v11  ;;  %v11217_v44 = vunpack.i.h.bf16 %v11203_v36 }
 0x1f9   : > { %v4849_v26 = vadd.f32 %v4686_v27, %v4470_v55  ;;  %v11220_v24 = vunpack.i.h.bf16 %v11219_v41  ;;  %v1131_v39 = vmin.f32 %v1060_v8, 6.0  ;;  %v1136_v27 = vmin.f32 %v1065_v61, 6.0  ;;  %v11222_v55 = vld [vmem:[#allocation14_spill] sm:$0xff] }
 0x1fa   : > { %v8594_v19 = vmul.f32 %v11217_v44, %v1130_v25  ;;  %v8603_v13 = vmul.f32 %v11045_v37, %v11150_v54  ;;  %v2537_v2 = vrot.slane %v2386_v53, 1  ;;  %v4919_v28 = vadd.f32 %v8156_v12, %v4850_v14 }
 0x1fb   : > { %v8598_v30 = vmul.f32 %v11220_v24, %v1133_v45  ;;  %v4918_v5 = vadd.f32 %v8156_v12, %v4849_v26  ;;  %v11223_v60 = vunpack.i.h.bf16 %v11222_v55  ;;  %v2766_v23 = vmul.f32 %v11053_v22, %v11147_v1  ;;  %v11225_v45 = vld [vmem:[#allocation23_spill] sm:$0xff] }
 0x1fc   : > { %11218 = vst [vmem:[#allocation50_spill] sm:$0xff] %v8594_v19  ;;  %v8614_v11 = vmul.f32 %v11053_v22, %v11150_v54  ;;  %v8617_v8 = vmul.f32 %v11225_v45, %v1136_v27  ;;  %v2538_v26 = vsel %vm2487_vm5, %v2535_v50, %v2537_v2  ;;  %v10878_v61 = vrot.slane %v8603_v13, 1 }
 0x1fd   : > { %11221 = vst [vmem:[#allocation35_spill] sm:$0xff] %v8598_v30  ;;  %v8608_v36 = vmul.f32 %v11223_v60, %v1131_v39  ;;  %v4980_v25 = vmax.f32 %v4918_v5, 0.0  ;;  %v4981_v53 = vmax.f32 %v4919_v28, 0.0  ;;  %v2699_v14 = vadd.f32 %v2538_v26, %v2257_v63 }
 0x1fe   : > { %v2917_v44 = vrot.slane %v2766_v23, 2  ;;  %v10877_v41 = vrot.slane %v8614_v11, 2  ;;  %v2540_v24 = vsel %vm2487_vm5, %v2537_v2, %v10878_v61  ;;  %v3145_v39 = vmul.f32 %v11041_v15, %v11176_v0 }
 0x1ff   : > { %11224 = vst [vmem:[#allocation11_spill] sm:$0xff] %v8608_v36  ;;  %v5042_v1 = vmin.f32 %v4980_v25, 6.0  ;;  %v3146_v42 = vmul.f32 %v11041_v15, %v11197_v18  ;;  %v5043_v5 = vmin.f32 %v4981_v53, 6.0  ;;  %v2700_v50 = vadd.f32 %v2540_v24, %v2258_v56  ;;  %v11226_v24 = vld [vmem:[#allocation28_spill] sm:$0xff] }
 0x200   : > { %v2918_v63 = vsel %vm2867_vm6, %v2915_v6, %v2917_v44  ;;  %v2920_v27 = vsel %vm2867_vm6, %v2917_v44, %v10877_v41  ;;  %v3274_v2 = vmul.f32 %v6940_v31, %v11197_v18  ;;  %v8641_v55 = vmul.f32 %v6940_v31, %v11198_v51 }
 0x201   : > { %v3079_v28 = vadd.f32 %v2918_v63, %v2699_v14  ;;  %v3653_v60 = vmul.f32 %v6944_v33, %v11197_v18  ;;  %v5093_v56 = vpack.c.bf16 %v5043_v5, %v5042_v1  ;;  %v3080_v23 = vadd.f32 %v2920_v27, %v2700_v50  ;;  %v11227_v63 = vld [vmem:[#allocation20_spill] sm:$0xff] }
 0x202   : > { %v8647_v59 = vmul.f32 %v6944_v33, %v11198_v51  ;;  %v4031_v6 = vmul.f32 %v6946_v34, %v11215_v49  ;;  %v3424_v45 = vrot.slane %v3274_v2, 1  ;;  %v10876_v26 = vrot.slane %v8641_v55, 1 }
 0x203   : > { %v3207_v25 = vadd.f32 %v3145_v39, %v3079_v28  ;;  %v3803_v53 = vrot.slane %v3653_v60, 2  ;;  %6232 = vmatmul.mubr.msk.bf16.gmra.mxu1 %vm5136_vm7, %v5093_v56  ;;  %v3208_v14 = vadd.f32 %v3146_v42, %v3080_v23  ;;  %v4032_v1 = vmul.f32 %v6946_v34, %v11226_v24 }
 0x204   : > { %v10875_v44 = vrot.slane %v8647_v59, 2  ;;  %v4160_v5 = vmul.f32 %v6948_v35, %v11226_v24  ;;  %6235 = vmatprep.mubr.msk.bf16.mxu1 %vm6656_vm4, %v11030_v4  ;;  %v3425_v39 = vsel %vm2487_vm5, %v3422_v10, %v3424_v45  ;;  %v3427_v50 = vsel %vm2487_vm5, %v3424_v45, %v10876_v26 }
 0x205   : > { %v3804_v42 = vsel %vm2867_vm6, %v3801_v48, %v3803_v53  ;;  %v8671_v27 = vmul.f32 %v6948_v35, %v11227_v63  ;;  %v3586_v28 = vadd.f32 %v3425_v39, %v3207_v25  ;;  %v3587_v2 = vadd.f32 %v3427_v50, %v3208_v14  ;;  %v11228_v48 = vld [vmem:[#allocation7_spill] sm:$0xff] }
 0x206   : > { %v3806_v43 = vsel %vm2867_vm6, %v3803_v53, %v10875_v44  ;;  %v4310_v60 = vrot.slane %v4160_v5, 1  ;;  %v4539_v56 = vmul.f32 %v8070_v62, %v11226_v24  ;;  %v8681_v57 = vmul.f32 %v8070_v62, %v11227_v63  ;;  %v11229_v53 = vld [vmem:[#allocation8_spill] sm:$0xff] }
 0x207   : > { %v10880_v10 = vrot.slane %v8671_v27, 1  ;;  %v958_v23 = vadd.f32 %v8566_v3, %v11228_v48  ;;  %v3965_v45 = vadd.f32 %v3804_v42, %v3586_v28  ;;  %v3966_v25 = vadd.f32 %v3806_v43, %v3587_v2  ;;  %v11230_v42 = vld [vmem:[#allocation3_spill] sm:$0xff] }
 0x208   : > { %v4311_v14 = vsel %vm2487_vm5, %v4308_v9, %v4310_v60  ;;  %v969_v5 = vadd.f32 %v8566_v3, %v11229_v53  ;;  %v4689_v50 = vrot.slane %v4539_v56, 2  ;;  %v10879_v44 = vrot.slane %v8681_v57, 2  ;;  %v11231_v43 = vld [vmem:[#allocation31_spill] sm:$0xff] }
 0x209   : > { %v4313_v39 = vsel %vm2487_vm5, %v4310_v60, %v10880_v10  ;;  %v1063_v26 = vmax.f32 %v958_v23, 0.0  ;;  %v4093_v41 = vadd.f32 %v4031_v6, %v3965_v45  ;;  %v4094_v61 = vadd.f32 %v4032_v1, %v3966_v25  ;;  %v11232_v45 = vld [vmem:[#allocation21_spill] sm:$0xff] }
 0x20a   : > { %v1066_v48 = vmax.f32 %v969_v5, 0.0  ;;  %v961_v28 = vadd.f32 %v8566_v3, %v11230_v42  ;;  %v4690_v16 = vsel %vm2867_vm6, %v4687_v32, %v4689_v50  ;;  %v4692_v9 = vsel %vm2867_vm6, %v4689_v50, %v10879_v44  ;;  %v11235_v42 = vld [vmem:[#allocation24_spill] sm:$0xff] }
 0x20b   : > { %v1134_v2 = vmin.f32 %v1063_v26, 6.0  ;;  %v982_v60 = vadd.f32 %v8566_v3, %v11231_v43  ;;  %v4472_v56 = vadd.f32 %v4311_v14, %v4093_v41  ;;  %v4473_v23 = vadd.f32 %v4313_v39, %v4094_v61 }
 0x20c   : > { %v1137_v6 = vmin.f32 %v1066_v48, 6.0  ;;  %v1064_v1 = vmax.f32 %v961_v28, 0.0  ;;  %v11233_v25 = vunpack.i.l.bf16 %v11232_v45  ;;  %v2259_v58 = vmul.f32 %v11066_v17, %v11150_v54 }
 0x20d   : > { %v1069_v5 = vmax.f32 %v982_v60, 0.0  ;;  %v2260_v32 = vmul.f32 %v11066_v17, %v11172_v40  ;;  %v4851_v50 = vadd.f32 %v4690_v16, %v4472_v56  ;;  %v4852_v26 = vadd.f32 %v4692_v9, %v4473_v23  ;;  %v11238_v16 = vld [vmem:[#allocation22_spill] sm:$0xff]  ;;  %v11240_v60 = vld [vmem:[#allocation25_spill] sm:$0xff] }
 0x20e   : > { %v8706_v53 = vmul.f32 %v11233_v25, %v1134_v2  ;;  %v11236_v44 = vunpack.i.l.bf16 %v11235_v42  ;;  %v1135_v61 = vmin.f32 %v1064_v1, 6.0  ;;  %v2388_v14 = vmul.f32 %v11045_v37, %v11172_v40 }
 0x20f   : > { %v1140_v41 = vmin.f32 %v1069_v5, 6.0  ;;  %v8720_v39 = vmul.f32 %v11045_v37, %v11176_v0  ;;  %v2768_v54 = vmul.f32 %v11053_v22, %v11172_v40  ;;  %v4920_v48 = vadd.f32 %v8156_v12, %v4851_v50 }
 0x210   : > { %11234 = vst [vmem:[#allocation12_spill] sm:$0xff] %v8706_v53  ;;  %v8714_v43 = vmul.f32 %v11236_v44, %v1137_v6  ;;  %v4921_v28 = vadd.f32 %v8156_v12, %v4852_v26  ;;  %v11239_v9 = vunpack.i.h.bf16 %v11238_v16  ;;  %v8732_v2 = vmul.f32 %v11053_v22, %v11176_v0 }
 0x211   : > { %v11241_v56 = vunpack.i.h.bf16 %v11240_v60  ;;  %v2541_v6 = vrot.slane %v2388_v14, 1  ;;  %v10884_v1 = vrot.slane %v8720_v39, 1  ;;  %v2921_v45 = vrot.slane %v2768_v54, 2 }
 0x212   : > { %11237 = vst [vmem:[#allocation46_spill] sm:$0xff] %v8714_v43  ;;  %v8728_v44 = vmul.f32 %v11239_v9, %v1135_v61  ;;  %v4982_v40 = vmax.f32 %v4920_v48, 0.0  ;;  %v4983_v25 = vmax.f32 %v4921_v28, 0.0  ;;  %v3147_v50 = vmul.f32 %v11041_v15, %v11198_v51 }
 0x213   : > { %v2222_v23 = vmul.f32 %v11241_v56, %v1140_v41  ;;  %v11244_v28 = vrot.slane %v8603_v13, 1  ;;  %v2544_v36 = vsel %vm2487_vm5, %v2541_v6, %v10884_v1  ;;  %v11245_v21 = vrot.slane %v8614_v11, 2  ;;  %v11249_v1 = vld [vmem:[#allocation37_spill] sm:$0xff] }
 0x214   : > { %v5044_v14 = vmin.f32 %v4982_v40, 6.0  ;;  %v5045_v54 = vmin.f32 %v4983_v25, 6.0  ;;  %v3148_v10 = vmul.f32 %v11041_v15, %v11213_v52  ;;  %v3276_v5 = vmul.f32 %v6940_v31, %v11213_v52 }
 0x215   : > { %v8741_v26 = vmul.f32 %v6940_v31, %v2222_v23  ;;  %v8744_v61 = vmul.f32 %v6944_v33, %v2222_v23  ;;  %v8747_v16 = vmul.f32 %v6946_v34, %v2222_v23  ;;  %v8750_v41 = vmul.f32 %v6948_v35, %v2222_v23 }
 0x216   : > { %v8753_v48 = vmul.f32 %v8070_v62, %v2222_v23  ;;  %v2542_v9 = vsel %vm2487_vm5, %v11244_v28, %v2541_v6  ;;  %v5094_v19 = vpack.c.bf16 %v5045_v54, %v5044_v14  ;;  %v2702_v23 = vadd.f32 %v2544_v36, %v2260_v32  ;;  %v11247_v32 = vld [vmem:[#allocation18_spill] sm:$0xff] }
 0x217   : > { %11242 = vst [vmem:[#allocation43_spill] sm:$0xff] %v8750_v41  ;;  %v2701_v25 = vadd.f32 %v2542_v9, %v2259_v58  ;;  %v2922_v13 = vsel %vm2867_vm6, %v11245_v21, %v2921_v45  ;;  %v11246_v28 = vrot.slane %v8732_v2, 2  ;;  %v8778_v36 = vmul.f32 %v6940_v31, %v11215_v49 }
 0x218   : > { %11243 = vst [vmem:[#allocation13_spill] sm:$0xff] %v8753_v48  ;;  %6236 = vmatmul.mubr.msk.bf16.gmra.mxu1 %vm5136_vm7, %v5094_v19  ;;  %v3655_v21 = vmul.f32 %v6944_v33, %v11213_v52  ;;  %v3428_v11 = vrot.slane %v3276_v5, 1  ;;  %v8786_v58 = vmul.f32 %v6944_v33, %v11215_v49  ;;  %v4033_v19 = vmul.f32 %v6946_v34, %v11227_v63 }
 0x219   : > { %v2924_v56 = vsel %vm2867_vm6, %v2921_v45, %v11246_v28  ;;  %v3081_v6 = vadd.f32 %v2922_v13, %v2701_v25  ;;  %6239 = vmatprep.mubr.msk.bf16.mxu1 %vm6656_vm4, %v11030_v4  ;;  %v4034_v45 = vmul.f32 %v6946_v34, %v11247_v32  ;;  %v4162_v28 = vmul.f32 %v6948_v35, %v11247_v32 }
 0x21a   : > { %v3082_v14 = vadd.f32 %v2924_v56, %v2702_v23  ;;  %v10888_v56 = vrot.slane %v8778_v36, 1  ;;  %v3807_v25 = vrot.slane %v3655_v21, 2  ;;  %v11248_v23 = vrot.slane %v8641_v55, 1 }
 0x21b   : > { %v3209_v54 = vadd.f32 %v3147_v50, %v3081_v6  ;;  %v10891_v5 = vrot.slane %v8786_v58, 2  ;;  %v8801_v40 = vmul.f32 %v6948_v35, %v11249_v1  ;;  %v11250_v6 = vrot.slane %v8647_v59, 2  ;;  %v11251_v59 = vld [vmem:[#allocation42_spill] sm:$0xff] }
 0x21c   : > { %v3210_v9 = vadd.f32 %v3148_v10, %v3082_v14  ;;  %v3429_v13 = vsel %vm2487_vm5, %v11248_v23, %v3428_v11  ;;  %v3431_v10 = vsel %vm2487_vm5, %v3428_v11, %v10888_v56  ;;  %v4541_v14 = vmul.f32 %v8070_v62, %v11247_v32 }
 0x21d   : > { %v3588_v50 = vadd.f32 %v3429_v13, %v3209_v54  ;;  %v3808_v55 = vsel %vm2867_vm6, %v11250_v6, %v3807_v25  ;;  %v3810_v23 = vsel %vm2867_vm6, %v3807_v25, %v10891_v5  ;;  %v4314_v46 = vrot.slane %v4162_v28, 1  ;;  %v11253_v28 = vld [vmem:[#allocation40_spill] sm:$0xff] }
 0x21e   : > { %v3589_v21 = vadd.f32 %v3431_v10, %v3210_v9  ;;  %v10890_v20 = vrot.slane %v8801_v40, 1  ;;  %v8817_v11 = vmul.f32 %v8070_v62, %v11249_v1  ;;  %v4693_v54 = vrot.slane %v4541_v14, 2 }
 0x21f   : > { %v3967_v7 = vadd.f32 %v3808_v55, %v3588_v50  ;;  %v974_v13 = vadd.f32 %v8566_v3, %v11251_v59  ;;  %v11252_v56 = vrot.slane %v8671_v27, 1  ;;  %v985_v10 = vadd.f32 %v8566_v3, %v11253_v28 }
 0x220   : > { %v3968_v6 = vadd.f32 %v3810_v23, %v3589_v21  ;;  %v4317_v25 = vsel %vm2487_vm5, %v4314_v46, %v10890_v20  ;;  %v11254_v62 = vrot.slane %v8681_v57, 2  ;;  %v10889_v14 = vrot.slane %v8817_v11, 2 }
 0x221   : > { %v4315_v9 = vsel %vm2487_vm5, %v11252_v56, %v4314_v46  ;;  %v4095_v50 = vadd.f32 %v4033_v19, %v3967_v7  ;;  %v1067_v59 = vmax.f32 %v974_v13, 0.0  ;;  %v1070_v23 = vmax.f32 %v985_v10, 0.0 }
 0x222   : > { %v4694_v55 = vsel %vm2867_vm6, %v11254_v62, %v4693_v54  ;;  %v4096_v21 = vadd.f32 %v4034_v45, %v3968_v6  ;;  %v2291_v27 = vmul.f32 %v11066_v17, %v8496_v47  ;;  %v2292_v56 = vmul.f32 %v11066_v17, %v8598_v30 }
 0x223   : > { %v4474_v46 = vadd.f32 %v4315_v9, %v4095_v50  ;;  %v4696_v7 = vsel %vm2867_vm6, %v4693_v54, %v10889_v14  ;;  %v1138_v19 = vmin.f32 %v1067_v59, 6.0  ;;  %v8842_v57 = vmul.f32 %v11045_v37, %v8496_v47  ;;  %v11259_v59 = vld [vmem:[#allocation27_spill] sm:$0xff] }
 0x224   : > { %v4475_v28 = vadd.f32 %v4317_v25, %v4096_v21  ;;  %v1141_v13 = vmin.f32 %v1070_v23, 6.0  ;;  %v2420_v45 = vmul.f32 %v11045_v37, %v8598_v30  ;;  %v8848_v6 = vmul.f32 %v11045_v37, %v8706_v53 }
 0x225   : > { %11255 = vst [vmem:[#allocation15_spill] sm:$0xff] %v8842_v57  ;;  %v4853_v10 = vadd.f32 %v4694_v55, %v4474_v46  ;;  %v11256_v9 = vunpack.i.h.bf16 %v11235_v42  ;;  %v10894_v54 = vrot.slane %v8842_v57, 1  ;;  %v8857_v62 = vmul.f32 %v11053_v22, %v8496_v47 }
 0x226   : > { %v4854_v25 = vadd.f32 %v4696_v7, %v4475_v28  ;;  %v11260_v21 = vunpack.i.l.bf16 %v11259_v59  ;;  %v2605_v14 = vrot.slane %v2420_v45, 1  ;;  %v10895_v20 = vrot.slane %v8848_v6, 1 }
 0x227   : > { %v8852_v50 = vmul.f32 %v11256_v9, %v1138_v19  ;;  %11258 = vst [vmem:[#allocation2_spill] sm:$0xff] %v8857_v62  ;;  %v4922_v5 = vadd.f32 %v8156_v12, %v4853_v10  ;;  %v2800_v42 = vmul.f32 %v11053_v22, %v8598_v30  ;;  %v8867_v55 = vmul.f32 %v11053_v22, %v8706_v53 }
 0x228   : > { %v2223_v23 = vmul.f32 %v11260_v21, %v1141_v13  ;;  %v4923_v19 = vadd.f32 %v8156_v12, %v4854_v25  ;;  %v2606_v7 = vsel %vm2487_vm5, %v10894_v54, %v2605_v14  ;;  %v2608_v28 = vsel %vm2487_vm5, %v2605_v14, %v10895_v20 }
 0x229   : > { %11257 = vst [vmem:[#allocation45_spill] sm:$0xff] %v8852_v50  ;;  %v3179_v13 = vmul.f32 %v11041_v15, %v8617_v8  ;;  %v4984_v45 = vmax.f32 %v4922_v5, 0.0  ;;  %v2733_v10 = vadd.f32 %v2606_v7, %v2291_v27  ;;  %v2734_v9 = vadd.f32 %v2608_v28, %v2292_v56 }
 0x22a   : > { %v2985_v21 = vrot.slane %v2800_v42, 2  ;;  %v4985_v30 = vmax.f32 %v4923_v19, 0.0  ;;  %v10903_v46 = vrot.slane %v8867_v55, 2  ;;  %v3180_v12 = vmul.f32 %v11041_v15, %v8714_v43 }
 0x22b   : > { %v8884_v25 = vmul.f32 %v6940_v31, %v8617_v8  ;;  %v5046_v54 = vmin.f32 %v4984_v45, 6.0  ;;  %v11262_v14 = vrot.slane %v8857_v62, 2  ;;  %v3308_v5 = vmul.f32 %v6940_v31, %v8714_v43 }
 0x22c   : > { %v8893_v27 = vmul.f32 %v6940_v31, %v8852_v50  ;;  %v5047_v56 = vmin.f32 %v4985_v30, 6.0  ;;  %v2988_v42 = vsel %vm2867_vm6, %v2985_v21, %v10903_v46  ;;  %v3687_v30 = vmul.f32 %v6944_v33, %v8714_v43 }
 0x22d   : > { %11261 = vst [vmem:[#allocation17_spill] sm:$0xff] %v8884_v25  ;;  %v2986_v20 = vsel %vm2867_vm6, %v11262_v14, %v2985_v21  ;;  %v10901_v7 = vrot.slane %v8884_v25, 1  ;;  %v3114_v28 = vadd.f32 %v2988_v42, %v2734_v9  ;;  %v3492_v45 = vrot.slane %v3308_v5, 1 }
 0x22e   : > { %v3113_v19 = vadd.f32 %v2986_v20, %v2733_v10  ;;  %v10902_v62 = vrot.slane %v8893_v27, 1  ;;  %v8902_v14 = vmul.f32 %v6944_v33, %v8617_v8  ;;  %v5095_v57 = vpack.c.bf16 %v5047_v56, %v5046_v54 }
 0x22f   : > { %v8908_v32 = vmul.f32 %v6944_v33, %v8852_v50  ;;  %v3242_v20 = vadd.f32 %v3180_v12, %v3114_v28  ;;  %v3493_v10 = vsel %vm2487_vm5, %v10901_v7, %v3492_v45  ;;  %v4066_v56 = vmul.f32 %v6946_v34, %v2223_v23 }
 0x230   : > { %11263 = vst [vmem:[#allocation14_spill] sm:$0xff] %v8902_v14  ;;  %v3241_v47 = vadd.f32 %v3179_v13, %v3113_v19  ;;  %v3495_v9 = vsel %vm2487_vm5, %v3492_v45, %v10902_v62  ;;  %v10904_v21 = vrot.slane %v8902_v14, 2  ;;  %6240 = vmatmul.mubr.msk.bf16.gmra.mxu1 %vm5136_vm7, %v5095_v57  ;;  %v3871_v13 = vrot.slane %v3687_v30, 2  ;;  %v8926_v19 = vld [vmem:[%s10734_s3 + $0x8] ss:$0 sm:$0xff]  ;;  %v11264_v45 = vld [vmem:[#allocation16_spill] sm:$0xff] }
 0x231   : > { %v10905_v5 = vrot.slane %v8908_v32, 2  ;;  %v3621_v42 = vadd.f32 %v3495_v9, %v3242_v20  ;;  %v8921_v12 = vmul.f32 %v6948_v35, %v2223_v23  ;;  %v8929_v28 = vmul.f32 %v8926_v19, %v2223_v23  ;;  %6243 = vmatprep.mubr.msk.bf16.mxu1 %vm6656_vm4, %v11030_v4 }
 0x232   : > { %v3620_v54 = vadd.f32 %v3493_v10, %v3241_v47  ;;  %v977_v47 = vadd.f32 %v8566_v3, %v11264_v45  ;;  %v3872_v57 = vsel %vm2867_vm6, %v10904_v21, %v3871_v13  ;;  %v998_v20 = vadd.f32 %v8566_v3, %v8339_v29 }
 0x233   : > { %v3874_v30 = vsel %vm2867_vm6, %v3871_v13, %v10905_v5  ;;  %v2261_v23 = vmul.f32 %v11066_v17, %v11176_v0  ;;  %v10907_v45 = vrot.slane %v8921_v12, 1  ;;  %v10906_v7 = vrot.slane %v8929_v28, 2 }
 0x234   : > { %v3999_v10 = vadd.f32 %v3872_v57, %v3620_v54  ;;  %v4000_v9 = vadd.f32 %v3874_v30, %v3621_v42  ;;  %v1068_v62 = vmax.f32 %v977_v47, 0.0  ;;  %v1073_v46 = vmax.f32 %v998_v20, 0.0 }
 0x235   : > { %v2262_v21 = vmul.f32 %v11066_v17, %v11197_v18  ;;  %v2390_v13 = vmul.f32 %v11045_v37, %v11197_v18  ;;  %v11265_v0 = vrot.slane %v8750_v41, 1  ;;  %v11266_v42 = vrot.slane %v8753_v48, 2 }
 0x236   : > { %v4127_v5 = vadd.f32 %v8747_v16, %v3999_v10  ;;  %v8952_v29 = vadd.f32 %v4066_v56, %v4000_v9  ;;  %v1139_v57 = vmin.f32 %v1068_v62, 6.0  ;;  %v1144_v30 = vmin.f32 %v1073_v46, 6.0 }
 0x237   : > { %v4379_v54 = vsel %vm2487_vm5, %v11265_v0, %v10907_v45  ;;  %v8964_v47 = vsel %vm2867_vm6, %v11266_v42, %v10906_v7  ;;  %v8968_v16 = vmul.f32 %v11045_v37, %v11198_v51  ;;  %v2545_v56 = vrot.slane %v2390_v13, 1  ;;  %v11270_v42 = vld [vmem:[#allocation26_spill] sm:$0xff] }
 0x238   : > { %11267 = vst [vmem:[#allocation23_spill] sm:$0xff] %v8964_v47  ;;  %v8970_v20 = vadd.f32 %v4379_v54, %v4127_v5  ;;  %v2770_v10 = vmul.f32 %v11053_v22, %v11197_v18  ;;  %v8976_v9 = vmul.f32 %v11053_v22, %v11198_v51  ;;  %v3149_v0 = vmul.f32 %v11041_v15, %v11215_v49 }
 0x239   : > { %v11269_v62 = vunpack.i.l.bf16 %v11240_v60  ;;  %v11271_v7 = vunpack.i.h.bf16 %v11270_v42  ;;  %v11272_v5 = vrot.slane %v8720_v39, 1  ;;  %v10909_v18 = vrot.slane %v8968_v16, 1 }
 0x23a   : > { %11268 = vst [vmem:[#allocation20_spill] sm:$0xff] %v8970_v20  ;;  %v2925_v47 = vrot.slane %v2770_v10, 2  ;;  %v10911_v20 = vrot.slane %v8976_v9, 2  ;;  %v3150_v48 = vmul.f32 %v11041_v15, %v11226_v24 }
 0x23b   : > { %v8982_v46 = vmul.f32 %v11269_v62, %v1139_v57  ;;  %v2226_v45 = vmul.f32 %v11271_v7, %v1144_v30  ;;  %v2546_v13 = vsel %vm2487_vm5, %v11272_v5, %v2545_v56  ;;  %v2548_v39 = vsel %vm2487_vm5, %v2545_v56, %v10909_v18 }
 0x23c   : > { %v2703_v54 = vadd.f32 %v2546_v13, %v2261_v23  ;;  %v3278_v7 = vmul.f32 %v6940_v31, %v11226_v24  ;;  %v2704_v23 = vadd.f32 %v2548_v39, %v2262_v21  ;;  %v11273_v30 = vrot.slane %v8732_v2, 2 }
 0x23d   : > { %v8994_v60 = vmul.f32 %v6948_v35, %v2226_v45  ;;  %v8997_v57 = vmul.f32 %v8926_v19, %v2226_v45  ;;  %v2928_v62 = vsel %vm2867_vm6, %v2925_v47, %v10911_v20  ;;  %v9012_v45 = vmul.f32 %v6940_v31, %v11227_v63 }
 0x23e   : > { %v2926_v10 = vsel %vm2867_vm6, %v11273_v30, %v2925_v47  ;;  %v3432_v18 = vrot.slane %v3278_v7, 1  ;;  %v3084_v41 = vadd.f32 %v2928_v62, %v2704_v23  ;;  %v3657_v2 = vmul.f32 %v6944_v33, %v11226_v24 }
 0x23f   : > { %v3083_v13 = vadd.f32 %v2926_v10, %v2703_v54  ;;  %v10914_v21 = vrot.slane %v9012_v45, 1  ;;  %v9021_v39 = vmul.f32 %v6944_v33, %v11227_v63  ;;  %v11274_v30 = vrot.slane %v8778_v36, 1  ;;  %v11275_v54 = vld [vmem:[#allocation5_spill] sm:$0xff] }
 0x240   : > { %v4035_v56 = vmul.f32 %v6946_v34, %v11249_v1  ;;  %v4036_v7 = vmul.f32 %v6946_v34, %v11275_v54  ;;  %v3212_v23 = vadd.f32 %v3150_v48, %v3084_v41  ;;  %v3811_v62 = vrot.slane %v3657_v2, 2 }
 0x241   : > { %v3211_v47 = vadd.f32 %v3149_v0, %v3083_v13  ;;  %v3433_v20 = vsel %vm2487_vm5, %v11274_v30, %v3432_v18  ;;  %v3435_v10 = vsel %vm2487_vm5, %v3432_v18, %v10914_v21  ;;  %v10918_v5 = vrot.slane %v9021_v39, 2  ;;  %v11276_v0 = vld [vmem:[#allocation32_spill] sm:$0xff] }
 0x242   : > { %v4164_v36 = vmul.f32 %v6948_v35, %v11275_v54  ;;  %v9038_v13 = vmul.f32 %v6948_v35, %v11276_v0  ;;  %v4543_v30 = vmul.f32 %v8926_v19, %v11275_v54  ;;  %v3591_v25 = vadd.f32 %v3435_v10, %v3212_v23 }
 0x243   : > { %v3590_v14 = vadd.f32 %v3433_v20, %v3211_v47  ;;  %v11277_v41 = vrot.slane %v8786_v58, 2  ;;  %v3814_v18 = vsel %vm2867_vm6, %v3811_v62, %v10918_v5  ;;  %v9050_v20 = vmul.f32 %v8926_v19, %v11276_v0 }
 0x244   : > { %v4318_v47 = vrot.slane %v4164_v36, 1  ;;  %v10920_v21 = vrot.slane %v9038_v13, 1  ;;  %v4697_v43 = vrot.slane %v4543_v30, 2  ;;  %v3970_v24 = vadd.f32 %v3814_v18, %v3591_v25 }
 0x245   : > { %v3812_v48 = vsel %vm2867_vm6, %v11277_v41, %v3811_v62  ;;  %11278 = vst [vmem:[#allocation7_spill] sm:$0xff] %v9050_v20  ;;  %v10919_v23 = vrot.slane %v9050_v20, 2  ;;  %v990_v58 = vadd.f32 %v8566_v3, %v8361_v38  ;;  %v2293_v10 = vmul.f32 %v11066_v17, %v8706_v53 }
 0x246   : > { %v3969_v2 = vadd.f32 %v3812_v48, %v3590_v14  ;;  %v11279_v62 = vrot.slane %v8801_v40, 1  ;;  %v4321_v14 = vsel %vm2487_vm5, %v4318_v47, %v10920_v21  ;;  %v11280_v36 = vrot.slane %v8817_v11, 2  ;;  %v992_v40 = vpop.f32.mrf.mxu0 }
 0x247   : > { %v4098_v30 = vadd.f32 %v4036_v7, %v3970_v24  ;;  %v4700_v38 = vsel %vm2867_vm6, %v4697_v43, %v10919_v23  ;;  %v1071_v48 = vmax.f32 %v990_v58, 0.0  ;;  %v3310_v11 = vmul.f32 %v6940_v31, %v8982_v46 }
 0x248   : > { %v4097_v41 = vadd.f32 %v4035_v56, %v3969_v2  ;;  %v4319_v5 = vsel %vm2487_vm5, %v11279_v62, %v4318_v47  ;;  %v4698_v25 = vsel %vm2867_vm6, %v11280_v36, %v4697_v43  ;;  %v2422_v56 = vmul.f32 %v11045_v37, %v8728_v44 }
 0x249   : > { %v2802_v2 = vmul.f32 %v11053_v22, %v8728_v44  ;;  %v3181_v47 = vmul.f32 %v11041_v15, %v8852_v50  ;;  %v4477_v24 = vadd.f32 %v4321_v14, %v4098_v30  ;;  %v1142_v7 = vmin.f32 %v1071_v48, 6.0  ;;  %v9089_v14 = vld [vmem:[%s10735_s4] ss:$0 sm:$0xff] }
 0x24a   : > { %v4476_v18 = vadd.f32 %v4319_v5, %v4097_v41  ;;  %v2609_v62 = vrot.slane %v2422_v56, 1  ;;  %v3689_v43 = vmul.f32 %v6944_v33, %v8982_v46  ;;  %v3496_v23 = vrot.slane %v3310_v11, 1 }
 0x24b   : > { %v2989_v36 = vrot.slane %v2802_v2, 2  ;;  %v993_v5 = vadd.f32 %v8566_v3, %v992_v40  ;;  %v4856_v41 = vadd.f32 %v4700_v38, %v4477_v24  ;;  %v11281_v21 = vunpack.i.h.bf16 %v11259_v59 }
 0x24c   : > { %v4855_v58 = vadd.f32 %v4698_v25, %v4476_v18  ;;  %v11282_v50 = vrot.slane %v8848_v6, 1  ;;  %v3875_v20 = vrot.slane %v3689_v43, 2  ;;  %v11283_v48 = vrot.slane %v8867_v55, 2 }
 0x24d   : > { %v2224_v53 = vmul.f32 %v11281_v21, %v1142_v7  ;;  %v11284_v59 = vrot.slane %v8893_v27, 1  ;;  %v4925_v6 = vadd.f32 %v9089_v14, %v4856_v41  ;;  %v2294_v27 = vmul.f32 %v11066_v17, %v8728_v44 }
 0x24e   : > { %v2610_v54 = vsel %vm2487_vm5, %v11282_v50, %v2609_v62  ;;  %v4924_v25 = vadd.f32 %v9089_v14, %v4855_v58  ;;  %v2990_v3 = vsel %vm2867_vm6, %v11283_v48, %v2989_v36  ;;  %v11285_v50 = vrot.slane %v8908_v32, 2 }
 0x24f   : > { %v2735_v30 = vadd.f32 %v2610_v54, %v2293_v10  ;;  %v3497_v21 = vsel %vm2487_vm5, %v11284_v59, %v3496_v23  ;;  %v4067_v56 = vmul.f32 %v6946_v34, %v2224_v53  ;;  %v4195_v40 = vmul.f32 %v6948_v35, %v2224_v53 }
 0x250   : > { %v3876_v38 = vsel %vm2867_vm6, %v11285_v50, %v3875_v20  ;;  %v4986_v18 = vmax.f32 %v4924_v25, 0.0  ;;  %v4574_v55 = vmul.f32 %v8926_v19, %v2224_v53  ;;  %v1072_v10 = vmax.f32 %v993_v5, 0.0 }
 0x251   : > { %v3115_v54 = vadd.f32 %v2990_v3, %v2735_v30  ;;  %v4987_v2 = vmax.f32 %v4925_v6, 0.0  ;;  %v4380_v11 = vrot.slane %v4195_v40, 1  ;;  %v2423_v24 = vmul.f32 %v11045_v37, %v8617_v8 }
 0x252   : > { %v5048_v32 = vmin.f32 %v4986_v18, 6.0  ;;  %v4759_v43 = vrot.slane %v4574_v55, 2  ;;  %v1143_v58 = vmin.f32 %v1072_v10, 6.0  ;;  %v11286_v48 = vrot.slane %v8921_v12, 1 }
 0x253   : > { %v3243_v7 = vadd.f32 %v3181_v47, %v3115_v54  ;;  %v5049_v41 = vmin.f32 %v4987_v2, 6.0  ;;  %v2611_v30 = vrot.slane %v2423_v24, 1  ;;  %v2803_v53 = vmul.f32 %v11053_v22, %v8617_v8 }
 0x254   : > { %v4381_v25 = vsel %vm2487_vm5, %v11286_v48, %v4380_v11  ;;  %v11287_v59 = vrot.slane %v8929_v28, 2  ;;  %v11288_v47 = vunpack.i.l.bf16 %v11270_v42  ;;  %v3182_v54 = vmul.f32 %v11041_v15, %v8982_v46 }
 0x255   : > { %v3622_v5 = vadd.f32 %v3497_v21, %v3243_v7  ;;  %v9115_v3 = vadd.f32 %v4381_v25, %v8952_v29  ;;  %v5096_v40 = vpack.c.bf16 %v5049_v41, %v5048_v32  ;;  %v2612_v12 = vsel %vm2487_vm5, %v2609_v62, %v2611_v30 }
 0x256   : > { %v9120_v6 = vsel %vm2867_vm6, %v11287_v59, %v4759_v43  ;;  %v2225_v50 = vmul.f32 %v11288_v47, %v1143_v58  ;;  %v2991_v18 = vrot.slane %v2803_v53, 2  ;;  %v2736_v21 = vadd.f32 %v2612_v12, %v2294_v27 }
 0x257   : > { %v4001_v55 = vadd.f32 %v3876_v38, %v3622_v5  ;;  %v11289_v29 = vrot.slane %v8741_v26, 1  ;;  %v11290_v28 = vrot.slane %v8744_v61, 2  ;;  %6244 = vmatmul.mubr.msk.bf16.gmra.mxu1 %vm5136_vm7, %v5096_v40  ;;  %v2263_v26 = vmul.f32 %v11066_v17, %v11198_v51 }
 0x258   : > { %v2992_v42 = vsel %vm2867_vm6, %v2989_v36, %v2991_v18  ;;  %v4068_v62 = vmul.f32 %v6946_v34, %v2225_v50  ;;  %v4196_v24 = vmul.f32 %v6948_v35, %v2225_v50  ;;  %v4575_v32 = vmul.f32 %v8926_v19, %v2225_v50  ;;  %6247 = vmatprep.mubr.msk.bf16.mxu1 %vm6656_vm4, %v11030_v4 }
 0x259   : > { %v3499_v10 = vsel %vm2487_vm5, %v3496_v23, %v11289_v29  ;;  %v3878_v2 = vsel %vm2867_vm6, %v3875_v20, %v11290_v28  ;;  %v4129_v38 = vadd.f32 %v4067_v56, %v4001_v55  ;;  %v3116_v27 = vadd.f32 %v2992_v42, %v2736_v21 }
 0x25a   : > { %v2264_v61 = vmul.f32 %v11066_v17, %v11213_v52  ;;  %v4382_v20 = vrot.slane %v4196_v24, 1  ;;  %v4761_v23 = vrot.slane %v4575_v32, 2  ;;  %v2392_v36 = vmul.f32 %v11045_v37, %v11213_v52 }
 0x25b   : > { %v9148_v7 = vmul.f32 %v11045_v37, %v11215_v49  ;;  %v3244_v56 = vadd.f32 %v3182_v54, %v3116_v27  ;;  %v2772_v58 = vmul.f32 %v11053_v22, %v11213_v52  ;;  %v9154_v41 = vmul.f32 %v11053_v22, %v11215_v49 }
 0x25c   : > { %v3151_v51 = vmul.f32 %v11041_v15, %v11227_v63  ;;  %v4383_v48 = vsel %vm2487_vm5, %v4380_v11, %v4382_v20  ;;  %v11291_v25 = vrot.slane %v8994_v60, 1  ;;  %v9163_v53 = vsel %vm2867_vm6, %v4759_v43, %v4761_v23  ;;  %v11293_v60 = vld [vmem:[#allocation18_spill] sm:$0xff] }
 0x25d   : > { %v11292_v5 = vrot.slane %v8997_v57, 2  ;;  %v3623_v59 = vadd.f32 %v3499_v10, %v3244_v56  ;;  %v9170_v47 = vadd.f32 %v4383_v48, %v4129_v38  ;;  %v2549_v50 = vrot.slane %v2392_v36, 1 }
 0x25e   : > { %v4385_v30 = vsel %vm2487_vm5, %v4382_v20, %v11291_v25  ;;  %v2551_v40 = vrot.slane %v9148_v7, 1  ;;  %v2929_v12 = vrot.slane %v2772_v58, 2  ;;  %v2931_v11 = vrot.slane %v9154_v41, 2 }
 0x25f   : > { %v9168_v52 = vsel %vm2867_vm6, %v4761_v23, %v11292_v5  ;;  %v3152_v18 = vmul.f32 %v11041_v15, %v11293_v60  ;;  %v3280_v43 = vmul.f32 %v6940_v31, %v11293_v60  ;;  %v4002_v54 = vadd.f32 %v3878_v2, %v3623_v59  ;;  %v11297_v5 = vld [vmem:[#allocation36_spill] sm:$0xff] }
 0x260   : > { %v11294_v57 = vrot.slane %v8968_v16, 1  ;;  %v2552_v21 = vsel %vm2487_vm5, %v2549_v50, %v2551_v40  ;;  %v9184_v29 = vmul.f32 %v6940_v31, %v11249_v1  ;;  %v11295_v42 = vrot.slane %v8976_v9, 2 }
 0x261   : > { %v2706_v28 = vadd.f32 %v2552_v21, %v2264_v61  ;;  %v2932_v2 = vsel %vm2867_vm6, %v2929_v12, %v2931_v11  ;;  %v4130_v32 = vadd.f32 %v4068_v62, %v4002_v54  ;;  %v3436_v16 = vrot.slane %v3280_v43, 1 }
 0x262   : > { %v2550_v55 = vsel %vm2487_vm5, %v11294_v57, %v2549_v50  ;;  %v2930_v24 = vsel %vm2867_vm6, %v11295_v42, %v2929_v12  ;;  %v3438_v38 = vrot.slane %v9184_v29, 1  ;;  %v3659_v27 = vmul.f32 %v6944_v33, %v11293_v60  ;;  %v11299_v12 = vld [vmem:[#allocation38_spill] sm:$0xff] }
 0x263   : > { %v2705_v10 = vadd.f32 %v2550_v55, %v2263_v26  ;;  %v3086_v23 = vadd.f32 %v2932_v2, %v2706_v28  ;;  %v9197_v26 = vmul.f32 %v6944_v33, %v11249_v1  ;;  %v4037_v9 = vmul.f32 %v6946_v34, %v11276_v0 }
 0x264   : > { %v9201_v61 = vadd.f32 %v4385_v30, %v4130_v32  ;;  %v11296_v36 = vrot.slane %v9012_v45, 1  ;;  %v3439_v7 = vsel %vm2487_vm5, %v3436_v16, %v3438_v38  ;;  %v3815_v56 = vrot.slane %v3659_v27, 2  ;;  %v11300_v32 = vld [vmem:[#allocation28_spill] sm:$0xff] }
 0x265   : > { %v3085_v20 = vadd.f32 %v2930_v24, %v2705_v10  ;;  %v3214_v48 = vadd.f32 %v3152_v18, %v3086_v23  ;;  %v3817_v25 = vrot.slane %v9197_v26, 2  ;;  %v4038_v59 = vmul.f32 %v6946_v34, %v11297_v5 }
 0x266   : > { %v3437_v62 = vsel %vm2487_vm5, %v11296_v36, %v3436_v16  ;;  %v11298_v50 = vrot.slane %v9021_v39, 2  ;;  %v4166_v45 = vmul.f32 %v6948_v35, %v11297_v5  ;;  %v9219_v43 = vmul.f32 %v6948_v35, %v11299_v12  ;;  %v11302_v36 = vld [vmem:[#allocation7_spill] sm:$0xff] }
 0x267   : > { %v3213_v58 = vadd.f32 %v3151_v51, %v3085_v20  ;;  %v4545_v51 = vmul.f32 %v8926_v19, %v11297_v5  ;;  %v3593_v54 = vadd.f32 %v3439_v7, %v3214_v48  ;;  %v3818_v57 = vsel %vm2867_vm6, %v3815_v56, %v3817_v25 }
 0x268   : > { %v3816_v30 = vsel %vm2867_vm6, %v11298_v50, %v3815_v56  ;;  %v9228_v39 = vmul.f32 %v8926_v19, %v11299_v12  ;;  %v4322_v55 = vrot.slane %v4166_v45, 1  ;;  %v4324_v21 = vrot.slane %v9219_v43, 1 }
 0x269   : > { %v3592_v18 = vadd.f32 %v3437_v62, %v3213_v58  ;;  %v4701_v10 = vrot.slane %v4545_v51, 2  ;;  %v2265_v28 = vmul.f32 %v11066_v17, %v11215_v49  ;;  %v3972_v24 = vadd.f32 %v3818_v57, %v3593_v54  ;;  %v11304_v54 = vld [vmem:[#allocation5_spill] sm:$0xff] }
 0x26a   : > { %v4703_v2 = vrot.slane %v9228_v39, 2  ;;  %v2266_v16 = vmul.f32 %v11066_v17, %v11300_v32  ;;  %v11301_v27 = vrot.slane %v9038_v13, 1  ;;  %v4325_v23 = vsel %vm2487_vm5, %v4322_v55, %v4324_v21 }
 0x26b   : > { %v3971_v42 = vadd.f32 %v3816_v30, %v3592_v18  ;;  %v11303_v62 = vrot.slane %v11302_v36, 2  ;;  %v2394_v49 = vmul.f32 %v11045_v37, %v11300_v32  ;;  %v4100_v58 = vadd.f32 %v4038_v59, %v3972_v24 }
 0x26c   : > { %v4323_v20 = vsel %vm2487_vm5, %v11301_v27, %v4322_v55  ;;  %v4704_v48 = vsel %vm2867_vm6, %v4701_v10, %v4703_v2  ;;  %v9252_v13 = vmul.f32 %v11045_v37, %v11227_v63  ;;  %v2774_v30 = vmul.f32 %v11053_v22, %v11300_v32 }
 0x26d   : > { %v4702_v7 = vsel %vm2867_vm6, %v11303_v62, %v4701_v10  ;;  %v4099_v56 = vadd.f32 %v4037_v9, %v3971_v42  ;;  %v2553_v50 = vrot.slane %v2394_v49, 1  ;;  %v9258_v45 = vmul.f32 %v11053_v22, %v11227_v63 }
 0x26e   : > { %v3153_v9 = vmul.f32 %v11041_v15, %v11249_v1  ;;  %v4479_v51 = vadd.f32 %v4325_v23, %v4100_v58  ;;  %v2555_v18 = vrot.slane %v9252_v13, 1  ;;  %v3154_v57 = vmul.f32 %v11041_v15, %v11304_v54 }
 0x26f   : > { %v4478_v59 = vadd.f32 %v4323_v20, %v4099_v56  ;;  %v2554_v55 = vsel %vm2487_vm5, %v2551_v40, %v2553_v50  ;;  %v2933_v10 = vrot.slane %v2774_v30, 2  ;;  %v2935_v42 = vrot.slane %v9258_v45, 2 }
 0x270   : > { %v3282_v24 = vmul.f32 %v6940_v31, %v11304_v54  ;;  %v4858_v27 = vadd.f32 %v4704_v48, %v4479_v51  ;;  %v2556_v20 = vsel %vm2487_vm5, %v2553_v50, %v2555_v18  ;;  %v2707_v23 = vadd.f32 %v2554_v55, %v2265_v28 }
 0x271   : > { %v4857_v32 = vadd.f32 %v4702_v7, %v4478_v59  ;;  %v2708_v36 = vadd.f32 %v2556_v20, %v2266_v16  ;;  %v2934_v62 = vsel %vm2867_vm6, %v2931_v11, %v2933_v10  ;;  %v2936_v40 = vsel %vm2867_vm6, %v2933_v10, %v2935_v42 }
 0x272   : > { %v9280_v49 = vmul.f32 %v6940_v31, %v11276_v0  ;;  %v4927_v56 = vadd.f32 %v9089_v14, %v4858_v27  ;;  %v3087_v58 = vadd.f32 %v2934_v62, %v2707_v23  ;;  %v3440_v48 = vrot.slane %v3282_v24, 1 }
 0x273   : > { %v4926_v7 = vadd.f32 %v9089_v14, %v4857_v32  ;;  %v3088_v28 = vadd.f32 %v2936_v40, %v2708_v36  ;;  %v3661_v41 = vmul.f32 %v6944_v33, %v11304_v54  ;;  %v9289_v11 = vmul.f32 %v6944_v33, %v11276_v0 }
 0x274   : > { %v3442_v16 = vrot.slane %v9280_v49, 1  ;;  %v4989_v30 = vmax.f32 %v4927_v56, 0.0  ;;  %v3215_v59 = vadd.f32 %v3153_v9, %v3087_v58  ;;  %v3441_v51 = vsel %vm2487_vm5, %v3438_v38, %v3440_v48  ;;  %v11305_v9 = vld [vmem:[#allocation29_spill] sm:$0xff]  ;;  %v11306_v58 = vld [vmem:[#allocation6_spill] sm:$0xff] }
 0x275   : > { %v4988_v50 = vmax.f32 %v4926_v7, 0.0  ;;  %v3216_v55 = vadd.f32 %v3154_v57, %v3088_v28  ;;  %v3819_v24 = vrot.slane %v3661_v41, 2  ;;  %v3821_v32 = vrot.slane %v9289_v11, 2 }
 0x276   : > { %v3443_v10 = vsel %vm2487_vm5, %v3440_v48, %v3442_v16  ;;  %v5051_v20 = vmin.f32 %v4989_v30, 6.0  ;;  %v3594_v23 = vadd.f32 %v3441_v51, %v3215_v59  ;;  %v4039_v36 = vmul.f32 %v6946_v34, %v11299_v12 }
 0x277   : > { %v5050_v27 = vmin.f32 %v4988_v50, 6.0  ;;  %v3595_v62 = vadd.f32 %v3443_v10, %v3216_v55  ;;  %v3820_v29 = vsel %vm2867_vm6, %v3817_v25, %v3819_v24  ;;  %v3822_v38 = vsel %vm2867_vm6, %v3819_v24, %v3821_v32 }
 0x278   : > { %v4040_v57 = vmul.f32 %v6946_v34, %v11305_v9  ;;  %v3973_v7 = vadd.f32 %v3820_v29, %v3594_v23  ;;  %v4168_v56 = vmul.f32 %v6948_v35, %v11305_v9  ;;  %v9312_v48 = vmul.f32 %v6948_v35, %v11306_v58 }
 0x279   : > { %v5097_v40 = vpack.c.bf16 %v5051_v20, %v5050_v27  ;;  %v3974_v28 = vadd.f32 %v3822_v38, %v3595_v62  ;;  %v4547_v26 = vmul.f32 %v8926_v19, %v11305_v9  ;;  %v9318_v25 = vmul.f32 %v8926_v19, %v11306_v58 }
 0x27a   : > { %v2267_v41 = vmul.f32 %v11066_v17, %v11227_v63  ;;  %v4101_v50 = vadd.f32 %v4039_v36, %v3973_v7  ;;  %v4326_v30 = vrot.slane %v4168_v56, 1  ;;  %v4328_v59 = vrot.slane %v9312_v48, 1 }
 0x27b   : > { %6248 = vmatmul.mubr.msk.bf16.gmra.mxu1 %vm5136_vm7, %v5097_v40  ;;  %v2268_v51 = vmul.f32 %v11066_v17, %v11293_v60  ;;  %v4102_v55 = vadd.f32 %v4040_v57, %v3974_v28  ;;  %v4705_v10 = vrot.slane %v4547_v26, 2  ;;  %v4707_v24 = vrot.slane %v9318_v25, 2 }
 0x27c   : > { %6251 = vmatprep.mubr.msk.bf16.mxu1 %vm6656_vm4, %v11030_v4  ;;  %v2396_v27 = vmul.f32 %v11045_v37, %v11293_v60  ;;  %v4327_v63 = vsel %vm2487_vm5, %v4324_v21, %v4326_v30  ;;  %v4329_v20 = vsel %vm2487_vm5, %v4326_v30, %v4328_v59  ;;  %v9339_v23 = vmul.f32 %v11045_v37, %v11249_v1 }
 0x27d   : > { %v2776_v36 = vmul.f32 %v11053_v22, %v11293_v60  ;;  %v4480_v62 = vadd.f32 %v4327_v63, %v4101_v50  ;;  %v4481_v29 = vadd.f32 %v4329_v20, %v4102_v55  ;;  %v4706_v38 = vsel %vm2867_vm6, %v4703_v2, %v4705_v10 }
 0x27e   : > { %v4708_v43 = vsel %vm2867_vm6, %v4705_v10, %v4707_v24  ;;  %v2557_v21 = vrot.slane %v2396_v27, 1  ;;  %v2559_v57 = vrot.slane %v9339_v23, 1  ;;  %v9352_v40 = vmul.f32 %v11053_v22, %v11249_v1 }
 0x27f   : > { %v2937_v7 = vrot.slane %v2776_v36, 2  ;;  %v4859_v56 = vadd.f32 %v4706_v38, %v4480_v62  ;;  %v4860_v60 = vadd.f32 %v4708_v43, %v4481_v29  ;;  %v3155_v28 = vmul.f32 %v11041_v15, %v11276_v0 }
 0x280   : > { %v3156_v39 = vmul.f32 %v11041_v15, %v11297_v5  ;;  %v2558_v2 = vsel %vm2487_vm5, %v2555_v18, %v2557_v21  ;;  %v2560_v26 = vsel %vm2487_vm5, %v2557_v21, %v2559_v57  ;;  %v2939_v30 = vrot.slane %v9352_v40, 2 }
 0x281   : > { %v2938_v50 = vsel %vm2867_vm6, %v2935_v42, %v2937_v7  ;;  %v4928_v55 = vadd.f32 %v9089_v14, %v4859_v56  ;;  %v4929_v10 = vadd.f32 %v9089_v14, %v4860_v60  ;;  %v2709_v27 = vadd.f32 %v2558_v2, %v2267_v41 }
 0x282   : > { %v2710_v63 = vadd.f32 %v2560_v26, %v2268_v51  ;;  %v2940_v13 = vsel %vm2867_vm6, %v2937_v7, %v2939_v30  ;;  %v3284_v18 = vmul.f32 %v6940_v31, %v11297_v5  ;;  %v9377_v45 = vmul.f32 %v6940_v31, %v11299_v12 }
 0x283   : > { %v3663_v42 = vmul.f32 %v6944_v33, %v11297_v5  ;;  %v4990_v20 = vmax.f32 %v4928_v55, 0.0  ;;  %v4991_v36 = vmax.f32 %v4929_v10, 0.0  ;;  %v3089_v62 = vadd.f32 %v2938_v50, %v2709_v27 }
 0x284   : > { %v3090_v29 = vadd.f32 %v2940_v13, %v2710_v63  ;;  %v3444_v41 = vrot.slane %v3284_v18, 1  ;;  %v3446_v51 = vrot.slane %v9377_v45, 1  ;;  %v9384_v38 = vmul.f32 %v6944_v33, %v11299_v12  ;;  %v11308_v13 = vld [vmem:[#allocation19_spill] sm:$0xff] }
 0x285   : > { %v3823_v43 = vrot.slane %v3663_v42, 2  ;;  %v5052_v21 = vmin.f32 %v4990_v20, 6.0  ;;  %v5053_v7 = vmin.f32 %v4991_v36, 6.0  ;;  %v3217_v56 = vadd.f32 %v3155_v28, %v3089_v62 }
 0x286   : > { %v3218_v60 = vadd.f32 %v3156_v39, %v3090_v29  ;;  %v3445_v2 = vsel %vm2487_vm5, %v3442_v16, %v3444_v41  ;;  %v3447_v26 = vsel %vm2487_vm5, %v3444_v41, %v3446_v51  ;;  %v3825_v55 = vrot.slane %v9384_v38, 2  ;;  %v11307_v16 = vld [vmem:[#allocation4_spill] sm:$0xff] }
 0x287   : > { %v3824_v50 = vsel %vm2867_vm6, %v3821_v32, %v3823_v43  ;;  %v5098_v10 = vpack.c.bf16 %v5053_v7, %v5052_v21  ;;  %v3596_v27 = vadd.f32 %v3445_v2, %v3217_v56  ;;  %v4041_v28 = vmul.f32 %v6946_v34, %v11306_v58 }
 0x288   : > { %v3597_v63 = vadd.f32 %v3447_v26, %v3218_v60  ;;  %v3826_v49 = vsel %vm2867_vm6, %v3823_v43, %v3825_v55  ;;  %v4042_v39 = vmul.f32 %v6946_v34, %v11307_v16  ;;  %v4170_v11 = vmul.f32 %v6948_v35, %v11307_v16 }
 0x289   : > { %v9407_v32 = vmul.f32 %v6948_v35, %v11308_v13  ;;  %6252 = vmatmul.mubr.msk.bf16.gmra.mxu1 %vm5136_vm7, %v5098_v10  ;;  %v3975_v18 = vadd.f32 %v3824_v50, %v3596_v27  ;;  %v4549_v20 = vmul.f32 %v8926_v19, %v11307_v16  ;;  %v9414_v36 = vmul.f32 %v8926_v19, %v11308_v13 }
 0x28a   : > { %v3976_v42 = vadd.f32 %v3826_v49, %v3597_v63  ;;  %6255 = vmatprep.mubr.msk.bf16.mxu1 %vm6656_vm4, %v11030_v4  ;;  %v4330_v62 = vrot.slane %v4170_v11, 1  ;;  %v2269_v41 = vmul.f32 %v11066_v17, %v11249_v1  ;;  %v2270_v43 = vmul.f32 %v11066_v17, %v11304_v54 }
 0x28b   : > { %v4332_v29 = vrot.slane %v9407_v32, 1  ;;  %v4103_v21 = vadd.f32 %v4041_v28, %v3975_v18  ;;  %v4709_v56 = vrot.slane %v4549_v20, 2  ;;  %v4711_v60 = vrot.slane %v9414_v36, 2 }
 0x28c   : > { %v4104_v7 = vadd.f32 %v4042_v39, %v3976_v42  ;;  %v4331_v2 = vsel %vm2487_vm5, %v4328_v59, %v4330_v62  ;;  %v2398_v50 = vmul.f32 %v11045_v37, %v11304_v54  ;;  %v9434_v1 = vmul.f32 %v11045_v37, %v11276_v0 }
 0x28d   : > { %v4333_v26 = vsel %vm2487_vm5, %v4330_v62, %v4332_v29  ;;  %v4482_v10 = vadd.f32 %v4331_v2, %v4103_v21  ;;  %v4710_v63 = vsel %vm2867_vm6, %v4707_v24, %v4709_v56  ;;  %v4712_v48 = vsel %vm2867_vm6, %v4709_v56, %v4711_v60 }
 0x28e   : > { %v4483_v27 = vadd.f32 %v4333_v26, %v4104_v7  ;;  %v2561_v59 = vrot.slane %v2398_v50, 1  ;;  %v2563_v28 = vrot.slane %v9434_v1, 1  ;;  %v2778_v49 = vmul.f32 %v11053_v22, %v11304_v54 }
 0x28f   : > { %v9447_v39 = vmul.f32 %v11053_v22, %v11276_v0  ;;  %v4861_v11 = vadd.f32 %v4710_v63, %v4482_v10  ;;  %v3157_v25 = vmul.f32 %v11041_v15, %v11299_v12  ;;  %v3158_v24 = vmul.f32 %v11041_v15, %v11305_v9 }
 0x290   : > { %v4862_v18 = vadd.f32 %v4712_v48, %v4483_v27  ;;  %v2562_v42 = vsel %vm2487_vm5, %v2559_v57, %v2561_v59  ;;  %v2564_v54 = vsel %vm2487_vm5, %v2561_v59, %v2563_v28  ;;  %v2941_v20 = vrot.slane %v2778_v49, 2 }
 0x291   : > { %v2943_v62 = vrot.slane %v9447_v39, 2  ;;  %v4930_v21 = vadd.f32 %v9089_v14, %v4861_v11  ;;  %v2711_v56 = vadd.f32 %v2562_v42, %v2269_v41  ;;  %v2712_v2 = vadd.f32 %v2564_v54, %v2270_v43 }
 0x292   : > { %v4931_v7 = vadd.f32 %v9089_v14, %v4862_v18  ;;  %v2942_v26 = vsel %vm2867_vm6, %v2939_v30, %v2941_v20  ;;  %v3286_v57 = vmul.f32 %v6940_v31, %v11305_v9  ;;  %v9472_v50 = vmul.f32 %v6940_v31, %v11306_v58 }
 0x293   : > { %v2944_v23 = vsel %vm2867_vm6, %v2941_v20, %v2943_v62  ;;  %v4992_v10 = vmax.f32 %v4930_v21, 0.0  ;;  %v3091_v63 = vadd.f32 %v2942_v26, %v2711_v56  ;;  %v3665_v30 = vmul.f32 %v6944_v33, %v11305_v9 }
 0x294   : > { %v4993_v27 = vmax.f32 %v4931_v7, 0.0  ;;  %v3092_v41 = vadd.f32 %v2944_v23, %v2712_v2  ;;  %v3448_v43 = vrot.slane %v3286_v57, 1  ;;  %v3450_v40 = vrot.slane %v9472_v50, 1 }
 0x295   : > { %v9479_v48 = vmul.f32 %v6944_v33, %v11306_v58  ;;  %v5054_v59 = vmin.f32 %v4992_v10, 6.0  ;;  %v3219_v11 = vadd.f32 %v3157_v25, %v3091_v63  ;;  %v3827_v20 = vrot.slane %v3665_v30, 2 }
 0x296   : > { %v5055_v49 = vmin.f32 %v4993_v27, 6.0  ;;  %v3220_v18 = vadd.f32 %v3158_v24, %v3092_v41  ;;  %v3449_v42 = vsel %vm2487_vm5, %v3446_v51, %v3448_v43  ;;  %v3451_v54 = vsel %vm2487_vm5, %v3448_v43, %v3450_v40  ;;  %v11309_v51 = vld [vmem:[#allocation39_spill] sm:$0xff]  ;;  %v11310_v27 = vld [vmem:[#allocation33_spill] sm:$0xff] }
 0x297   : > { %v3829_v21 = vrot.slane %v9479_v48, 2  ;;  %v3598_v56 = vadd.f32 %v3449_v42, %v3219_v11  ;;  %v4043_v26 = vmul.f32 %v6946_v34, %v11308_v13  ;;  %v3828_v25 = vsel %vm2867_vm6, %v3825_v55, %v3827_v20 }
 0x298   : > { %v5099_v7 = vpack.c.bf16 %v5055_v49, %v5054_v59  ;;  %v3599_v2 = vadd.f32 %v3451_v54, %v3220_v18  ;;  %v4044_v24 = vmul.f32 %v6946_v34, %v11309_v51  ;;  %v4172_v23 = vmul.f32 %v6948_v35, %v11309_v51 }
 0x299   : > { %v3830_v45 = vsel %vm2867_vm6, %v3827_v20, %v3829_v21  ;;  %v3977_v57 = vadd.f32 %v3828_v25, %v3598_v56  ;;  %v9503_v63 = vmul.f32 %v6948_v35, %v11310_v27  ;;  %v4551_v38 = vmul.f32 %v8926_v19, %v11309_v51 }
 0x29a   : > { %6256 = vmatmul.mubr.msk.bf16.gmra.mxu1 %vm5136_vm7, %v5099_v7  ;;  %v3978_v10 = vadd.f32 %v3830_v45, %v3599_v2  ;;  %v4334_v55 = vrot.slane %v4172_v23, 1  ;;  %v9511_v41 = vmul.f32 %v8926_v19, %v11310_v27  ;;  %v2271_v43 = vmul.f32 %v11066_v17, %v11276_v0 }
 0x29b   : > { %6259 = vmatprep.mubr.msk.bf16.mxu1 %vm6656_vm4, %v11030_v4  ;;  %v2272_v30 = vmul.f32 %v11066_v17, %v11297_v5  ;;  %v4105_v59 = vadd.f32 %v4043_v26, %v3977_v57  ;;  %v4336_v11 = vrot.slane %v9503_v63, 1  ;;  %v4713_v18 = vrot.slane %v4551_v38, 2 }
 0x29c   : > { %v4106_v49 = vadd.f32 %v4044_v24, %v3978_v10  ;;  %v4335_v42 = vsel %vm2487_vm5, %v4332_v29, %v4334_v55  ;;  %v4715_v54 = vrot.slane %v9511_v41, 2  ;;  %v2400_v20 = vmul.f32 %v11045_v37, %v11297_v5 }
 0x29d   : > { %v9526_v0 = vmul.f32 %v11045_v37, %v11299_v12  ;;  %v4337_v7 = vsel %vm2487_vm5, %v4334_v55, %v4336_v11  ;;  %v4484_v56 = vadd.f32 %v4335_v42, %v4105_v59  ;;  %v4714_v32 = vsel %vm2867_vm6, %v4711_v60, %v4713_v18 }
 0x29e   : > { %v2780_v29 = vmul.f32 %v11053_v22, %v11297_v5  ;;  %v4485_v2 = vadd.f32 %v4337_v7, %v4106_v49  ;;  %v4716_v26 = vsel %vm2867_vm6, %v4713_v18, %v4715_v54  ;;  %v2565_v25 = vrot.slane %v2400_v20, 1 }
 0x29f   : > { %v2567_v45 = vrot.slane %v9526_v0, 1  ;;  %v4863_v24 = vadd.f32 %v4714_v32, %v4484_v56  ;;  %v9542_v23 = vmul.f32 %v11053_v22, %v11299_v12  ;;  %v3159_v36 = vmul.f32 %v11041_v15, %v11306_v58 }
 0x2a0   : > { %v2945_v57 = vrot.slane %v2780_v29, 2  ;;  %v4864_v60 = vadd.f32 %v4716_v26, %v4485_v2  ;;  %v2566_v5 = vsel %vm2487_vm5, %v2563_v28, %v2565_v25  ;;  %v3160_v38 = vmul.f32 %v11041_v15, %v11307_v16 }
 0x2a1   : > { %v2568_v10 = vsel %vm2487_vm5, %v2565_v25, %v2567_v45  ;;  %v4932_v55 = vadd.f32 %v9089_v14, %v4863_v24  ;;  %v2713_v59 = vadd.f32 %v2566_v5, %v2271_v43  ;;  %v2947_v1 = vrot.slane %v9542_v23, 2 }
 0x2a2   : > { %v2714_v49 = vadd.f32 %v2568_v10, %v2272_v30  ;;  %v2946_v18 = vsel %vm2867_vm6, %v2943_v62, %v2945_v57  ;;  %v4933_v42 = vadd.f32 %v9089_v14, %v4864_v60  ;;  %v3288_v28 = vmul.f32 %v6940_v31, %v11307_v16 }
 0x2a3   : > { %v9564_v20 = vmul.f32 %v6940_v31, %v11308_v13  ;;  %v4994_v7 = vmax.f32 %v4932_v55, 0.0  ;;  %v3093_v56 = vadd.f32 %v2946_v18, %v2713_v59  ;;  %v3667_v43 = vmul.f32 %v6944_v33, %v11307_v16 }
 0x2a4   : > { %v9570_v39 = vmul.f32 %v6944_v33, %v11308_v13  ;;  %v4995_v62 = vmax.f32 %v4933_v42, 0.0  ;;  %v2948_v30 = vsel %vm2867_vm6, %v2945_v57, %v2947_v1  ;;  %v3452_v32 = vrot.slane %v3288_v28, 1 }
 0x2a5   : > { %v3454_v29 = vrot.slane %v9564_v20, 1  ;;  %v5056_v2 = vmin.f32 %v4994_v7, 6.0  ;;  %v3094_v26 = vadd.f32 %v2948_v30, %v2714_v49  ;;  %v3221_v25 = vadd.f32 %v3159_v36, %v3093_v56  ;;  %v11312_v56 = vld [vmem:[#allocation34_spill] sm:$0xff] }
 0x2a6   : > { %v3831_v24 = vrot.slane %v3667_v43, 2  ;;  %v5057_v60 = vmin.f32 %v4995_v62, 6.0  ;;  %v3453_v5 = vsel %vm2487_vm5, %v3450_v40, %v3452_v32  ;;  %v3833_v55 = vrot.slane %v9570_v39, 2  ;;  %v11311_v40 = vld [vmem:[#allocation30_spill] sm:$0xff] }
 0x2a7   : > { %v3455_v10 = vsel %vm2487_vm5, %v3452_v32, %v3454_v29  ;;  %v3222_v59 = vadd.f32 %v3160_v38, %v3094_v26  ;;  %v3600_v57 = vadd.f32 %v3453_v5, %v3221_v25  ;;  %v4045_v36 = vmul.f32 %v6946_v34, %v11310_v27 }
 0x2a8   : > { %v3832_v18 = vsel %vm2867_vm6, %v3829_v21, %v3831_v24  ;;  %v5100_v49 = vpack.c.bf16 %v5057_v60, %v5056_v2  ;;  %v3834_v50 = vsel %vm2867_vm6, %v3831_v24, %v3833_v55  ;;  %v4046_v42 = vmul.f32 %v6946_v34, %v11311_v40 }
 0x2a9   : > { %v4174_v28 = vmul.f32 %v6948_v35, %v11311_v40  ;;  %v3601_v38 = vadd.f32 %v3455_v10, %v3222_v59  ;;  %v3979_v7 = vadd.f32 %v3832_v18, %v3600_v57  ;;  %v9597_v48 = vmul.f32 %v6948_v35, %v11312_v56 }
 0x2aa   : > { %v4553_v21 = vmul.f32 %v8926_v19, %v11311_v40  ;;  %6260 = vmatmul.mubr.msk.bf16.gmra.mxu1 %vm5136_vm7, %v5100_v49  ;;  %v9604_v62 = vmul.f32 %v8926_v19, %v11312_v56  ;;  %v2273_v30 = vmul.f32 %v11066_v17, %v11299_v12  ;;  %v2274_v32 = vmul.f32 %v11066_v17, %v11305_v9 }
 0x2ab   : > { %v4338_v43 = vrot.slane %v4174_v28, 1  ;;  %6263 = vmatprep.mubr.msk.bf16.mxu1 %vm6656_vm4, %v11030_v4  ;;  %v3980_v2 = vadd.f32 %v3834_v50, %v3601_v38  ;;  %v4107_v26 = vadd.f32 %v4045_v36, %v3979_v7  ;;  %v4340_v25 = vrot.slane %v9597_v48, 1 }
 0x2ac   : > { %v4717_v24 = vrot.slane %v4553_v21, 2  ;;  %v4719_v19 = vrot.slane %v9604_v62, 2  ;;  %v2402_v12 = vmul.f32 %v11045_v37, %v11305_v9  ;;  %v9621_v5 = vmul.f32 %v11045_v37, %v11306_v58 }
 0x2ad   : > { %v4339_v60 = vsel %vm2487_vm5, %v4336_v11, %v4338_v43  ;;  %v4108_v10 = vadd.f32 %v4046_v42, %v3980_v2  ;;  %v4341_v59 = vsel %vm2487_vm5, %v4338_v43, %v4340_v25  ;;  %v9629_v11 = vpop.f32.mrf.mxu0  ;;  %v2782_v50 = vmul.f32 %v11053_v22, %v11305_v9 }
 0x2ae   : > { %v4486_v57 = vadd.f32 %v4339_v60, %v4107_v26  ;;  %v4718_v63 = vsel %vm2867_vm6, %v4715_v54, %v4717_v24  ;;  %v4720_v18 = vsel %vm2867_vm6, %v4717_v24, %v4719_v19  ;;  %v2569_v36 = vrot.slane %v2402_v12, 1 }
 0x2af   : > { %v2571_v49 = vrot.slane %v9621_v5, 1  ;;  %v4487_v42 = vadd.f32 %v4341_v59, %v4108_v10  ;;  %v9639_v38 = vmul.f32 %v11053_v22, %v11306_v58  ;;  %v3161_v41 = vmul.f32 %v11041_v15, %v11308_v13  ;;  %v6189_v54 = vpop.f32.mrf.mxu0 }
 0x2b0   : > { %v4865_v28 = vadd.f32 %v4718_v63, %v4486_v57  ;;  %v2570_v7 = vsel %vm2487_vm5, %v2567_v45, %v2569_v36  ;;  %v2949_v43 = vrot.slane %v2782_v50, 2  ;;  %v3162_v9 = vmul.f32 %v11041_v15, %v11309_v51 }
 0x2b1   : > { %v2572_v21 = vsel %vm2487_vm5, %v2569_v36, %v2571_v49  ;;  %v4866_v2 = vadd.f32 %v4720_v18, %v4487_v42  ;;  %v2715_v24 = vadd.f32 %v2570_v7, %v2273_v30  ;;  %v2951_v0 = vrot.slane %v9639_v38, 2 }
 0x2b2   : > { %v4934_v26 = vadd.f32 %v9089_v14, %v4865_v28  ;;  %v2716_v60 = vadd.f32 %v2572_v21, %v2274_v32  ;;  %v2950_v12 = vsel %vm2867_vm6, %v2947_v1, %v2949_v43  ;;  %v3290_v45 = vmul.f32 %v6940_v31, %v11309_v51 }
 0x2b3   : > { %v9660_v10 = vmul.f32 %v6940_v31, %v11310_v27  ;;  %v4935_v59 = vadd.f32 %v9089_v14, %v4866_v2  ;;  %v3095_v63 = vadd.f32 %v2950_v12, %v2715_v24  ;;  %v3669_v30 = vmul.f32 %v6944_v33, %v11309_v51 }
 0x2b4   : > { %v4996_v57 = vmax.f32 %v4934_v26, 0.0  ;;  %v2952_v23 = vsel %vm2867_vm6, %v2949_v43, %v2951_v0  ;;  %v3456_v1 = vrot.slane %v3290_v45, 1  ;;  %v9671_v18 = vmul.f32 %v6944_v33, %v11310_v27 }
 0x2b5   : > { %v3458_v32 = vrot.slane %v9660_v10, 1  ;;  %v4997_v36 = vmax.f32 %v4935_v59, 0.0  ;;  %v3096_v42 = vadd.f32 %v2952_v23, %v2716_v60  ;;  %v3223_v28 = vadd.f32 %v3161_v41, %v3095_v63  ;;  %v11314_v63 = vld [vmem:[#allocation51_spill] sm:$0xff] }
 0x2b6   : > { %v5058_v50 = vmin.f32 %v4996_v57, 6.0  ;;  %v3457_v54 = vsel %vm2487_vm5, %v3454_v29, %v3456_v1  ;;  %v3835_v21 = vrot.slane %v3669_v30, 2  ;;  %v3837_v43 = vrot.slane %v9671_v18, 2  ;;  %v11313_v29 = vld [vmem:[#allocation48_spill] sm:$0xff] }
 0x2b7   : > { %v3459_v7 = vsel %vm2487_vm5, %v3456_v1, %v3458_v32  ;;  %v5059_v2 = vmin.f32 %v4997_v36, 6.0  ;;  %v3224_v26 = vadd.f32 %v3162_v9, %v3096_v42  ;;  %v3602_v24 = vadd.f32 %v3457_v54, %v3223_v28 }
 0x2b8   : > { %v4047_v12 = vmul.f32 %v6946_v34, %v11312_v56  ;;  %v3836_v41 = vsel %vm2867_vm6, %v3833_v55, %v3835_v21  ;;  %v3838_v20 = vsel %vm2867_vm6, %v3835_v21, %v3837_v43  ;;  %v4048_v60 = vmul.f32 %v6946_v34, %v11313_v29  ;;  %v9699_v55 = vld [vmem:[%s10734_s3 + $0x8] ss:$0 sm:$0xff] }
 0x2b9   : > { %v4176_v45 = vmul.f32 %v6948_v35, %v11313_v29  ;;  %v5101_v59 = vpack.c.bf16 %v5059_v2, %v5058_v50  ;;  %v3603_v9 = vadd.f32 %v3459_v7, %v3224_v26  ;;  %v3981_v57 = vadd.f32 %v3836_v41, %v3602_v24 }
 0x2ba   : > { %v9694_v30 = vmul.f32 %v6948_v35, %v11314_v63  ;;  %v4555_v23 = vmul.f32 %v9699_v55, %v11313_v29  ;;  %v9705_v1 = vmul.f32 %v9699_v55, %v11314_v63  ;;  %v2275_v36 = vmul.f32 %v11066_v17, %v11306_v58 }
 0x2bb   : > { %v4342_v39 = vrot.slane %v4176_v45, 1  ;;  %6264 = vmatmul.mubr.msk.bf16.gmra.mxu1 %vm5136_vm7, %v5101_v59  ;;  %v3982_v50 = vadd.f32 %v3838_v20, %v3603_v9  ;;  %v4109_v42 = vadd.f32 %v4047_v12, %v3981_v57  ;;  %v2276_v54 = vmul.f32 %v11066_v17, %v11307_v16  ;;  %v9736_v45 = vpop.f32.mrf.mxu0 }
 0x2bc   : > { %v4344_v28 = vrot.slane %v9694_v30, 1  ;;  %6267 = vmatprep.mubr.msk.bf16.mxu1 %vm6656_vm4, %v11030_v4  ;;  %v4721_v21 = vrot.slane %v4555_v23, 2  ;;  %v4723_v2 = vrot.slane %v9705_v1, 2  ;;  %v2404_v58 = vmul.f32 %v11045_v37, %v11307_v16 }
 0x2bd   : > { %v4343_v7 = vsel %vm2487_vm5, %v4340_v25, %v4342_v39  ;;  %v4110_v26 = vadd.f32 %v4048_v60, %v3982_v50  ;;  %v9726_v41 = vmul.f32 %v11045_v37, %v11308_v13  ;;  %v2784_v60 = vmul.f32 %v11053_v22, %v11307_v16  ;;  %v6190_v50 = vpop.f32.mrf.mxu0 }
 0x2be   : > { %v4345_v24 = vsel %vm2487_vm5, %v4342_v39, %v4344_v28  ;;  %v4488_v12 = vadd.f32 %v4343_v7, %v4109_v42  ;;  %v4722_v48 = vsel %vm2867_vm6, %v4719_v19, %v4721_v21  ;;  %v4724_v25 = vsel %vm2867_vm6, %v4721_v21, %v4723_v2 }
 0x2bf   : > { %v2573_v20 = vrot.slane %v2404_v58, 1  ;;  %v4489_v59 = vadd.f32 %v4345_v24, %v4110_v26  ;;  %v2575_v57 = vrot.slane %v9726_v41, 1  ;;  %v9741_v39 = vmul.f32 %v11053_v22, %v11308_v13 }
 0x2c0   : > { %v4867_v9 = vadd.f32 %v4722_v48, %v4488_v12  ;;  %v2953_v19 = vrot.slane %v2784_v60, 2  ;;  %v3163_v23 = vmul.f32 %v11041_v15, %v11310_v27  ;;  %v3164_v16 = vmul.f32 %v11041_v15, %v11311_v40  ;;  %v5272_v12 = vpop.f32.mrf.mxu0 }
 0x2c1   : > { %v2574_v62 = vsel %vm2487_vm5, %v2571_v49, %v2573_v20  ;;  %v4868_v42 = vadd.f32 %v4724_v25, %v4489_v59  ;;  %v2576_v21 = vsel %vm2487_vm5, %v2573_v20, %v2575_v57  ;;  %v2955_v49 = vrot.slane %v9741_v39, 2 }
 0x2c2   : > { %v4936_v7 = vadd.f32 %v9089_v14, %v4867_v9  ;;  %v2717_v58 = vadd.f32 %v2574_v62, %v2275_v36  ;;  %v2718_v26 = vadd.f32 %v2576_v21, %v2276_v54  ;;  %v2954_v5 = vsel %vm2867_vm6, %v2951_v0, %v2953_v19  ;;  %v6193_v20 = vpop.f32.mrf.mxu0 }
 0x2c3   : > { %v3292_v24 = vmul.f32 %v6940_v31, %v11311_v40  ;;  %v4937_v48 = vadd.f32 %v9089_v14, %v4868_v42  ;;  %v9763_v59 = vmul.f32 %v6940_v31, %v11312_v56  ;;  %v2956_v38 = vsel %vm2867_vm6, %v2953_v19, %v2955_v49 }
 0x2c4   : > { %v4998_v25 = vmax.f32 %v4936_v7, 0.0  ;;  %v3097_v60 = vadd.f32 %v2954_v5, %v2717_v58  ;;  %v3671_v0 = vmul.f32 %v6944_v33, %v11311_v40  ;;  %v9772_v54 = vmul.f32 %v6944_v33, %v11312_v56  ;;  %v5274_v58 = vpop.f32.mrf.mxu0 }
 0x2c5   : > { %v3460_v36 = vrot.slane %v3292_v24, 1  ;;  %v4999_v14 = vmax.f32 %v4937_v48, 0.0  ;;  %v3098_v62 = vadd.f32 %v2956_v38, %v2718_v26  ;;  %v3462_v7 = vrot.slane %v9763_v59, 1  ;;  %v11315_v26 = vld [vmem:[#allocation47_spill] sm:$0xff]  ;;  %v9891_v59 = vpop.f32.mrf.mxu1 }
 0x2c6   : > { %v5060_v9 = vmin.f32 %v4998_v25, 6.0  ;;  %v3225_v50 = vadd.f32 %v3163_v23, %v3097_v60  ;;  %v3839_v19 = vrot.slane %v3671_v0, 2  ;;  %v3841_v21 = vrot.slane %v9772_v54, 2 }
 0x2c7   : > { %v3461_v42 = vsel %vm2487_vm5, %v3458_v32, %v3460_v36  ;;  %v5061_v5 = vmin.f32 %v4999_v14, 6.0  ;;  %v3226_v24 = vadd.f32 %v3164_v16, %v3098_v62  ;;  %v4049_v20 = vmul.f32 %v6946_v34, %v11314_v63  ;;  %v6194_v16 = vpop.f32.mrf.mxu0  ;;  %v11316_v14 = vld [vmem:[#allocation10_spill] sm:$0xff] }
 0x2c8   : > { %v3604_v12 = vadd.f32 %v3461_v42, %v3225_v50  ;;  %v3463_v23 = vsel %vm2487_vm5, %v3460_v36, %v3462_v7  ;;  %v3840_v10 = vsel %vm2867_vm6, %v3837_v43, %v3839_v19  ;;  %v3842_v32 = vsel %vm2867_vm6, %v3839_v19, %v3841_v21 }
 0x2c9   : > { %v4050_v48 = vmul.f32 %v6946_v34, %v11315_v26  ;;  %v5102_v25 = vpack.c.bf16 %v5061_v5, %v5060_v9  ;;  %v3605_v60 = vadd.f32 %v3463_v23, %v3226_v24  ;;  %v4178_v0 = vmul.f32 %v6948_v35, %v11315_v26 }
 0x2ca   : > { %v3983_v38 = vadd.f32 %v3840_v10, %v3604_v12  ;;  %v9796_v36 = vmul.f32 %v6948_v35, %v11316_v14  ;;  %v4557_v18 = vmul.f32 %v9699_v55, %v11315_v26  ;;  %v9802_v43 = vmul.f32 %v9699_v55, %v11316_v14 }
 0x2cb   : > { %v2277_v62 = vmul.f32 %v11066_v17, %v11308_v13  ;;  %6268 = vmatmul.mubr.msk.bf16.gmra.mxu1 %vm5136_vm7, %v5102_v25  ;;  %v3984_v9 = vadd.f32 %v3842_v32, %v3605_v60  ;;  %v4346_v42 = vrot.slane %v4178_v0, 1  ;;  %v2278_v19 = vmul.f32 %v11066_v17, %v11309_v51 }
 0x2cc   : > { %v4111_v50 = vadd.f32 %v4049_v20, %v3983_v38  ;;  %6271 = vmatprep.mubr.msk.bf16.mxu1 %vm6656_vm4, %v11030_v4  ;;  %v4348_v58 = vrot.slane %v9796_v36, 1  ;;  %v4725_v5 = vrot.slane %v4557_v18, 2  ;;  %v4727_v24 = vrot.slane %v9802_v43, 2 }
 0x2cd   : > { %v2406_v12 = vmul.f32 %v11045_v37, %v11309_v51  ;;  %v4112_v13 = vadd.f32 %v4050_v48, %v3984_v9  ;;  %v4347_v20 = vsel %vm2487_vm5, %v4344_v28, %v4346_v42  ;;  %v9820_v23 = vmul.f32 %v11045_v37, %v11310_v27 }
 0x2ce   : > { %v2786_v10 = vmul.f32 %v11053_v22, %v11309_v51  ;;  %v4349_v32 = vsel %vm2487_vm5, %v4346_v42, %v4348_v58  ;;  %v4490_v16 = vadd.f32 %v4347_v20, %v4111_v50  ;;  %v4726_v48 = vsel %vm2867_vm6, %v4723_v2, %v4725_v5  ;;  %v9842_v2 = vpop.f32.mrf.mxu0 }
 0x2cf   : > { %v4728_v30 = vsel %vm2867_vm6, %v4725_v5, %v4727_v24  ;;  %v4491_v28 = vadd.f32 %v4349_v32, %v4112_v13  ;;  %v2577_v25 = vrot.slane %v2406_v12, 1  ;;  %v2579_v60 = vrot.slane %v9820_v23, 1  ;;  %v9854_v12 = vld [vmem:[%s10735_s4] ss:$0 sm:$0xff] }
 0x2d0   : > { %v9836_v51 = vmul.f32 %v11053_v22, %v11310_v27  ;;  %v4869_v38 = vadd.f32 %v4726_v48, %v4490_v16  ;;  %v2957_v0 = vrot.slane %v2786_v10, 2  ;;  %v3165_v18 = vmul.f32 %v11041_v15, %v11312_v56 }
 0x2d1   : > { %v3166_v1 = vmul.f32 %v11041_v15, %v11313_v29  ;;  %v4870_v9 = vadd.f32 %v4728_v30, %v4491_v28  ;;  %v2578_v50 = vsel %vm2487_vm5, %v2575_v57, %v2577_v25  ;;  %v2580_v42 = vsel %vm2487_vm5, %v2577_v25, %v2579_v60  ;;  %v6197_v57 = vpop.f32.mrf.mxu0 }
 0x2d2   : > { %v10927_v5 = vrot.slane %v9836_v51, 2  ;;  %v4938_v13 = vadd.f32 %v9854_v12, %v4869_v38  ;;  %v2719_v20 = vadd.f32 %v2578_v50, %v2277_v62  ;;  %v2720_v10 = vadd.f32 %v2580_v42, %v2278_v19 }
 0x2d3   : > { %v2958_v41 = vsel %vm2867_vm6, %v2955_v49, %v2957_v0  ;;  %v4939_v32 = vadd.f32 %v9854_v12, %v4870_v9  ;;  %v3294_v48 = vmul.f32 %v6940_v31, %v11313_v29  ;;  %v9868_v30 = vmul.f32 %v6940_v31, %v11314_v63 }
 0x2d4   : > { %v2960_v16 = vsel %vm2867_vm6, %v2957_v0, %v10927_v5  ;;  %v5000_v62 = vmax.f32 %v4938_v13, 0.0  ;;  %v3099_v19 = vadd.f32 %v2958_v41, %v2719_v20  ;;  %v3673_v39 = vmul.f32 %v6944_v33, %v11313_v29  ;;  %v9884_v41 = vpop.f32.mrf.mxu0 }
 0x2d5   : > { %v3100_v28 = vadd.f32 %v2960_v16, %v2720_v10  ;;  %v5001_v49 = vmax.f32 %v4939_v32, 0.0  ;;  %v3464_v25 = vrot.slane %v3294_v48, 1  ;;  %v3466_v38 = vrot.slane %v9868_v30, 1 }
 0x2d6   : > { %v9875_v0 = vmul.f32 %v6944_v33, %v11314_v63  ;;  %v5062_v9 = vmin.f32 %v5000_v62, 6.0  ;;  %v3227_v50 = vadd.f32 %v3165_v18, %v3099_v19  ;;  %v3843_v57 = vrot.slane %v3673_v39, 2  ;;  %v11317_v62 = vld [vmem:[#allocation44_spill] sm:$0xff]  ;;  %v6198_v39 = vpop.f32.mrf.mxu0 }
 0x2d7   : > { %v3228_v42 = vadd.f32 %v3166_v1, %v3100_v28  ;;  %v5063_v5 = vmin.f32 %v5001_v49, 6.0  ;;  %v3465_v13 = vsel %vm2487_vm5, %v3462_v7, %v3464_v25  ;;  %v3467_v20 = vsel %vm2487_vm5, %v3464_v25, %v3466_v38 }
 0x2d8   : > { %v10928_v10 = vrot.slane %v9875_v0, 2  ;;  %v3606_v32 = vadd.f32 %v3465_v13, %v3227_v50  ;;  %v3844_v18 = vsel %vm2867_vm6, %v3841_v21, %v3843_v57  ;;  %v4051_v1 = vmul.f32 %v6946_v34, %v11316_v14  ;;  %v11318_v21 = vld [vmem:[#allocation9_spill] sm:$0xff] }
 0x2d9   : > { %v3607_v16 = vadd.f32 %v3467_v20, %v3228_v42  ;;  %v5103_v7 = vpack.c.bf16 %v5063_v5, %v5062_v9  ;;  %v4052_v19 = vmul.f32 %v6946_v34, %v11317_v62  ;;  %v4180_v28 = vmul.f32 %v6948_v35, %v11317_v62  ;;  %v6213_v9 = vpop.f32.mrf.mxu1  ;;  %v5286_v20 = vpop.f32.mrf.mxu0 }
 0x2da   : > { %v3846_v48 = vsel %vm2867_vm6, %v3843_v57, %v10928_v10  ;;  %v3985_v54 = vadd.f32 %v3844_v18, %v3606_v32  ;;  %v9902_v25 = vmul.f32 %v6948_v35, %v11318_v21  ;;  %v4559_v5 = vmul.f32 %v9699_v55, %v11317_v62 }
 0x2db   : > { %v3986_v49 = vadd.f32 %v3846_v48, %v3607_v16  ;;  %6272 = vmatmul.mubr.msk.bf16.gmra.mxu1 %vm5136_vm7, %v5103_v7  ;;  %v4350_v50 = vrot.slane %v4180_v28, 1  ;;  %v9909_v42 = vmul.f32 %v9699_v55, %v11318_v21  ;;  %v2279_v57 = vmul.f32 %v11066_v17, %v11310_v27  ;;  %v6201_v9 = vpop.f32.mrf.mxu0  ;;  %v9940_v10 = vpop.f32.mrf.mxu1 }
 0x2dc   : > { %v2280_v13 = vmul.f32 %v11066_v17, %v11311_v40  ;;  %6275 = vmatprep.mubr.msk.bf16.mxu1 %vm6656_vm4, %v11030_v4  ;;  %v4113_v32 = vadd.f32 %v4051_v1, %v3985_v54  ;;  %v10931_v18 = vrot.slane %v9902_v25, 1  ;;  %v4729_v7 = vrot.slane %v4559_v5, 2  ;;  %11319 = vst [vmem:[#allocation8_spill] sm:$0xff] %v9940_v10 }
 0x2dd   : > { %v4114_v16 = vadd.f32 %v4052_v19, %v3986_v49  ;;  %v4351_v48 = vsel %vm2487_vm5, %v4348_v58, %v4350_v50  ;;  %v10930_v28 = vrot.slane %v9909_v42, 2  ;;  %v2408_v27 = vmul.f32 %v11045_v37, %v11311_v40  ;;  %v5288_v9 = vpop.f32.mrf.mxu0 }
 0x2de   : > { %v9926_v39 = vmul.f32 %v11045_v37, %v11312_v56  ;;  %v4353_v1 = vsel %vm2487_vm5, %v4350_v50, %v10931_v18  ;;  %v4492_v19 = vadd.f32 %v4351_v48, %v4113_v32  ;;  %v4730_v36 = vsel %vm2867_vm6, %v4727_v24, %v4729_v7 }
 0x2df   : > { %v2788_v58 = vmul.f32 %v11053_v22, %v11311_v40  ;;  %v4493_v54 = vadd.f32 %v4353_v1, %v4114_v16  ;;  %v4732_v49 = vsel %vm2867_vm6, %v4729_v7, %v10930_v28  ;;  %v2581_v5 = vrot.slane %v2408_v27, 1  ;;  %v6202_v27 = vpop.f32.mrf.mxu0  ;;  %v6214_v1 = vpop.f32.mrf.mxu1 }
 0x2e0   : > { %v10929_v20 = vrot.slane %v9926_v39, 1  ;;  %v4871_v50 = vadd.f32 %v4730_v36, %v4492_v19  ;;  %v9944_v43 = vmul.f32 %v11053_v22, %v11312_v56  ;;  %v3167_v40 = vmul.f32 %v11041_v15, %v11314_v63 }
 0x2e1   : > { %v2961_v24 = vrot.slane %v2788_v58, 2  ;;  %v4872_v32 = vadd.f32 %v4732_v49, %v4493_v54  ;;  %v2582_v16 = vsel %vm2487_vm5, %v2579_v60, %v2581_v5  ;;  %v3168_v48 = vmul.f32 %v11041_v15, %v11315_v26  ;;  %v9968_v27 = vpop.f32.mrf.mxu0 }
 0x2e2   : > { %v2584_v7 = vsel %vm2487_vm5, %v2581_v5, %v10929_v20  ;;  %v4940_v19 = vadd.f32 %v9854_v12, %v4871_v50  ;;  %v2721_v36 = vadd.f32 %v2582_v16, %v2279_v57  ;;  %v11320_v9 = vrot.slane %v9836_v51, 2  ;;  %11321 = vst [vmem:[#allocation3_spill] sm:$0xff] %v9968_v27  ;;  %v5314_v50 = vpop.f32.mrf.mxu1 }
 0x2e3   : > { %v2722_v58 = vadd.f32 %v2584_v7, %v2280_v13  ;;  %v4941_v23 = vadd.f32 %v9854_v12, %v4872_v32  ;;  %v10932_v60 = vrot.slane %v9944_v43, 2  ;;  %v3296_v49 = vmul.f32 %v6940_v31, %v11315_v26  ;;  %v6205_v20 = vpop.f32.mrf.mxu0 }
 0x2e4   : > { %v2962_v54 = vsel %vm2867_vm6, %v11320_v9, %v2961_v24  ;;  %v9966_v5 = vmul.f32 %v6940_v31, %v11316_v14  ;;  %v5002_v57 = vmax.f32 %v4940_v19, 0.0  ;;  %v3675_v51 = vmul.f32 %v6944_v33, %v11315_v26  ;;  %v6217_v28 = vpop.f32.mrf.mxu1 }
 0x2e5   : > { %v3101_v13 = vadd.f32 %v2962_v54, %v2721_v36  ;;  %v9974_v32 = vmul.f32 %v6944_v33, %v11316_v14  ;;  %v5003_v16 = vmax.f32 %v4941_v23, 0.0  ;;  %v2964_v7 = vsel %vm2867_vm6, %v2961_v24, %v10932_v60 }
 0x2e6   : > { %v3468_v1 = vrot.slane %v3296_v49, 1  ;;  %v10934_v9 = vrot.slane %v9966_v5, 1  ;;  %v5064_v50 = vmin.f32 %v5002_v57, 6.0  ;;  %v3102_v19 = vadd.f32 %v2964_v7, %v2722_v58  ;;  %v9987_v49 = vpop.f32.mrf.mxu0  ;;  %v5316_v60 = vpop.f32.mrf.mxu1  ;;  %v11325_v7 = vld [vmem:[#allocation50_spill] sm:$0xff] }
 0x2e7   : > { %v3229_v36 = vadd.f32 %v3167_v40, %v3101_v13  ;;  %v3847_v54 = vrot.slane %v3675_v51, 2  ;;  %v5065_v18 = vmin.f32 %v5003_v16, 6.0  ;;  %v10933_v24 = vrot.slane %v9974_v32, 2  ;;  %11322 = vst [vmem:[#allocation31_spill] sm:$0xff] %v9987_v49  ;;  %v11324_v13 = vld [vmem:[#allocation41_spill] sm:$0xff] }
 0x2e8   : > { %v3469_v27 = vsel %vm2487_vm5, %v3466_v38, %v3468_v1  ;;  %v3471_v23 = vsel %vm2487_vm5, %v3468_v1, %v10934_v9  ;;  %v3230_v20 = vadd.f32 %v3168_v48, %v3102_v19  ;;  %v11323_v58 = vrot.slane %v9875_v0, 2  ;;  %v6206_v48 = vpop.f32.mrf.mxu0 }
 0x2e9   : > { %v3608_v28 = vadd.f32 %v3469_v27, %v3229_v36  ;;  %v4053_v30 = vmul.f32 %v6946_v34, %v11318_v21  ;;  %v5104_v57 = vpack.c.bf16 %v5065_v18, %v5064_v50  ;;  %v3850_v38 = vsel %vm2867_vm6, %v3847_v54, %v10933_v24  ;;  %v6218_v27 = vpop.f32.mrf.mxu1 }
 0x2ea   : > { %v3848_v40 = vsel %vm2867_vm6, %v11323_v58, %v3847_v54  ;;  %v4054_v51 = vmul.f32 %v6946_v34, %v11324_v13  ;;  %v4182_v60 = vmul.f32 %v6948_v35, %v11324_v13  ;;  %v3609_v16 = vadd.f32 %v3471_v23, %v3230_v20  ;;  %v5300_v23 = vpop.f32.mrf.mxu0 }
 0x2eb   : > { %v3987_v0 = vadd.f32 %v3848_v40, %v3608_v28  ;;  %v10003_v1 = vmul.f32 %v6948_v35, %v11325_v7  ;;  %v4561_v18 = vmul.f32 %v9699_v55, %v11324_v13  ;;  %6276 = vmatmul.mubr.msk.bf16.gmra.mxu1 %vm5136_vm7, %v5104_v57  ;;  %v10010_v19 = vmul.f32 %v9699_v55, %v11325_v7  ;;  %v10016_v20 = vpop.f32.mrf.mxu1 }
 0x2ec   : > { %v4354_v50 = vrot.slane %v4182_v60, 1  ;;  %v2281_v36 = vmul.f32 %v11066_v17, %v11312_v56  ;;  %v2282_v54 = vmul.f32 %v11066_v17, %v11313_v29  ;;  %11326 = vst [vmem:[#allocation21_spill] sm:$0xff] %v10016_v20  ;;  %6279 = vmatprep.mubr.msk.bf16.mxu1 %vm6656_vm4, %v11030_v4  ;;  %v3988_v28 = vadd.f32 %v3850_v38, %v3609_v16  ;;  %v6209_v24 = vpop.f32.mrf.mxu0 }
 0x2ed   : > { %v4115_v58 = vadd.f32 %v4053_v30, %v3987_v0  ;;  %v10936_v40 = vrot.slane %v10003_v1, 1  ;;  %v4733_v57 = vrot.slane %v4561_v18, 2  ;;  %v11327_v60 = vrot.slane %v9902_v25, 1  ;;  %v6221_v9 = vpop.f32.mrf.mxu1 }
 0x2ee   : > { %v10935_v56 = vrot.slane %v10010_v19, 2  ;;  %v2410_v27 = vmul.f32 %v11045_v37, %v11313_v29  ;;  %v10029_v23 = vmul.f32 %v11045_v37, %v11314_v63  ;;  %v4116_v38 = vadd.f32 %v4054_v51, %v3988_v28  ;;  %v5302_v24 = vpop.f32.mrf.mxu0 }
 0x2ef   : > { %v4355_v48 = vsel %vm2487_vm5, %v11327_v60, %v4354_v50  ;;  %v4357_v30 = vsel %vm2487_vm5, %v4354_v50, %v10936_v40  ;;  %v11328_v25 = vrot.slane %v9909_v42, 2  ;;  %v2790_v9 = vmul.f32 %v11053_v22, %v11313_v29  ;;  %v10043_v51 = vpop.f32.mrf.mxu1 }
 0x2f0   : > { %v4494_v16 = vadd.f32 %v4355_v48, %v4115_v58  ;;  %v4736_v18 = vsel %vm2867_vm6, %v4733_v57, %v10935_v56  ;;  %v2585_v60 = vrot.slane %v2410_v27, 1  ;;  %v10938_v20 = vrot.slane %v10029_v23, 1  ;;  %11329 = vst [vmem:[#allocation24_spill] sm:$0xff] %v10043_v51 }
 0x2f1   : > { %v4734_v0 = vsel %vm2867_vm6, %v11328_v25, %v4733_v57  ;;  %v4495_v28 = vadd.f32 %v4357_v30, %v4116_v38  ;;  %v10047_v42 = vmul.f32 %v11053_v22, %v11314_v63  ;;  %v3169_v58 = vmul.f32 %v11041_v15, %v11316_v14  ;;  %v6210_v30 = vpop.f32.mrf.mxu0 }
 0x2f2   : > { %v4873_v50 = vadd.f32 %v4734_v0, %v4494_v16  ;;  %v11330_v57 = vrot.slane %v9926_v39, 1  ;;  %v2588_v29 = vsel %vm2487_vm5, %v2585_v60, %v10938_v20  ;;  %v2965_v27 = vrot.slane %v2790_v9, 2  ;;  %v6222_v16 = vpop.f32.mrf.mxu1 }
 0x2f3   : > { %v3170_v38 = vmul.f32 %v11041_v15, %v11317_v62  ;;  %v4874_v25 = vadd.f32 %v4736_v18, %v4495_v28  ;;  %v2724_v56 = vadd.f32 %v2588_v29, %v2282_v54  ;;  %v11331_v40 = vrot.slane %v9944_v43, 2 }
 0x2f4   : > { %v2586_v48 = vsel %vm2487_vm5, %v11330_v57, %v2585_v60  ;;  %v4942_v0 = vadd.f32 %v9854_v12, %v4873_v50  ;;  %v10937_v57 = vrot.slane %v10047_v42, 2  ;;  %v3298_v60 = vmul.f32 %v6940_v31, %v11317_v62  ;;  %v5328_v30 = vpop.f32.mrf.mxu1 }
 0x2f5   : > { %v2723_v24 = vadd.f32 %v2586_v48, %v2281_v36  ;;  %v2966_v39 = vsel %vm2867_vm6, %v11331_v40, %v2965_v27  ;;  %v10068_v9 = vmul.f32 %v6940_v31, %v11318_v21  ;;  %v4943_v18 = vadd.f32 %v9854_v12, %v4874_v25 }
 0x2f6   : > { %v5004_v28 = vmax.f32 %v4942_v0, 0.0  ;;  %v3677_v36 = vmul.f32 %v6944_v33, %v11317_v62  ;;  %v2968_v43 = vsel %vm2867_vm6, %v2965_v27, %v10937_v57  ;;  %v3472_v54 = vrot.slane %v3298_v60, 1  ;;  %v6225_v29 = vpop.f32.mrf.mxu1 }
 0x2f7   : > { %v3103_v50 = vadd.f32 %v2966_v39, %v2723_v24  ;;  %v3474_v40 = vrot.slane %v10068_v9, 1  ;;  %v10079_v48 = vmul.f32 %v6944_v33, %v11318_v21  ;;  %v5005_v16 = vmax.f32 %v4943_v18, 0.0  ;;  %v11335_v29 = vld [vmem:[#allocation49_spill] sm:$0xff] }
 0x2f8   : > { %v5066_v30 = vmin.f32 %v5004_v28, 6.0  ;;  %v3104_v25 = vadd.f32 %v2968_v43, %v2724_v56  ;;  %v11332_v24 = vrot.slane %v9966_v5, 1  ;;  %v3851_v60 = vrot.slane %v3677_v36, 2  ;;  %v5330_v20 = vpop.f32.mrf.mxu1  ;;  %v11334_v28 = vld [vmem:[#allocation11_spill] sm:$0xff] }
 0x2f9   : > { %v3231_v0 = vadd.f32 %v3169_v58, %v3103_v50  ;;  %v3475_v27 = vsel %vm2487_vm5, %v3472_v54, %v3474_v40  ;;  %v10941_v57 = vrot.slane %v10079_v48, 2  ;;  %v5067_v51 = vmin.f32 %v5005_v16, 6.0 }
 0x2fa   : > { %v3473_v39 = vsel %vm2487_vm5, %v11332_v24, %v3472_v54  ;;  %v3232_v49 = vadd.f32 %v3170_v38, %v3104_v25  ;;  %v4055_v18 = vmul.f32 %v6946_v34, %v11325_v7  ;;  %v11333_v56 = vrot.slane %v9974_v32, 2  ;;  %v6226_v36 = vpop.f32.mrf.mxu1 }
 0x2fb   : > { %v3610_v10 = vadd.f32 %v3473_v39, %v3231_v0  ;;  %v3854_v58 = vsel %vm2867_vm6, %v3851_v60, %v10941_v57  ;;  %v4056_v50 = vmul.f32 %v6946_v34, %v11334_v28  ;;  %v4184_v20 = vmul.f32 %v6948_v35, %v11334_v28 }
 0x2fc   : > { %v3852_v5 = vsel %vm2867_vm6, %v11333_v56, %v3851_v60  ;;  %v5105_v38 = vpack.c.bf16 %v5067_v51, %v5066_v30  ;;  %v3611_v43 = vadd.f32 %v3475_v27, %v3232_v49  ;;  %v10102_v16 = vmul.f32 %v6948_v35, %v11335_v29  ;;  %v10112_v39 = vpop.f32.mrf.mxu1 }
 0x2fd   : > { %v3989_v54 = vadd.f32 %v3852_v5, %v3610_v10  ;;  %v4358_v32 = vrot.slane %v4184_v20, 1  ;;  %v4563_v25 = vmul.f32 %v9699_v55, %v11334_v28  ;;  %v10108_v0 = vmul.f32 %v9699_v55, %v11335_v29 }
 0x2fe   : > { %v2283_v24 = vmul.f32 %v11066_v17, %v11314_v63  ;;  %6280 = vmatmul.mubr.msk.bf16.gmra.mxu1 %vm5136_vm7, %v5105_v38  ;;  %v3990_v10 = vadd.f32 %v3854_v58, %v3611_v43  ;;  %v10940_v51 = vrot.slane %v10102_v16, 1  ;;  %v2284_v30 = vmul.f32 %v11066_v17, %v11315_v26  ;;  %v6229_v58 = vpop.f32.mrf.mxu1 }
 0x2ff   : > { %v4117_v49 = vadd.f32 %v4055_v18, %v3989_v54  ;;  %6283 = vmatprep.mubr.msk.bf16.mxu1 %vm6656_vm4, %v11030_v4  ;;  %v11336_v27 = vrot.slane %v10003_v1, 1  ;;  %v4737_v56 = vrot.slane %v4563_v25, 2  ;;  %v10939_v63 = vrot.slane %v10108_v0, 2 }
 0x300   : > { %v2412_v5 = vmul.f32 %v11045_v37, %v11315_v26  ;;  %v4118_v18 = vadd.f32 %v4056_v50, %v3990_v10  ;;  %v4361_v20 = vsel %vm2487_vm5, %v4358_v32, %v10940_v51  ;;  %v10131_v38 = vmul.f32 %v11045_v37, %v11316_v14  ;;  %v10141_v10 = vpop.f32.mrf.mxu1 }
 0x301   : > { %v4359_v60 = vsel %vm2487_vm5, %v11336_v27, %v4358_v32  ;;  %v11337_v1 = vrot.slane %v10010_v19, 2  ;;  %v4740_v54 = vsel %vm2867_vm6, %v4737_v56, %v10939_v63  ;;  %v2792_v50 = vmul.f32 %v11053_v22, %v11315_v26  ;;  %11338 = vst [vmem:[#allocation22_spill] sm:$0xff] %v10141_v10 }
 0x302   : > { %v4496_v36 = vadd.f32 %v4359_v60, %v4117_v49  ;;  %v2589_v25 = vrot.slane %v2412_v5, 1  ;;  %v4497_v32 = vadd.f32 %v4361_v20, %v4118_v18  ;;  %v10943_v27 = vrot.slane %v10131_v38, 1  ;;  %v6230_v5 = vpop.f32.mrf.mxu1 }
 0x303   : > { %v4738_v43 = vsel %vm2867_vm6, %v11337_v1, %v4737_v56  ;;  %v10146_v60 = vmul.f32 %v11053_v22, %v11316_v14  ;;  %v11339_v19 = vrot.slane %v10029_v23, 1  ;;  %v2969_v1 = vrot.slane %v2792_v50, 2 }
 0x304   : > { %v4875_v49 = vadd.f32 %v4738_v43, %v4496_v36  ;;  %v3171_v56 = vmul.f32 %v11041_v15, %v11318_v21  ;;  %v3172_v26 = vmul.f32 %v11041_v15, %v11324_v13  ;;  %v4876_v18 = vadd.f32 %v4740_v54, %v4497_v32  ;;  %v5342_v57 = vpop.f32.mrf.mxu1 }
 0x305   : > { %v2590_v58 = vsel %vm2487_vm5, %v11339_v19, %v2589_v25  ;;  %v2592_v36 = vsel %vm2487_vm5, %v2589_v25, %v10943_v27  ;;  %v11340_v23 = vrot.slane %v10047_v42, 2  ;;  %v10942_v19 = vrot.slane %v10146_v60, 2 }
 0x306   : > { %v4944_v20 = vadd.f32 %v9854_v12, %v4875_v49  ;;  %v2725_v43 = vadd.f32 %v2590_v58, %v2283_v24  ;;  %v2726_v63 = vadd.f32 %v2592_v36, %v2284_v30  ;;  %v3300_v51 = vmul.f32 %v6940_v31, %v11324_v13  ;;  %v6233_v57 = vpop.f32.mrf.mxu1 }
 0x307   : > { %v2970_v50 = vsel %vm2867_vm6, %v11340_v23, %v2969_v1  ;;  %v4945_v54 = vadd.f32 %v9854_v12, %v4876_v18  ;;  %v10168_v5 = vmul.f32 %v6940_v31, %v11325_v7  ;;  %v2972_v42 = vsel %vm2867_vm6, %v2969_v1, %v10942_v19 }
 0x308   : > { %v5006_v32 = vmax.f32 %v4944_v20, 0.0  ;;  %v3105_v49 = vadd.f32 %v2970_v50, %v2725_v43  ;;  %v3476_v24 = vrot.slane %v3300_v51, 1  ;;  %v3679_v30 = vmul.f32 %v6944_v33, %v11324_v13  ;;  %v5344_v50 = vpop.f32.mrf.mxu1 }
 0x309   : > { %v10177_v25 = vmul.f32 %v6944_v33, %v11325_v7  ;;  %v5007_v58 = vmax.f32 %v4945_v54, 0.0  ;;  %v3106_v20 = vadd.f32 %v2972_v42, %v2726_v63  ;;  %v10947_v23 = vrot.slane %v10168_v5, 1  ;;  %v11342_v54 = vld [vmem:[#allocation35_spill] sm:$0xff] }
 0x30a   : > { %v5068_v18 = vmin.f32 %v5006_v32, 6.0  ;;  %v3233_v36 = vadd.f32 %v3171_v56, %v3105_v49  ;;  %v3477_v43 = vsel %vm2487_vm5, %v3474_v40, %v3476_v24  ;;  %v3855_v1 = vrot.slane %v3679_v30, 2 }
 0x30b   : > { %v10944_v51 = vrot.slane %v10177_v25, 2  ;;  %v5069_v19 = vmin.f32 %v5007_v58, 6.0  ;;  %v3234_v27 = vadd.f32 %v3172_v26, %v3106_v20  ;;  %v4057_v57 = vmul.f32 %v6946_v34, %v11335_v29  ;;  %v6234_v26 = vpop.f32.mrf.mxu1  ;;  %v11343_v20 = vld [vmem:[#allocation12_spill] sm:$0xff] }
 0x30c   : > { %v3612_v10 = vadd.f32 %v3477_v43, %v3233_v36  ;;  %v3479_v63 = vsel %vm2487_vm5, %v3476_v24, %v10947_v23  ;;  %v11341_v9 = vrot.slane %v10079_v48, 2  ;;  %v4058_v32 = vmul.f32 %v6946_v34, %v11342_v54 }
 0x30d   : > { %v3858_v56 = vsel %vm2867_vm6, %v3855_v1, %v10944_v51  ;;  %v5106_v49 = vpack.c.bf16 %v5069_v19, %v5068_v18  ;;  %v3613_v42 = vadd.f32 %v3479_v63, %v3234_v27  ;;  %v4186_v58 = vmul.f32 %v6948_v35, %v11342_v54  ;;  %v10211_v19 = vpop.f32.mrf.mxu1 }
 0x30e   : > { %v3856_v40 = vsel %vm2867_vm6, %v11341_v9, %v3855_v1  ;;  %v10201_v24 = vmul.f32 %v6948_v35, %v11343_v20  ;;  %v4565_v48 = vmul.f32 %v9699_v55, %v11342_v54  ;;  %v10207_v36 = vmul.f32 %v9699_v55, %v11343_v20 }
 0x30f   : > { %v3991_v30 = vadd.f32 %v3856_v40, %v3612_v10  ;;  %v2285_v43 = vmul.f32 %v11066_v17, %v11316_v14  ;;  %6284 = vmatmul.mubr.msk.bf16.gmra.mxu1 %vm5136_vm7, %v5106_v49  ;;  %v3992_v10 = vadd.f32 %v3858_v56, %v3613_v42  ;;  %v4362_v18 = vrot.slane %v4186_v58, 1  ;;  %v6237_v40 = vpop.f32.mrf.mxu1 }
 0x310   : > { %v2286_v1 = vmul.f32 %v11066_v17, %v11317_v62  ;;  %6287 = vmatprep.mubr.msk.bf16.mxu1 %vm6656_vm4, %v11030_v4  ;;  %v10946_v50 = vrot.slane %v10201_v24, 1  ;;  %v4741_v63 = vrot.slane %v4565_v48, 2  ;;  %v10945_v9 = vrot.slane %v10207_v36, 2 }
 0x311   : > { %v4119_v27 = vadd.f32 %v4057_v57, %v3991_v30  ;;  %v2414_v14 = vmul.f32 %v11045_v37, %v11317_v62  ;;  %v4120_v26 = vadd.f32 %v4058_v32, %v3992_v10  ;;  %v11344_v56 = vrot.slane %v10102_v16, 1  ;;  %v10240_v10 = vpop.f32.mrf.mxu1 }
 0x312   : > { %v10227_v49 = vmul.f32 %v11045_v37, %v11318_v21  ;;  %v2794_v42 = vmul.f32 %v11053_v22, %v11317_v62  ;;  %v4365_v30 = vsel %vm2487_vm5, %v4362_v18, %v10946_v50  ;;  %v11345_v48 = vrot.slane %v10108_v0, 2  ;;  %11346 = vst [vmem:[#allocation25_spill] sm:$0xff] %v10240_v10 }
 0x313   : > { %v4363_v57 = vsel %vm2487_vm5, %v11344_v56, %v4362_v18  ;;  %v4744_v16 = vsel %vm2867_vm6, %v4741_v63, %v10945_v9  ;;  %v4499_v40 = vadd.f32 %v4365_v30, %v4120_v26  ;;  %v2593_v56 = vrot.slane %v2414_v14, 1 }
 0x314   : > { %v4498_v58 = vadd.f32 %v4363_v57, %v4119_v27  ;;  %v4742_v32 = vsel %vm2867_vm6, %v11345_v48, %v4741_v63  ;;  %v10949_v51 = vrot.slane %v10227_v49, 1  ;;  %v10245_v62 = vmul.f32 %v11053_v22, %v11318_v21  ;;  %v6238_v48 = vpop.f32.mrf.mxu1 }
 0x315   : > { %v2973_v27 = vrot.slane %v2794_v42, 2  ;;  %v3173_v0 = vmul.f32 %v11041_v15, %v11325_v7  ;;  %v3174_v57 = vmul.f32 %v11041_v15, %v11334_v28  ;;  %v4878_v63 = vadd.f32 %v4744_v16, %v4499_v40 }
 0x316   : > { %v4877_v18 = vadd.f32 %v4742_v32, %v4498_v58  ;;  %v11347_v9 = vrot.slane %v10131_v38, 1  ;;  %v2596_v26 = vsel %vm2487_vm5, %v2593_v56, %v10949_v51  ;;  %v10948_v30 = vrot.slane %v10245_v62, 2  ;;  %v5356_v48 = vpop.f32.mrf.mxu1 }
 0x317   : > { %v2728_v32 = vadd.f32 %v2596_v26, %v2286_v1  ;;  %v11348_v50 = vrot.slane %v10146_v60, 2  ;;  %v4947_v16 = vadd.f32 %v9854_v12, %v4878_v63  ;;  %v10270_v40 = vmul.f32 %v6940_v31, %v11335_v29 }
 0x318   : > { %v2594_v14 = vsel %vm2487_vm5, %v11347_v9, %v2593_v56  ;;  %v4946_v42 = vadd.f32 %v9854_v12, %v4877_v18  ;;  %v2976_v38 = vsel %vm2867_vm6, %v2973_v27, %v10948_v30  ;;  %v3302_v9 = vmul.f32 %v6940_v31, %v11334_v28 }
 0x319   : > { %v2727_v58 = vadd.f32 %v2594_v14, %v2285_v43  ;;  %v2974_v23 = vsel %vm2867_vm6, %v11348_v50, %v2973_v27  ;;  %v3108_v56 = vadd.f32 %v2976_v38, %v2728_v32  ;;  %v3681_v60 = vmul.f32 %v6944_v33, %v11334_v28  ;;  %v6241_v50 = vpop.f32.mrf.mxu1 }
 0x31a   : > { %v5008_v43 = vmax.f32 %v4946_v42, 0.0  ;;  %v5009_v18 = vmax.f32 %v4947_v16, 0.0  ;;  %v3480_v63 = vrot.slane %v3302_v9, 1  ;;  %v3482_v14 = vrot.slane %v10270_v40, 1 }
 0x31b   : > { %v3107_v1 = vadd.f32 %v2974_v23, %v2727_v58  ;;  %v10277_v27 = vmul.f32 %v6944_v33, %v11335_v29  ;;  %v3236_v30 = vadd.f32 %v3174_v57, %v3108_v56  ;;  %v3859_v51 = vrot.slane %v3681_v60, 2  ;;  %v5358_v10 = vpop.f32.mrf.mxu1 }
 0x31c   : > { %v5070_v26 = vmin.f32 %v5008_v43, 6.0  ;;  %v5071_v42 = vmin.f32 %v5009_v18, 6.0  ;;  %v11349_v23 = vrot.slane %v10168_v5, 1  ;;  %v3483_v32 = vsel %vm2487_vm5, %v3480_v63, %v3482_v14  ;;  %v10294_v5 = vld [vmem:[%s10737_s6] ss:$0 sm:$0xff] }
 0x31d   : > { %v3235_v48 = vadd.f32 %v3173_v0, %v3107_v1  ;;  %v10950_v16 = vrot.slane %v10277_v27, 2  ;;  %v3615_v9 = vadd.f32 %v3483_v32, %v3236_v30  ;;  %v11350_v50 = vrot.slane %v10177_v25, 2  ;;  %v6242_v57 = vpop.f32.mrf.mxu1 }
 0x31e   : > { %v3481_v58 = vsel %vm2487_vm5, %v11349_v23, %v3480_v63  ;;  %v4059_v10 = vmul.f32 %v6946_v34, %v11343_v20  ;;  %v5107_v43 = vpack.c.bf16 %v5071_v42, %v5070_v26  ;;  %v4060_v25 = vmul.f32 %v6946_v34, %v8728_v44  ;;  %v6595_v23 = vld [vmem:[%s6732_s10 + $0x10] sm:$0xff]  }
 0x31f   : > { %v3614_v38 = vadd.f32 %v3481_v58, %v3235_v48  ;;  %v3860_v0 = vsel %vm2867_vm6, %v11350_v50, %v3859_v51  ;;  %v3862_v1 = vsel %vm2867_vm6, %v3859_v51, %v10950_v16  ;;  %v4188_v30 = vmul.f32 %v6948_v35, %v8728_v44  ;;  %v10309_v26 = vpop.f32.mrf.mxu1 }
 0x320   : > { %v3994_v60 = vadd.f32 %v3862_v1, %v3615_v9  ;;  %v10305_v18 = vmul.f32 %v6948_v35, %v8617_v8  ;;  %v4567_v63 = vmul.f32 %v9699_v55, %v8728_v44  ;;  %6288 = vmatmul.mubr.msk.bf16.gmra.mxu1 %vm5136_vm7, %v5107_v43  ;;  %v10314_v48 = vmul.f32 %v9699_v55, %v8617_v8 }
 0x321   : > { %v3993_v56 = vadd.f32 %v3860_v0, %v3614_v38  ;;  %v4366_v51 = vrot.slane %v4188_v30, 1  ;;  %v5265_v42 = vadd.f32 %v10294_v5, %v9629_v11  ;;  %v5481_v58 = vunpack.c.l.bf16 %v6595_v23  ;;  %6291 = vmatprep.mubr.msk.bf16.mxu1 %vm6656_vm4, %v11030_v4  ;;  %v6245_v0 = vpop.f32.mrf.mxu1 }
 0x322   : > { %v4122_v38 = vadd.f32 %v4060_v25, %v3994_v60  ;;  %v10953_v9 = vrot.slane %v10305_v18, 1  ;;  %v4745_v50 = vrot.slane %v4567_v63, 2  ;;  %v11351_v57 = vrot.slane %v10201_v24, 1 }
 0x323   : > { %v4121_v32 = vadd.f32 %v4059_v10, %v3993_v56  ;;  %v10951_v43 = vrot.slane %v10314_v48, 2  ;;  %v5482_v1 = vunpack.c.h.bf16 %v6595_v23  ;;  %v5577_v11 = vrot.slane %v5481_v58, 1  ;;  %v10335_v24 = vpop.f32.mrf.mxu1 }
 0x324   : > { %v4367_v55 = vsel %vm2487_vm5, %v11351_v57, %v4366_v51  ;;  %v4369_v30 = vsel %vm2487_vm5, %v4366_v51, %v10953_v9  ;;  %v11352_v10 = vrot.slane %v10207_v36, 2  ;;  %v2287_v56 = vmul.f32 %v11066_v17, %v11318_v21 }
 0x325   : > { %v4500_v16 = vadd.f32 %v4367_v55, %v4121_v32  ;;  %v4501_v60 = vadd.f32 %v4369_v30, %v4122_v38  ;;  %v4748_v63 = vsel %vm2867_vm6, %v4745_v50, %v10951_v43  ;;  %v10340_v23 = vrot.slane %v5482_v1, 1  ;;  %v6246_v38 = vpop.f32.mrf.mxu1 }
 0x326   : > { %v4746_v25 = vsel %vm2867_vm6, %v11352_v10, %v4745_v50  ;;  %v2288_v51 = vmul.f32 %v11066_v17, %v11324_v13  ;;  %v2416_v36 = vmul.f32 %v11045_v37, %v11324_v13  ;;  %v10348_v32 = vmul.f32 %v11045_v37, %v11325_v7 }
 0x327   : > { %v4879_v58 = vadd.f32 %v4746_v25, %v4500_v16  ;;  %v2796_v21 = vmul.f32 %v11053_v22, %v11324_v13  ;;  %v4880_v0 = vadd.f32 %v4748_v63, %v4501_v60  ;;  %v5579_v16 = vsel %vm2487_vm5, %v5577_v11, %v10340_v23 }
 0x328   : > { %v10361_v50 = vmul.f32 %v11053_v22, %v11325_v7  ;;  %v3175_v57 = vmul.f32 %v11041_v15, %v11335_v29  ;;  %v5689_v55 = vadd.f32 %v5579_v16, %v5265_v42  ;;  %v2597_v1 = vrot.slane %v2416_v36, 1 }
 0x329   : > { %v4948_v13 = vadd.f32 %v9854_v12, %v4879_v58  ;;  %v10952_v30 = vrot.slane %v10348_v32, 1  ;;  %v4949_v10 = vadd.f32 %v9854_v12, %v4880_v0  ;;  %v2977_v25 = vrot.slane %v2796_v21, 2 }
 0x32a   : > { %v2979_v60 = vrot.slane %v10361_v50, 2  ;;  %v3176_v11 = vmul.f32 %v11041_v15, %v11342_v54  ;;  %5721 = vst.msk [vmem:[%s10355_s29] sm:$0xff] %vm570_vm2, %v5689_v55  ;;  %v11353_v38 = vrot.slane %v10227_v49, 1  ;;  %v3304_v58 = vmul.f32 %v6940_v31, %v11342_v54 }
 0x32b   : > { %v5010_v63 = vmax.f32 %v4948_v13, 0.0  ;;  %v2600_v42 = vsel %vm2487_vm5, %v2597_v1, %v10952_v30  ;;  %v5011_v36 = vmax.f32 %v4949_v10, 0.0  ;;  %v11354_v16 = vrot.slane %v10245_v62, 2 }
 0x32c   : > { %v2598_v29 = vsel %vm2487_vm5, %v11353_v38, %v2597_v1  ;;  %v2730_v0 = vadd.f32 %v2600_v42, %v2288_v51  ;;  %v2980_v49 = vsel %vm2867_vm6, %v2977_v25, %v2979_v60  ;;  %v10389_v55 = vmul.f32 %v6940_v31, %v11343_v20 }
 0x32d   : > { %v2729_v21 = vadd.f32 %v2598_v29, %v2287_v56  ;;  %v2978_v13 = vsel %vm2867_vm6, %v11354_v16, %v2977_v25  ;;  %v5072_v43 = vmin.f32 %v5010_v63, 6.0  ;;  %v3484_v1 = vrot.slane %v3304_v58, 1 }
 0x32e   : > { %v5073_v38 = vmin.f32 %v5011_v36, 6.0  ;;  %v3110_v9 = vadd.f32 %v2980_v49, %v2730_v0  ;;  %v3683_v56 = vmul.f32 %v6944_v33, %v11342_v54  ;;  %v3486_v51 = vrot.slane %v10389_v55, 1 }
 0x32f   : > { %v3109_v30 = vadd.f32 %v2978_v13, %v2729_v21  ;;  %v3485_v62 = vsel %vm2487_vm5, %v3482_v14, %v3484_v1  ;;  %v10399_v10 = vmul.f32 %v6944_v33, %v11343_v20  ;;  %v4061_v25 = vmul.f32 %v6946_v34, %v8617_v8  ;;  %v11355_v14 = vld [vmem:[#allocation46_spill] sm:$0xff]  ;;  %v6596_v13 = vld [vmem:[%s10734_s3 + $0x8] ss:$0 sm:$0xff] }
 0x330   : > { %v5108_v63 = vpack.c.bf16 %v5073_v38, %v5072_v43  ;;  %v3238_v42 = vadd.f32 %v3176_v11, %v3110_v9  ;;  %v3863_v58 = vrot.slane %v3683_v56, 2  ;;  %v3487_v54 = vsel %vm2487_vm5, %v3484_v1, %v3486_v51 }
 0x331   : > { %v3237_v29 = vadd.f32 %v3175_v57, %v3109_v30  ;;  %v3865_v40 = vrot.slane %v10399_v10, 2  ;;  %v4062_v36 = vmul.f32 %v6946_v34, %v11355_v14  ;;  %v4190_v21 = vmul.f32 %v6948_v35, %v11355_v14  ;;  %v11357_v57 = vld [vmem:[#allocation45_spill] sm:$0xff] }
 0x332   : > { %6292 = vmatmul.mubr.msk.bf16.gmra.mxu1 %vm5136_vm7, %v5108_v63  ;;  %v3617_v8 = vadd.f32 %v3487_v54, %v3238_v42  ;;  %v11356_v43 = vrot.slane %v10277_v27, 2  ;;  %v10417_v30 = vmul.f32 %v6948_v35, %v11357_v57  ;;  %v4569_v27 = vmul.f32 %v6596_v13, %v11355_v14  ;;  %v6597_v54 = vld [vmem:[%s6732_s10 + $0x18] sm:$0xff]  }
 0x333   : > { %v3616_v0 = vadd.f32 %v3485_v62, %v3237_v29  ;;  %6295 = vmatprep.mubr.msk.bf16.mxu1 %vm6656_vm4, %v11030_v4  ;;  %v3866_v11 = vsel %vm2867_vm6, %v3863_v58, %v3865_v40  ;;  %v4370_v16 = vrot.slane %v4190_v21, 1  ;;  %v10429_v49 = vmul.f32 %v6596_v13, %v11357_v57 }
 0x334   : > { %v3864_v9 = vsel %vm2867_vm6, %v11356_v43, %v3863_v58  ;;  %v3996_v38 = vadd.f32 %v3866_v11, %v3617_v8  ;;  %v4372_v56 = vrot.slane %v10417_v30, 1  ;;  %v5268_v62 = vadd.f32 %v10294_v5, %v9736_v45 }
 0x335   : > { %v3995_v1 = vadd.f32 %v3864_v9, %v3616_v0  ;;  %v11358_v63 = vrot.slane %v10305_v18, 1  ;;  %v4749_v42 = vrot.slane %v4569_v27, 2  ;;  %v4751_v58 = vrot.slane %v10429_v49, 2 }
 0x336   : > { %v5483_v21 = vunpack.c.l.bf16 %v6597_v54  ;;  %v4124_v43 = vadd.f32 %v4062_v36, %v3996_v38  ;;  %v4373_v0 = vsel %vm2487_vm5, %v4370_v16, %v4372_v56  ;;  %v2289_v8 = vmul.f32 %v11066_v17, %v11325_v7 }
 0x337   : > { %v4371_v29 = vsel %vm2487_vm5, %v11358_v63, %v4370_v16  ;;  %v4123_v14 = vadd.f32 %v4061_v25, %v3995_v1  ;;  %v11359_v45 = vrot.slane %v10314_v48, 2  ;;  %v4752_v9 = vsel %vm2867_vm6, %v4749_v42, %v4751_v58 }
 0x338   : > { %v5580_v11 = vrot.slane %v5483_v21, 1  ;;  %v2290_v25 = vmul.f32 %v11066_v17, %v11334_v28  ;;  %v4503_v27 = vadd.f32 %v4373_v0, %v4124_v43  ;;  %v2418_v16 = vmul.f32 %v11045_v37, %v11334_v28 }
 0x339   : > { %v4750_v18 = vsel %vm2867_vm6, %v11359_v45, %v4749_v42  ;;  %v4502_v36 = vadd.f32 %v4371_v29, %v4123_v14  ;;  %v2798_v7 = vmul.f32 %v11053_v22, %v11334_v28  ;;  %v3177_v1 = vmul.f32 %v11041_v15, %v11343_v20 }
 0x33a   : > { %v5581_v48 = vsel %vm2487_vm5, %v10340_v23, %v5580_v11  ;;  %v3178_v38 = vmul.f32 %v11041_v15, %v8728_v44  ;;  %v3306_v17 = vmul.f32 %v6940_v31, %v8728_v44  ;;  %v4882_v29 = vadd.f32 %v4752_v9, %v4503_v27  ;;  %v11365_v11 = vld [vmem:[#allocation17_spill] sm:$0xff] }
 0x33b   : > { %v4881_v63 = vadd.f32 %v4750_v18, %v4502_v36  ;;  %v5690_v42 = vadd.f32 %v5581_v48, %v5268_v62  ;;  %v2601_v37 = vrot.slane %v2418_v16, 1  ;;  %v2981_v54 = vrot.slane %v2798_v7, 2  ;;  %v11361_v62 = vld [vmem:[#allocation15_spill] sm:$0xff] }
 0x33c   : > { %v3488_v21 = vrot.slane %v3306_v17, 1  ;;  %v3685_v22 = vmul.f32 %v6944_v33, %v8728_v44  ;;  %v4063_v28 = vmul.f32 %v6946_v34, %v11357_v57  ;;  %v4951_v23 = vadd.f32 %v9854_v12, %v4882_v29  ;;  %v11363_v44 = vld [vmem:[#allocation2_spill] sm:$0xff]  ;;  %v5370_v17 = vpop.f32.mrf.mxu1 }
 0x33d   : > { %v4950_v20 = vadd.f32 %v9854_v12, %v4881_v63  ;;  %5722 = vst.msk [vmem:[%s10355_s29 + $0x8] sm:$0xff] %vm570_vm2, %v5690_v42  ;;  %v11360_v31 = vrot.slane %v10348_v32, 1  ;;  %v11362_v14 = vrot.slane %v11361_v62, 1  ;;  %v2982_v33 = vsel %vm2867_vm6, %v2979_v60, %v2981_v54  ;;  %v11367_v42 = vld [vmem:[#allocation14_spill] sm:$0xff]  ;;  %v11371_v62 = vld [vmem:[#allocation13_spill] sm:$0xff] }
 0x33e   : > { %v11364_v57 = vrot.slane %v11363_v44, 2  ;;  %v5013_v9 = vmax.f32 %v4951_v23, 0.0  ;;  %v3489_v32 = vsel %vm2487_vm5, %v3486_v51, %v3488_v21  ;;  %v11366_v36 = vrot.slane %v11365_v11, 1  ;;  %v11373_v44 = vld [vmem:[#allocation20_spill] sm:$0xff] }
 0x33f   : > { %v2602_v15 = vsel %vm2487_vm5, %v11360_v31, %v2601_v37  ;;  %v2604_v43 = vsel %vm2487_vm5, %v2601_v37, %v11362_v14  ;;  %v5012_v18 = vmax.f32 %v4950_v20, 0.0  ;;  %v3867_v16 = vrot.slane %v3685_v22, 2 }
 0x340   : > { %v2731_v0 = vadd.f32 %v2602_v15, %v2289_v8  ;;  %v2732_v45 = vadd.f32 %v2604_v43, %v2290_v25  ;;  %v2984_v12 = vsel %vm2867_vm6, %v2981_v54, %v11364_v57  ;;  %v3491_v27 = vsel %vm2487_vm5, %v3488_v21, %v11366_v36  ;;  %v11374_v57 = vld [vmem:[#allocation23_spill] sm:$0xff] }
 0x341   : > { %v4064_v50 = vmul.f32 %v6946_v34, %v8982_v46  ;;  %v5074_v60 = vmin.f32 %v5012_v18, 6.0  ;;  %v5075_v7 = vmin.f32 %v5013_v9, 6.0  ;;  %v4192_v48 = vmul.f32 %v6948_v35, %v8982_v46  ;;  %v6249_v35 = vpop.f32.mrf.mxu1  ;;  %v6599_v18 = vld [vmem:[%s6732_s10 + $0x28] sm:$0xff]  }
 0x342   : > { %v3111_v8 = vadd.f32 %v2982_v33, %v2731_v0  ;;  %v3112_v25 = vadd.f32 %v2984_v12, %v2732_v45  ;;  %v4571_v55 = vmul.f32 %v6596_v13, %v8982_v46  ;;  %v3868_v29 = vsel %vm2867_vm6, %v3865_v40, %v3867_v16  ;;  %v6598_v13 = vld [vmem:[%s6732_s10 + $0x20] sm:$0xff]   ;;  %v11369_v40 = vld [vmem:[#allocation43_spill] sm:$0xff] }
 0x343   : > { %v11368_v37 = vrot.slane %v11367_v42, 2  ;;  %v5109_v34 = vpack.c.bf16 %v5075_v7, %v5074_v60  ;;  %v4374_v21 = vrot.slane %v4192_v48, 1  ;;  %v5279_v20 = vadd.f32 %v10294_v5, %v9842_v2  ;;  %v5372_v0 = vpop.f32.mrf.mxu1  ;;  %v6601_v48 = vld [vmem:[%s6732_s10 + $0x40] sm:$0xff]  }
 0x344   : > { %v3239_v51 = vadd.f32 %v3177_v1, %v3111_v8  ;;  %v3240_v63 = vadd.f32 %v3178_v38, %v3112_v25  ;;  %v4753_v22 = vrot.slane %v4571_v55, 2  ;;  %v5484_v1 = vunpack.c.l.bf16 %v6598_v13  ;;  %v6603_v0 = vld [vmem:[%s6732_s10 + $0x30] sm:$0xff]  }
 0x345   : > { %v3870_v54 = vsel %vm2867_vm6, %v3867_v16, %v11368_v37  ;;  %v5485_v38 = vunpack.c.h.bf16 %v6598_v13  ;;  %6296 = vmatmul.mubr.msk.bf16.gmra.mxu1 %vm5136_vm7, %v5109_v34  ;;  %v4375_v10 = vsel %vm2487_vm5, %v4372_v56, %v4374_v21  ;;  %v11370_v31 = vrot.slane %v11369_v40, 1 }
 0x346   : > { %v3618_v23 = vadd.f32 %v3489_v32, %v3239_v51  ;;  %v3619_v46 = vadd.f32 %v3491_v27, %v3240_v63  ;;  %v4754_v2 = vsel %vm2867_vm6, %v4751_v58, %v4753_v22  ;;  %v11372_v14 = vrot.slane %v11371_v62, 2  ;;  %6299 = vmatprep.mubr.msk.bf16.mxu1 %vm6656_vm4, %v11030_v4  ;;  %v6250_v32 = vpop.f32.mrf.mxu1 }
 0x347   : > { %v4377_v15 = vsel %vm2487_vm5, %v4374_v21, %v11370_v31  ;;  %v5582_v33 = vrot.slane %v5484_v1, 1  ;;  %v5583_v56 = vrot.slane %v5485_v38, 1  ;;  %v4885_v12 = vadd.f32 %v11374_v57, %v11373_v44  ;;  %v6602_v38 = vld [vmem:[%s6732_s10 + $0x48] sm:$0xff]  }
 0x348   : > { %v4756_v43 = vsel %vm2867_vm6, %v4753_v22, %v11372_v14  ;;  %v3997_v45 = vadd.f32 %v3868_v29, %v3618_v23  ;;  %v3998_v30 = vadd.f32 %v3870_v54, %v3619_v46  ;;  %v4886_v49 = vadd.f32 %v9120_v6, %v9115_v3  ;;  %v6600_v3 = vld [vmem:[%s10735_s4] ss:$0 sm:$0xff]  ;;  %v11376_v14 = vld [vmem:[#allocation3_spill] sm:$0xff] }
 0x349   : > { %v5282_v58 = vadd.f32 %v10294_v5, %v9884_v41  ;;  %v5486_v9 = vunpack.c.l.bf16 %v6599_v18  ;;  %v5584_v27 = vsel %vm2487_vm5, %v5582_v33, %v5583_v56  ;;  %v5307_v8 = vadd.f32 %v10294_v5, %v9891_v59  ;;  %v11377_v18 = vld [vmem:[#allocation31_spill] sm:$0xff] }
 0x34a   : > { %v4125_v11 = vadd.f32 %v4063_v28, %v3997_v45  ;;  %v4126_v36 = vadd.f32 %v4064_v50, %v3998_v30  ;;  %v5691_v25 = vadd.f32 %v5584_v27, %v5279_v20  ;;  %v4954_v6 = vadd.f32 %v6600_v3, %v4885_v12  ;;  %v6604_v27 = vld [vmem:[%s6732_s10 + $0x38] sm:$0xff]  }
 0x34b   : > { %v4955_v16 = vadd.f32 %v6600_v3, %v4886_v49  ;;  %v5585_v60 = vrot.slane %v5486_v9, 1  ;;  %v5490_v55 = vunpack.c.l.bf16 %v6601_v48  ;;  %v5491_v17 = vunpack.c.h.bf16 %v6601_v48 }
 0x34c   : > { %v4504_v41 = vadd.f32 %v4375_v10, %v4125_v11  ;;  %v4505_v7 = vadd.f32 %v4377_v15, %v4126_v36  ;;  %6006 = vst.msk [vmem:[%s10355_s29 + $0x10] sm:$0xff] %vm570_vm2, %v5691_v25  ;;  %v5016_v28 = vmax.f32 %v4954_v6, 0.0  ;;  %v4887_v51 = vadd.f32 %v9163_v53, %v9170_v47  ;;  %v11375_v53 = vld [vmem:[#allocation8_spill] sm:$0xff]  ;;  %v10552_v15 = vpop.f32.mrf.mxu1  ;;  %v11378_v6 = vld [vmem:[#allocation21_spill] sm:$0xff] }
 0x34d   : > { %v5017_v50 = vmax.f32 %v4955_v16, 0.0  ;;  %v5586_v59 = vsel %vm2487_vm5, %v5583_v56, %v5585_v60  ;;  %v5592_v37 = vrot.slane %v5490_v55, 1  ;;  %v5593_v21 = vrot.slane %v5491_v17, 1  ;;  %v6605_v60 = vld [vmem:[%s6732_s10 + $0x50] sm:$0xff]  }
 0x34e   : > { %v4883_v63 = vadd.f32 %v4754_v2, %v4504_v41  ;;  %v4884_v29 = vadd.f32 %v4756_v43, %v4505_v7  ;;  %v5692_v42 = vadd.f32 %v5586_v59, %v5282_v58  ;;  %v10538_v54 = vmin.f32 %v5016_v28, 6.0  ;;  %v6253_v57 = vpop.f32.mrf.mxu1  ;;  %v11379_v17 = vld [vmem:[#allocation24_spill] sm:$0xff] }
 0x34f   : > { %v10540_v34 = vmin.f32 %v5017_v50, 6.0  ;;  %v4888_v22 = vadd.f32 %v9168_v52, %v9201_v61  ;;  %v4956_v23 = vadd.f32 %v6600_v3, %v4887_v51  ;;  %v5310_v47 = vadd.f32 %v10294_v5, %v11375_v53  ;;  %v6606_v50 = vld [vmem:[%s6732_s10 + $0x58] sm:$0xff]  }
 0x350   : > { %v4952_v20 = vadd.f32 %v6600_v3, %v4883_v63  ;;  %v4953_v35 = vadd.f32 %v6600_v3, %v4884_v29  ;;  %6007 = vst.msk [vmem:[%s10355_s29 + $0x18] sm:$0xff] %vm570_vm2, %v5692_v42  ;;  %v5594_v13 = vsel %vm2487_vm5, %v5592_v37, %v5593_v21  ;;  %v5492_v10 = vunpack.c.l.bf16 %v6602_v38  ;;  %v10567_v25 = vpop.f32.mrf.mxu1  ;;  %v6608_v38 = vld [vmem:[%s6732_s10 + $0x68] sm:$0xff]  }
 0x351   : > { %v5111_v46 = vpack.c.bf16 %v10540_v34, %v10538_v54  ;;  %v4957_v1 = vadd.f32 %v6600_v3, %v4888_v22  ;;  %v5695_v61 = vadd.f32 %v5594_v13, %v5307_v8  ;;  %v5018_v31 = vmax.f32 %v4956_v23, 0.0  ;;  %v11380_v13 = vld [vmem:[#allocation22_spill] sm:$0xff]  ;;  %v6612_v34 = vld [vmem:[%s6732_s10 + $0x88] sm:$0xff]  }
 0x352   : > { %v5014_v40 = vmax.f32 %v4952_v20, 0.0  ;;  %v5015_v52 = vmax.f32 %v4953_v35, 0.0  ;;  %v5595_v62 = vrot.slane %v5492_v10, 1  ;;  %v5293_v43 = vadd.f32 %v10294_v5, %v11376_v14  ;;  %v6254_v51 = vpop.f32.mrf.mxu1  ;;  %v6607_v20 = vld [vmem:[%s6732_s10 + $0x60] sm:$0xff]  }
 0x353   : > { %v5019_v2 = vmax.f32 %v4957_v1, 0.0  ;;  %v5487_v45 = vunpack.c.l.bf16 %v6603_v0  ;;  %6010 = vst.msk [vmem:[%s10355_s29 + $0x30] sm:$0xff] %vm570_vm2, %v5695_v61  ;;  %v10559_v56 = vmin.f32 %v5018_v31, 6.0  ;;  %v5488_v44 = vunpack.c.h.bf16 %v6603_v0 }
 0x354   : > { %v5076_v30 = vmin.f32 %v5014_v40, 6.0  ;;  %v5077_v33 = vmin.f32 %v5015_v52, 6.0  ;;  %v5596_v49 = vsel %vm2487_vm5, %v5593_v21, %v5595_v62  ;;  %v5296_v9 = vadd.f32 %v10294_v5, %v11377_v18  ;;  %v6609_v62 = vld [vmem:[%s6732_s10 + $0x70] sm:$0xff]  }
 0x355   : > { %v10561_v12 = vmin.f32 %v5019_v2, 6.0  ;;  %v5587_v58 = vrot.slane %v5487_v45, 1  ;;  %v5696_v11 = vadd.f32 %v5596_v49, %v5310_v47  ;;  %v5588_v36 = vrot.slane %v5488_v44, 1 }
 0x356   : > { %v5110_v32 = vpack.c.bf16 %v5077_v33, %v5076_v30  ;;  %v5489_v8 = vunpack.c.l.bf16 %v6604_v27  ;;  %v5321_v16 = vadd.f32 %v10294_v5, %v11378_v6  ;;  %v5493_v41 = vunpack.c.l.bf16 %v6605_v60  ;;  %v6610_v30 = vld [vmem:[%s6732_s10 + $0x78] sm:$0xff]  }
 0x357   : > { %v5112_v3 = vpack.c.bf16 %v10561_v12, %v10559_v56  ;;  %v5494_v7 = vunpack.c.h.bf16 %v6605_v60  ;;  %6011 = vst.msk [vmem:[%s10355_s29 + $0x38] sm:$0xff] %vm570_vm2, %v5696_v11  ;;  %v5589_v48 = vsel %vm2487_vm5, %v5587_v58, %v5588_v36  ;;  %v5324_v28 = vadd.f32 %v10294_v5, %v11379_v17  ;;  %v11381_v58 = vld [vmem:[#allocation25_spill] sm:$0xff]  ;;  %v6611_v11 = vld [vmem:[%s6732_s10 + $0x80] sm:$0xff]   ;;  %v6613_v60 = vld [vmem:[%s6732_s10 + $0x90] sm:$0xff]  }
 0x358   : > { %6300 = vmatmul.mubr.msk.bf16.gmra.mxu1 %vm5136_vm7, %v5110_v32  ;;  %v5590_v55 = vrot.slane %v5489_v8, 1  ;;  %v5495_v59 = vunpack.c.l.bf16 %v6606_v50  ;;  %v5693_v63 = vadd.f32 %v5589_v48, %v5293_v43  ;;  %v5597_v29 = vrot.slane %v5493_v41, 1  ;;  %v6614_v50 = vld [vmem:[%s6732_s10 + $0x98] sm:$0xff]   ;;  %v6615_v56 = vld [vmem:[%s6732_s10 + $0xa0] sm:$0xff]  }
 0x359   : > { %6303 = vmatprep.mubr.msk.bf16.mxu1 %vm6656_vm4, %v11030_v4  ;;  %v5598_v42 = vrot.slane %v5494_v7, 1  ;;  %v5335_v37 = vadd.f32 %v10294_v5, %v10112_v39  ;;  %v5496_v35 = vunpack.c.l.bf16 %v6607_v20  ;;  %v5497_v23 = vunpack.c.h.bf16 %v6607_v20 }
 0x35a   : > { %v5591_v21 = vsel %vm2487_vm5, %v5588_v36, %v5590_v55  ;;  %v5600_v22 = vrot.slane %v5495_v59, 1  ;;  %6008 = vst.msk [vmem:[%s10355_s29 + $0x20] sm:$0xff] %vm570_vm2, %v5693_v63  ;;  %v5338_v1 = vadd.f32 %v10294_v5, %v11380_v13  ;;  %v5498_v39 = vunpack.c.l.bf16 %v6608_v38  ;;  %v5384_v7 = vpop.f32.mrf.mxu1 }
 0x35b   : > { %v5694_v53 = vadd.f32 %v5591_v21, %v5296_v9  ;;  %v5599_v47 = vsel %vm2487_vm5, %v5597_v29, %v5598_v42  ;;  %v5602_v52 = vrot.slane %v5496_v35, 1  ;;  %v5603_v61 = vrot.slane %v5497_v23, 1 }
 0x35c   : > { %v5697_v10 = vadd.f32 %v5599_v47, %v5321_v16  ;;  %v5601_v40 = vsel %vm2487_vm5, %v5598_v42, %v5600_v22  ;;  %v5605_v2 = vrot.slane %v5498_v39, 1  ;;  %v5499_v14 = vunpack.c.l.bf16 %v6609_v62  ;;  %v6257_v51 = vpop.f32.mrf.mxu1  ;;  %v6616_v39 = vld [vmem:[%s6732_s10 + $0xa8] sm:$0xff]  }
 0x35d   : > { %6009 = vst.msk [vmem:[%s10355_s29 + $0x28] sm:$0xff] %vm570_vm2, %v5694_v53  ;;  %v5698_v31 = vadd.f32 %v5601_v40, %v5324_v28  ;;  %v5604_v43 = vsel %vm2487_vm5, %v5602_v52, %v5603_v61  ;;  %v5349_v0 = vadd.f32 %v10294_v5, %v10211_v19  ;;  %v5500_v45 = vunpack.c.h.bf16 %v6609_v62 }
 0x35e   : > { %6012 = vst.msk [vmem:[%s10355_s29 + $0x40] sm:$0xff] %vm570_vm2, %v5697_v10  ;;  %v5501_v33 = vunpack.c.l.bf16 %v6610_v30  ;;  %v5699_v44 = vadd.f32 %v5604_v43, %v5335_v37  ;;  %v5606_v57 = vsel %vm2487_vm5, %v5603_v61, %v5605_v2  ;;  %v5607_v49 = vrot.slane %v5499_v14, 1  ;;  %v5386_v23 = vpop.f32.mrf.mxu1 }
 0x35f   : > { %6013 = vst.msk [vmem:[%s10355_s29 + $0x48] sm:$0xff] %vm570_vm2, %v5698_v31  ;;  %v5352_v18 = vadd.f32 %v10294_v5, %v11381_v58  ;;  %v5700_v19 = vadd.f32 %v5606_v57, %v5338_v1  ;;  %v5608_v9 = vrot.slane %v5500_v45, 1  ;;  %v5502_v36 = vunpack.c.l.bf16 %v6611_v11  ;;  %v6617_v58 = vld [vmem:[%s6732_s10 + $0xb0] sm:$0xff]  }
 0x360   : > { %6304 = vmatmul.mubr.msk.bf16.gmra.mxu1 %vm5136_vm7, %v5111_v46  ;;  %v5610_v32 = vrot.slane %v5501_v33, 1  ;;  %6014 = vst.msk [vmem:[%s10355_s29 + $0x50] sm:$0xff] %vm570_vm2, %v5699_v44  ;;  %v5363_v27 = vadd.f32 %v10294_v5, %v10309_v26  ;;  %v5503_v8 = vunpack.c.h.bf16 %v6611_v11  ;;  %v5366_v54 = vadd.f32 %v10294_v5, %v10335_v24  ;;  %v6258_v53 = vpop.f32.mrf.mxu1  ;;  %v6618_v11 = vld [vmem:[%s6732_s10 + $0xb8] sm:$0xff]  }
 0x361   : > { %6307 = vmatprep.mubr.msk.bf16.mxu1 %vm6656_vm4, %v11030_v4  ;;  %v5504_v46 = vunpack.c.l.bf16 %v6612_v34  ;;  %6015 = vst.msk [vmem:[%s10355_s29 + $0x58] sm:$0xff] %vm570_vm2, %v5700_v19  ;;  %v5609_v6 = vsel %vm2487_vm5, %v5607_v49, %v5608_v9  ;;  %v5612_v16 = vrot.slane %v5502_v36, 1  ;;  %v5505_v41 = vunpack.c.l.bf16 %v6613_v60 }
 0x362   : > { %v5611_v4 = vsel %vm2487_vm5, %v5608_v9, %v5610_v32  ;;  %v5701_v26 = vadd.f32 %v5609_v6, %v5349_v0  ;;  %v5613_v55 = vrot.slane %v5503_v8, 1  ;;  %v5506_v24 = vunpack.c.h.bf16 %v6613_v60 }
 0x363   : > { %v5702_v48 = vadd.f32 %v5611_v4, %v5352_v18  ;;  %v5615_v17 = vrot.slane %v5504_v46, 1  ;;  %v5617_v28 = vrot.slane %v5505_v41, 1  ;;  %v5507_v59 = vunpack.c.l.bf16 %v6614_v50 }
 0x364   : > { %6016 = vst.msk [vmem:[%s10355_s29 + $0x60] sm:$0xff] %vm570_vm2, %v5701_v26  ;;  %v5614_v63 = vsel %vm2487_vm5, %v5612_v16, %v5613_v55  ;;  %v5377_v42 = vadd.f32 %v10294_v5, %v10552_v15  ;;  %v5380_v37 = vadd.f32 %v10294_v5, %v10567_v25  ;;  %v5618_v20 = vrot.slane %v5506_v24, 1  ;;  %v6619_v24 = vld [vmem:[%s6732_s10 + $0xc0] sm:$0xff]  }
 0x365   : > { %6017 = vst.msk [vmem:[%s10355_s29 + $0x68] sm:$0xff] %vm570_vm2, %v5702_v48  ;;  %v5616_v29 = vsel %vm2487_vm5, %v5613_v55, %v5615_v17  ;;  %v5703_v21 = vadd.f32 %v5614_v63, %v5363_v27  ;;  %v5620_v35 = vrot.slane %v5507_v59, 1  ;;  %v5508_v12 = vunpack.c.l.bf16 %v6615_v56  ;;  %v6620_v63 = vld [vmem:[%s6732_s10 + $0xc8] sm:$0xff]  }
 0x366   : > { %v5704_v22 = vadd.f32 %v5616_v29, %v5366_v54  ;;  %v5619_v15 = vsel %vm2487_vm5, %v5617_v28, %v5618_v20  ;;  %v5509_v1 = vunpack.c.h.bf16 %v6615_v56  ;;  %v5510_v10 = vunpack.c.l.bf16 %v6616_v39 }
 0x367   : > { %6018 = vst.msk [vmem:[%s10355_s29 + $0x70] sm:$0xff] %vm570_vm2, %v5703_v21  ;;  %v5621_v25 = vsel %vm2487_vm5, %v5618_v20, %v5620_v35  ;;  %v5705_v47 = vadd.f32 %v5619_v15, %v5377_v42  ;;  %v5511_v18 = vunpack.c.l.bf16 %v6617_v58  ;;  %v5512_v19 = vunpack.c.h.bf16 %v6617_v58 }
 0x368   : > { %6308 = vmatmul.mubr.msk.bf16.gmra.mxu1 %vm5136_vm7, %v5112_v3  ;;  %6019 = vst.msk [vmem:[%s10355_s29 + $0x78] sm:$0xff] %vm570_vm2, %v5704_v22  ;;  %v5706_v13 = vadd.f32 %v5621_v25, %v5380_v37  ;;  %v5622_v3 = vrot.slane %v5508_v12, 1  ;;  %v5623_v38 = vrot.slane %v5509_v1, 1  ;;  %v5625_v61 = vrot.slane %v5510_v10, 1 }
 0x369   : > { %6020 = vst.msk [vmem:[%s10355_s29 + $0x80] sm:$0xff] %vm570_vm2, %v5705_v47  ;;  %v5627_v9 = vrot.slane %v5511_v18, 1  ;;  %v5628_v32 = vrot.slane %v5512_v19, 1  ;;  %v5513_v36 = vunpack.c.l.bf16 %v6618_v11  ;;  %v5514_v28 = vunpack.c.l.bf16 %v6619_v24 }
 0x36a   : > { %6021 = vst.msk [vmem:[%s10355_s29 + $0x88] sm:$0xff] %vm570_vm2, %v5706_v13  ;;  %v5390_v40 = vpop.f32.mrf.mxu1  ;;  %v5624_v52 = vsel %vm2487_vm5, %v5622_v3, %v5623_v38  ;;  %v5626_v43 = vsel %vm2487_vm5, %v5623_v38, %v5625_v61  ;;  %v5515_v50 = vunpack.c.h.bf16 %v6619_v24  ;;  %v5516_v29 = vunpack.c.l.bf16 %v6620_v63  ;;  %v6621_v3 = vld [vmem:[%s6732_s10 + $0xd0] sm:$0xff]  }
 0x36b   : > { %v5391_v31 = vadd.f32 %v10294_v5, %v5390_v40  ;;  %v5629_v8 = vsel %vm2487_vm5, %v5627_v9, %v5628_v32  ;;  %v5630_v54 = vrot.slane %v5513_v36, 1  ;;  %v5632_v59 = vrot.slane %v5514_v28, 1  ;;  %v6623_v9 = vld [vmem:[%s6732_s10 + $0xe0] sm:$0xff]  }
 0x36c   : > { %v6261_v2 = vpop.f32.mrf.mxu1  ;;  %v5633_v51 = vrot.slane %v5515_v50, 1  ;;  %v5635_v21 = vrot.slane %v5516_v29, 1  ;;  %v5517_v38 = vunpack.c.l.bf16 %v6621_v3  ;;  %v5518_v39 = vunpack.c.h.bf16 %v6621_v3  ;;  %v6627_v3 = vld [vmem:[%s6732_s10 + $0x100] sm:$0xff]  }
 0x36d   : > { %v5707_v62 = vadd.f32 %v5624_v52, %v5391_v31  ;;  %v5631_v16 = vsel %vm2487_vm5, %v5628_v32, %v5630_v54  ;;  %v6622_v52 = vld [vmem:[%s6732_s10 + $0xd8] sm:$0xff]   ;;  %v5520_v32 = vunpack.c.l.bf16 %v6623_v9  ;;  %v5521_v11 = vunpack.c.h.bf16 %v6623_v9 }
 0x36e   : > { %v5393_v14 = vpop.f32.mrf.mxu1  ;;  %v5634_v37 = vsel %vm2487_vm5, %v5632_v59, %v5633_v51  ;;  %v5636_v15 = vsel %vm2487_vm5, %v5633_v51, %v5635_v21  ;;  %v5637_v10 = vrot.slane %v5517_v38, 1  ;;  %v5638_v40 = vrot.slane %v5518_v39, 1  ;;  %v6625_v59 = vld [vmem:[%s6732_s10 + $0xf0] sm:$0xff]  }
 0x36f   : > { %6022 = vst.msk [vmem:[%s10355_s29 + $0x90] sm:$0xff] %vm570_vm2, %v5707_v62  ;;  %v5394_v0 = vadd.f32 %v10294_v5, %v5393_v14  ;;  %v5519_v61 = vunpack.c.l.bf16 %v6622_v52  ;;  %v5642_v36 = vrot.slane %v5520_v32, 1  ;;  %v5523_v51 = vunpack.c.l.bf16 %v6625_v59 }
 0x370   : > { %v6262_v45 = vpop.f32.mrf.mxu1  ;;  %v5639_v2 = vsel %vm2487_vm5, %v5637_v10, %v5638_v40  ;;  %v5524_v63 = vunpack.c.h.bf16 %v6625_v59  ;;  %v5526_v38 = vunpack.c.l.bf16 %v6627_v3  ;;  %v5527_v39 = vunpack.c.h.bf16 %v6627_v3 }
 0x371   : > { %v5708_v30 = vadd.f32 %v5626_v43, %v5394_v0  ;;  %v5640_v62 = vrot.slane %v5519_v61, 1  ;;  %v5647_v29 = vrot.slane %v5523_v51, 1 }
 0x372   : > { %v5652_v52 = vrot.slane %v5526_v38, 1  ;;  %v5653_v61 = vrot.slane %v5527_v39, 1 }
 0x373   : > { %6023 = vst.msk [vmem:[%s10355_s29 + $0x98] sm:$0xff] %vm570_vm2, %v5708_v30  ;;  %v5641_v30 = vsel %vm2487_vm5, %v5638_v40, %v5640_v62 }
 0x37b   : > { %v5398_v33 = vpop.f32.mrf.mxu1 }
 0x37d   : > { %v6265_v44 = vpop.f32.mrf.mxu1 }
 0x37f   : > { %v5400_v57 = vpop.f32.mrf.mxu1 }
 0x381   : > { %v6266_v49 = vpop.f32.mrf.mxu1 }
 0x38b   : > { %v5404_v27 = vpop.f32.mrf.mxu1 }
 0x38c   : > { %v5405_v34 = vadd.f32 %v10294_v5, %v5404_v27  ;;  %v5643_v27 = vrot.slane %v5521_v11, 1 }
 0x38d   : > { %v6269_v46 = vpop.f32.mrf.mxu1 }
 0x38e   : > { %v5709_v6 = vadd.f32 %v5629_v8, %v5405_v34  ;;  %v6624_v8 = vld [vmem:[%s6732_s10 + $0xe8] sm:$0xff]   ;;  %v5644_v46 = vsel %vm2487_vm5, %v5642_v36, %v5643_v27 }
 0x38f   : > { %v5407_v4 = vpop.f32.mrf.mxu1  ;;  %v5522_v54 = vunpack.c.l.bf16 %v6624_v8 }
 0x390   : > { %6024 = vst.msk [vmem:[%s10355_s29 + $0xa0] sm:$0xff] %vm570_vm2, %v5709_v6  ;;  %v5408_v60 = vadd.f32 %v10294_v5, %v5407_v4 }
 0x391   : > { %v6270_v41 = vpop.f32.mrf.mxu1  ;;  %v5645_v6 = vrot.slane %v5522_v54, 1 }
 0x392   : > { %v5710_v7 = vadd.f32 %v5631_v16, %v5408_v60 }
 0x394   : > { %6025 = vst.msk [vmem:[%s10355_s29 + $0xa8] sm:$0xff] %vm570_vm2, %v5710_v7  ;;  %v5646_v7 = vsel %vm2487_vm5, %v5643_v27, %v5645_v6 }
 0x39b   : > { %v5412_v26 = vpop.f32.mrf.mxu1 }
 0x39d   : > { %v6273_v48 = vpop.f32.mrf.mxu1 }
 0x39f   : > { %v5414_v55 = vpop.f32.mrf.mxu1 }
 0x3a1   : > { %v6274_v17 = vpop.f32.mrf.mxu1 }
 0x3ab   : > { %v5418_v42 = vpop.f32.mrf.mxu1 }
 0x3ac   : > { %v5419_v22 = vadd.f32 %v10294_v5, %v5418_v42  ;;  %v5648_v42 = vrot.slane %v5524_v63, 1 }
 0x3ad   : > { %v6277_v20 = vpop.f32.mrf.mxu1 }
 0x3ae   : > { %v5711_v35 = vadd.f32 %v5634_v37, %v5419_v22  ;;  %v6626_v37 = vld [vmem:[%s6732_s10 + $0xf8] sm:$0xff]   ;;  %v5649_v20 = vsel %vm2487_vm5, %v5647_v29, %v5648_v42 }
 0x3af   : > { %v5421_v23 = vpop.f32.mrf.mxu1  ;;  %v5525_v21 = vunpack.c.l.bf16 %v6626_v37 }
 0x3b0   : > { %6026 = vst.msk [vmem:[%s10355_s29 + $0xb0] sm:$0xff] %vm570_vm2, %v5711_v35  ;;  %v5422_v25 = vadd.f32 %v10294_v5, %v5421_v23 }
 0x3b1   : > { %v6278_v53 = vpop.f32.mrf.mxu1  ;;  %v5650_v35 = vrot.slane %v5525_v21, 1 }
 0x3b2   : > { %v5712_v47 = vadd.f32 %v5636_v15, %v5422_v25 }
 0x3b4   : > { %6027 = vst.msk [vmem:[%s10355_s29 + $0xb8] sm:$0xff] %vm570_vm2, %v5712_v47  ;;  %v5651_v47 = vsel %vm2487_vm5, %v5648_v42, %v5650_v35 }
 0x3be   : > { %v5426_v13 = vpop.f32.mrf.mxu1 }
 0x3c0   : > { %v6281_v56 = vpop.f32.mrf.mxu1 }
 0x3c2   : > { %v5428_v12 = vpop.f32.mrf.mxu1 }
 0x3c4   : > { %v6282_v1 = vpop.f32.mrf.mxu1 }
 0x3cf   : > { %v5432_v31 = vpop.f32.mrf.mxu1 }
 0x3d0   : > { %v5433_v14 = vadd.f32 %v10294_v5, %v5432_v31  ;;  %v6628_v31 = vld [vmem:[%s6732_s10 + $0x108] sm:$0xff]  }
 0x3d1   : > { %v6285_v43 = vpop.f32.mrf.mxu1 }
 0x3d2   : > { %v5713_v0 = vadd.f32 %v5639_v2, %v5433_v14  ;;  %v5528_v2 = vunpack.c.l.bf16 %v6628_v31  ;;  %v5654_v43 = vsel %vm2487_vm5, %v5652_v52, %v5653_v61 }
 0x3d3   : > { %v5435_v45 = vpop.f32.mrf.mxu1 }
 0x3d4   : > { %6028 = vst.msk [vmem:[%s10355_s29 + $0xc0] sm:$0xff] %vm570_vm2, %v5713_v0  ;;  %v5436_v33 = vadd.f32 %v10294_v5, %v5435_v45  ;;  %v5655_v0 = vrot.slane %v5528_v2, 1 }
 0x3d5   : > { %v6286_v44 = vpop.f32.mrf.mxu1 }
 0x3d6   : > { %v5714_v57 = vadd.f32 %v5641_v30, %v5436_v33 }
 0x3d8   : > { %6029 = vst.msk [vmem:[%s10355_s29 + $0xc8] sm:$0xff] %vm570_vm2, %v5714_v57  ;;  %v5656_v57 = vsel %vm2487_vm5, %v5653_v61, %v5655_v0 }
 0x3e0   : > { %v5440_v49 = vpop.f32.mrf.mxu1 }
 0x3e2   : > { %v6289_v58 = vpop.f32.mrf.mxu1 }
 0x3e4   : > { %v5442_v18 = vpop.f32.mrf.mxu1 }
 0x3e6   : > { %v6290_v19 = vpop.f32.mrf.mxu1 }
 0x3f2   : > { %v5446_v34 = vpop.f32.mrf.mxu1 }
 0x3f3   : > { %v5447_v4 = vadd.f32 %v10294_v5, %v5446_v34 }
 0x3f4   : > { %v6293_v16 = vpop.f32.mrf.mxu1 }
 0x3f5   : > { %v5715_v60 = vadd.f32 %v5644_v46, %v5447_v4 }
 0x3f6   : > { %v5449_v41 = vpop.f32.mrf.mxu1 }
 0x3f7   : > { %6030 = vst.msk [vmem:[%s10355_s29 + $0xd0] sm:$0xff] %vm570_vm2, %v5715_v60  ;;  %v5450_v26 = vadd.f32 %v10294_v5, %v5449_v41 }
 0x3f8   : > { %v6294_v48 = vpop.f32.mrf.mxu1 }
 0x3f9   : > { %v5716_v55 = vadd.f32 %v5646_v7, %v5450_v26 }
 0x3fb   : > { %6031 = vst.msk [vmem:[%s10355_s29 + $0xd8] sm:$0xff] %vm570_vm2, %v5716_v55 }
 0x405   : > { %v5454_v17 = vpop.f32.mrf.mxu1 }
 0x407   : > { %v6297_v24 = vpop.f32.mrf.mxu1 }
 0x409   : > { %v5456_v28 = vpop.f32.mrf.mxu1 }
 0x40b   : > { %v6298_v50 = vpop.f32.mrf.mxu1 }
 0x418   : > { %v5460_v22 = vpop.f32.mrf.mxu1 }
 0x419   : > { %v5461_v23 = vadd.f32 %v10294_v5, %v5460_v22 }
 0x41a   : > { %v6301_v15 = vpop.f32.mrf.mxu1 }
 0x41b   : > { %v5717_v25 = vadd.f32 %v5649_v20, %v5461_v23 }
 0x41c   : > { %v5463_v53 = vpop.f32.mrf.mxu1 }
 0x41d   : > { %6032 = vst.msk [vmem:[%s10355_s29 + $0xe0] sm:$0xff] %vm570_vm2, %v5717_v25  ;;  %v5464_v13 = vadd.f32 %v10294_v5, %v5463_v53 }
 0x41e   : > { %v6302_v56 = vpop.f32.mrf.mxu1 }
 0x41f   : > { %v5718_v12 = vadd.f32 %v5651_v47, %v5464_v13 }
 0x420   : > { %v5468_v1 = vpop.f32.mrf.mxu1 }
 0x421   : > { %6033 = vst.msk [vmem:[%s10355_s29 + $0xe8] sm:$0xff] %vm570_vm2, %v5718_v12 }
 0x422   : > { %v6305_v10 = vpop.f32.mrf.mxu1 }
 0x424   : > { %v5470_v40 = vpop.f32.mrf.mxu1 }
 0x426   : > { %v6306_v62 = vpop.f32.mrf.mxu1 }
 0x428   : > { %v5474_v14 = vpop.f32.mrf.mxu1 }
 0x429   : > { %v5475_v45 = vadd.f32 %v10294_v5, %v5474_v14 }
 0x42a   : > { %v6309_v30 = vpop.f32.mrf.mxu1 }
 0x42b   : > { %v5719_v33 = vadd.f32 %v5654_v43, %v5475_v45 }
 0x42c   : > { %v5477_v44 = vpop.f32.mrf.mxu1 }
 0x42d   : > { %6034 = vst.msk [vmem:[%s10355_s29 + $0xf0] sm:$0xff] %vm570_vm2, %v5719_v33  ;;  %v5478_v49 = vadd.f32 %v10294_v5, %v5477_v44 }
 0x42e   : > { %v6310_v58 = vpop.f32.mrf.mxu1 }
 0x42f   : > { %v5720_v18 = vadd.f32 %v5656_v57, %v5478_v49 }
 0x431   : > { %6035 = vst.msk [vmem:[%s10355_s29 + $0xf8] sm:$0xff] %vm570_vm2, %v5720_v18 }
 0x432 PF: > { %s17_s26 = sadd.s32 1, %s6651_s26   ;;  %s11382_s24 = smov %s6647_s25 }
 0x433   : > { %p14_p5 = scmp.ge.s32.totalorder %s17_s26, 4   ;;  %s11383_s25 = smov %s11385_s27 }
 0x435   :  { %16 = sbr.rel (!%p14_p5) target bundleno = 2 (0x2), region = 94 }

</bundles_post_ra>
